<compile_context>
chip_gen: v7x
topology: tpu7x:2x2x1
jax: 0.10.0
libtpu: 0.0.40
codegen_flags: <defaults>
</compile_context>

<pallas_src>
import functools
import math

import jax
import jax.numpy as jnp
import numpy as np
from jax.experimental import pallas as pl
from jax.experimental.pallas import tpu as pltpu


_ACT_DTYPE = jnp.bfloat16          # activation / weight-operator MXU dtype
_VMEM_LIMIT = 32 * 1024 * 1024     # explicit scoped-VMEM limit (v5e/v6e/v7x safe)
_OUT_LANES = 128                   # padded logits lane width  (dense vst)
_OUT_SUBLANES = 8                  # padded logits rows / image (dense vst)


# ----------------------------------------------------------------------------
# The fused whole-network kernel
# ----------------------------------------------------------------------------
def _resnet_kernel(*refs, plan):
    """refs = (x_ref, *param_refs, out_ref); plan is a static op list."""
    x_ref = refs[0]
    out_ref = refs[-1]
    params = refs[1:-1]
    pos = 0

    def take():
        nonlocal pos
        r = params[pos]
        pos += 1
        return r

    def conv(x, s_ref, b_ref, bias_ref):
        # x:        (rows_in,  Win*Cin)  bf16
        # b_ref[kh]:(Win*Cin,  Wo*Cout)  bf16  banded weight operator
        # s_ref[kh]:(rows_out, rows_in)  f32   row-shift operator
        acc = None
        for kh in range(3):
            p = jnp.dot(x, b_ref[kh], preferred_element_type=jnp.float32)
            t = jnp.dot(s_ref[kh], p, preferred_element_type=jnp.float32)
            acc = t if acc is None else acc + t
        return acc + bias_ref[...]

    x = x_ref[...]                                   # (Nb*H, W*Cin) bf16
    for step in plan:
        if step == "stem":
            s, b, bias = take(), take(), take()
            x = jnp.maximum(conv(x, s, b, bias), 0.0).astype(_ACT_DTYPE)

        elif step in ("block_id", "block_proj"):
            s1, b1, bias1 = take(), take(), take()
            s2, b2, bias2 = take(), take(), take()
            if step == "block_proj":
                # option-A shortcut: ::2 subsample + zero channel padding,
                # expressed as two matmuls with constant selection operators.
                ssc, psc = take(), take()
                res = jnp.dot(
                    ssc[...],
                    jnp.dot(x, psc[...], preferred_element_type=jnp.float32),
                    preferred_element_type=jnp.float32)
            else:
                res = x.astype(jnp.float32)
            h = jnp.maximum(conv(x, s1, b1, bias1), 0.0).astype(_ACT_DTYPE)
            y = conv(h, s2, b2, bias2) + res
            x = jnp.maximum(y, 0.0).astype(_ACT_DTYPE)

        else:  # "head": global average pool folded into the Linear weight.
            l, rlin, bias = take(), take(), take()
            feat = jnp.dot(x.astype(jnp.float32), rlin[...],
                           preferred_element_type=jnp.float32)
            out_ref[...] = (jnp.dot(l[...], feat,
                                    preferred_element_type=jnp.float32)
                            + bias[...])


# ----------------------------------------------------------------------------
# Host-side operator construction (lane-dense conv / shortcut / head matrices)
# ----------------------------------------------------------------------------
def _conv_operators(wf, Hin, Win, stride, Nb):
    """wf: (3,3,Cin,Cout) f32 numpy (BN already folded).  Returns (S, B, Ho, Wo).

    out2[n*Ho+ho, wo*Cout+co] = sum_kh (S[kh] @ X2 @ B[kh])[...], where
    X2[n*Hin+h, w*Cin+ci] = x[n, h, w, ci]  (zero-padded 3x3 conv, given stride).
    """
    Cin, Cout = wf.shape[2], wf.shape[3]
    Ho = (Hin + 2 - 3) // stride + 1
    Wo = (Win + 2 - 3) // stride + 1

    B = np.zeros((3, Win * Cin, Wo * Cout), np.float32)
    for kh in range(3):
        for kw in range(3):
            for wo in range(Wo):
                w_in = stride * wo + kw - 1
                if 0 <= w_in < Win:
                    B[kh, w_in * Cin:(w_in + 1) * Cin,
                      wo * Cout:(wo + 1) * Cout] = wf[kh, kw]

    S = np.zeros((3, Nb * Ho, Nb * Hin), np.float32)
    for kh in range(3):
        for n in range(Nb):
            for ho in range(Ho):
                h_in = stride * ho + kh - 1
                if 0 <= h_in < Hin:
                    S[kh, n * Ho + ho, n * Hin + h_in] = 1.0
    return S, B, Ho, Wo


def _shortcut_operators(Cin, Cout, Hin, Win, Nb):
    """Option-A shortcut (x[:, :, ::2, ::2] + zero channel pad) as matmuls."""
    Ho, Wo = (Hin + 1) // 2, (Win + 1) // 2
    pad = Cout // 4
    assert Cin + 2 * pad == Cout, "option-A shortcut assumes planes == 2*in_planes"

    P = np.zeros((Win * Cin, Wo * Cout), np.float32)
    eye = np.eye(Cin, dtype=np.float32)
    for wo in range(Wo):
        w_in = 2 * wo
        P[w_in * Cin:(w_in + 1) * Cin,
          wo * Cout + pad: wo * Cout + pad + Cin] = eye

    S = np.zeros((Nb * Ho, Nb * Hin), np.float32)
    for n in range(Nb):
        for ho in range(Ho):
            S[n * Ho + ho, n * Hin + 2 * ho] = 1.0
    return S, P


def build_model(params, *, H, W, batch_tile=1):
    """Precompute all lane-dense operators for a fixed input spatial size."""
    Nb = batch_tile
    assert H % 4 == 0 and W % 4 == 0, "spatial dims must be divisible by 4"
    num_classes = params["linear_w"].shape[1]
    assert num_classes <= _OUT_LANES

    flat, plan = [], []

    def add_conv(conv_p, Hin, Win, stride):
        wf = np.asarray(conv_p["w"], np.float32)
        Cout = wf.shape[3]
        S, B, Ho, Wo = _conv_operators(wf, Hin, Win, stride, Nb)
        brow = np.tile(np.asarray(conv_p["b"], np.float32), Wo).reshape(1, Wo * Cout)
        flat.extend([jnp.asarray(S, jnp.float32),
                     jnp.asarray(B, _ACT_DTYPE),
                     jnp.asarray(brow, jnp.float32)])
        return Ho, Wo, Cout

    plan.append("stem")
    Hc, Wc, Cc = add_conv(params["conv1"], H, W, 1)

    for layer in params["layers"]:
        for blk in layer:
            stride = blk["stride"]
            proj = stride != 1 or blk["in_planes"] != blk["planes"]
            plan.append("block_proj" if proj else "block_id")
            Hin, Win, Cin = Hc, Wc, Cc
            Hc, Wc, Cc = add_conv(blk["conv1"], Hin, Win, stride)
            add_conv(blk["conv2"], Hc, Wc, 1)
            if proj:
                Ssc, Psc = _shortcut_operators(Cin, Cc, Hin, Win, Nb)
                flat.extend([jnp.asarray(Ssc, jnp.float32),
                             jnp.asarray(Psc, _ACT_DTYPE)])

    plan.append("head")
    H3, W3, C3 = Hc, Wc, Cc
    L = np.zeros((Nb * _OUT_SUBLANES, Nb * H3), np.float32)
    for n in range(Nb):
        L[n * _OUT_SUBLANES, n * H3:(n + 1) * H3] = 1.0 / H3
    R = np.zeros((W3 * C3, C3), np.float32)
    for w in range(W3):
        R[w * C3:(w + 1) * C3, :] = np.eye(C3, dtype=np.float32) / W3
    rlin = R @ np.asarray(params["linear_w"], np.float32)   # pooling folded into Linear
    rlin_pad = np.zeros((W3 * C3, _OUT_LANES), np.float32)
    rlin_pad[:, :num_classes] = rlin
    b_pad = np.zeros((1, _OUT_LANES), np.float32)
    b_pad[0, :num_classes] = np.asarray(params["linear_b"], np.float32)
    flat.extend([jnp.asarray(L, jnp.float32),
                 jnp.asarray(rlin_pad, jnp.float32),
                 jnp.asarray(b_pad, jnp.float32)])

    return {"flat": tuple(flat), "plan": tuple(plan),
            "H": H, "W": W, "in_channels": int(params["conv1"]["w"].shape[2]),
            "batch_tile": Nb, "num_classes": num_classes}


# ----------------------------------------------------------------------------
# Forward pass (one pallas_call)
# ----------------------------------------------------------------------------
def _replicated_spec(arr):
    nd = arr.ndim
    return pl.BlockSpec(tuple(arr.shape), lambda i, _nd=nd: (0,) * _nd)


def resnet_forward(model, x_nchw):
    N, C, H, W = x_nchw.shape
    Nb = model["batch_tile"]
    assert H == model["H"] and W == model["W"] and C == model["in_channels"]
    assert N % Nb == 0

    # NCHW -> lane-dense (N*H, W*C) bf16.
    x2d = jnp.transpose(x_nchw, (0, 2, 3, 1)).reshape(N * H, W * C)
    x2d = x2d.astype(_ACT_DTYPE)

    flat = model["flat"]
    in_specs = [pl.BlockSpec((Nb * H, W * C), lambda i: (i, 0))]
    in_specs += [_replicated_spec(a) for a in flat]
    out_specs = pl.BlockSpec((Nb * _OUT_SUBLANES, _OUT_LANES), lambda i: (i, 0))

    kernel = functools.partial(_resnet_kernel, plan=model["plan"])
    padded = pl.pallas_call(
        kernel,
        out_shape=jax.ShapeDtypeStruct((N * _OUT_SUBLANES, _OUT_LANES), jnp.float32),
        grid=(N // Nb,),
        in_specs=in_specs,
        out_specs=out_specs,
        compiler_params=pltpu.CompilerParams(
            dimension_semantics=("parallel",),
            vmem_limit_bytes=_VMEM_LIMIT,
        ),
    )(x2d, *flat)

    ncls = model["num_classes"]
    return padded.reshape(N, _OUT_SUBLANES, _OUT_LANES)[:, 0, :ncls]


# ----------------------------------------------------------------------------
# Deterministic parameter init (inference-mode BN folded into conv weights)
# ----------------------------------------------------------------------------
def _kaiming_conv(key, cin, cout):
    fan_in = 9 * cin
    std = math.sqrt(2.0 / fan_in)
    return jax.random.normal(key, (3, 3, cin, cout), jnp.float32) * std


def _bn_params(key, c, eps=1e-5):
    k1, k2, k3, k4 = jax.random.split(key, 4)
    gamma = 1.0 + 0.1 * jax.random.normal(k1, (c,), jnp.float32)
    beta = 0.1 * jax.random.normal(k2, (c,), jnp.float32)
    mean = 0.1 * jax.random.normal(k3, (c,), jnp.float32)
    var = jnp.abs(1.0 + 0.1 * jax.random.normal(k4, (c,), jnp.float32))
    scale = gamma / jnp.sqrt(var + eps)
    bias = beta - mean * scale
    return scale, bias


def _fold_conv_bn(wkey, bnkey, cin, cout):
    w = _kaiming_conv(wkey, cin, cout)
    scale, bias = _bn_params(bnkey, cout)
    return {"w": w * scale.reshape(1, 1, 1, cout), "b": bias}


def init_resnet_params(key, num_blocks=(1, 1, 1), num_classes=10):
    keys = iter(jax.random.split(key, 256))
    params = {"conv1": _fold_conv_bn(next(keys), next(keys), 3, 16)}

    in_planes = 16
    layers = []
    for planes, nb, first_stride in zip((16, 32, 64), num_blocks, (1, 2, 2)):
        blocks = []
        for s in [first_stride] + [1] * (nb - 1):
            blocks.append({
                "conv1": _fold_conv_bn(next(keys), next(keys), in_planes, planes),
                "conv2": _fold_conv_bn(next(keys), next(keys), planes, planes),
                "stride": s, "in_planes": in_planes, "planes": planes,
            })
            in_planes = planes   # BasicBlock.expansion == 1
        layers.append(blocks)
    params["layers"] = layers

    # nn.Linear(64, num_classes): kaiming_normal_ weight, default bias init.
    std = math.sqrt(2.0 / 64)
    params["linear_w"] = jax.random.normal(next(keys), (64, num_classes), jnp.float32) * std
    bound = 1.0 / math.sqrt(64)
    params["linear_b"] = jax.random.uniform(next(keys), (num_classes,), jnp.float32,
                                            minval=-bound, maxval=bound)
    return params


# ----------------------------------------------------------------------------
# Pure-JAX (XLA) f32 reference with the same folded-BN parameters
# ----------------------------------------------------------------------------
def resnet_reference(params, x_nchw):
    def conv(x, p, stride):
        y = jax.lax.conv_general_dilated(
            x, p["w"], window_strides=(stride, stride), padding=((1, 1), (1, 1)),
            dimension_numbers=("NHWC", "HWIO", "NHWC"))
        return y + p["b"]

    x = jnp.transpose(x_nchw, (0, 2, 3, 1)).astype(jnp.float32)
    out = jax.nn.relu(conv(x, params["conv1"], 1))
    for layer in params["layers"]:
        for blk in layer:
            s = blk["stride"]
            h = jax.nn.relu(conv(out, blk["conv1"], s))
            h = conv(h, blk["conv2"], 1)
            if s != 1 or blk["in_planes"] != blk["planes"]:
                sc = out[:, ::2, ::2, :]
                pad = blk["planes"] // 4
                sc = jnp.pad(sc, ((0, 0), (0, 0), (0, 0), (pad, pad)))
            else:
                sc = out
            out = jax.nn.relu(h + sc)
    pooled = jnp.mean(out, axis=(1, 2))
    return pooled @ params["linear_w"] + params["linear_b"]


# ----------------------------------------------------------------------------
if __name__ == "__main__":
    key = jax.random.PRNGKey(0)
    kx, kp = jax.random.split(key)

    # Small CIFAR-like input: batch=2, channels=3, spatial=16x16 (NCHW).
    N, C, H, W = 2, 3, 16, 16
    x = jax.random.normal(kx, (N, C, H, W), jnp.float32)

    params = init_resnet_params(kp, num_blocks=(1, 1, 1), num_classes=10)
    model = build_model(params, H=H, W=W, batch_tile=1)

    fwd = jax.jit(lambda xx: resnet_forward(model, xx))
    out = fwd(x)
    jax.block_until_ready(out)

    assert out.shape == (N, 10), out.shape
    assert out.dtype == jnp.float32
    assert bool(jnp.all(jnp.isfinite(out)))

    # Cross-check vs. pure-JAX f32 reference (bf16 kernel => loose tolerance).
    ref = jax.jit(lambda xx: resnet_reference(params, xx))(x)
    err = float(jnp.max(jnp.abs(out - ref)))
    assert err < 0.15, f"max |kernel - reference| = {err}"

    print("KERNEL_OK")
</pallas_src>

<mosaic_0001>
module attributes {stable_mosaic.version = 11 : i64} {
  func.func @_resnet_kernel(%arg0: i32, %arg1: memref<16x48xbf16, #tpu.memory_space<vmem>>, %arg2: memref<3x16x16xf32, #tpu.memory_space<vmem>>, %arg3: memref<3x48x256xbf16, #tpu.memory_space<vmem>>, %arg4: memref<1x256xf32, #tpu.memory_space<vmem>>, %arg5: memref<3x16x16xf32, #tpu.memory_space<vmem>>, %arg6: memref<3x256x256xbf16, #tpu.memory_space<vmem>>, %arg7: memref<1x256xf32, #tpu.memory_space<vmem>>, %arg8: memref<3x16x16xf32, #tpu.memory_space<vmem>>, %arg9: memref<3x256x256xbf16, #tpu.memory_space<vmem>>, %arg10: memref<1x256xf32, #tpu.memory_space<vmem>>, %arg11: memref<3x8x16xf32, #tpu.memory_space<vmem>>, %arg12: memref<3x256x256xbf16, #tpu.memory_space<vmem>>, %arg13: memref<1x256xf32, #tpu.memory_space<vmem>>, %arg14: memref<3x8x8xf32, #tpu.memory_space<vmem>>, %arg15: memref<3x256x256xbf16, #tpu.memory_space<vmem>>, %arg16: memref<1x256xf32, #tpu.memory_space<vmem>>, %arg17: memref<8x16xf32, #tpu.memory_space<vmem>>, %arg18: memref<256x256xbf16, #tpu.memory_space<vmem>>, %arg19: memref<3x4x8xf32, #tpu.memory_space<vmem>>, %arg20: memref<3x256x256xbf16, #tpu.memory_space<vmem>>, %arg21: memref<1x256xf32, #tpu.memory_space<vmem>>, %arg22: memref<3x4x4xf32, #tpu.memory_space<vmem>>, %arg23: memref<3x256x256xbf16, #tpu.memory_space<vmem>>, %arg24: memref<1x256xf32, #tpu.memory_space<vmem>>, %arg25: memref<4x8xf32, #tpu.memory_space<vmem>>, %arg26: memref<256x256xbf16, #tpu.memory_space<vmem>>, %arg27: memref<8x4xf32, #tpu.memory_space<vmem>>, %arg28: memref<256x128xf32, #tpu.memory_space<vmem>>, %arg29: memref<1x128xf32, #tpu.memory_space<vmem>>, %arg30: memref<8x128xf32, #tpu.memory_space<vmem>>) attributes {dimension_semantics = [#tpu.dimension_semantics<parallel>], iteration_bounds = array<i64: 2>, scalar_prefetch = 0 : i64, scratch_operands = 0 : i64, tpu.core_type = #tpu.core_type<tc>, window_params = [{transform_indices = @transform_0, window_bounds = array<i64: 16, 48>}, {pipeline_mode = #tpu.pipeline_mode<synchronous>, transform_indices = @transform_1, window_bounds = array<i64: 3, 16, 16>}, {pipeline_mode = #tpu.pipeline_mode<synchronous>, transform_indices = @transform_2, window_bounds = array<i64: 3, 48, 256>}, {pipeline_mode = #tpu.pipeline_mode<synchronous>, transform_indices = @transform_3, window_bounds = array<i64: 1, 256>}, {pipeline_mode = #tpu.pipeline_mode<synchronous>, transform_indices = @transform_4, window_bounds = array<i64: 3, 16, 16>}, {pipeline_mode = #tpu.pipeline_mode<synchronous>, transform_indices = @transform_5, window_bounds = array<i64: 3, 256, 256>}, {pipeline_mode = #tpu.pipeline_mode<synchronous>, transform_indices = @transform_6, window_bounds = array<i64: 1, 256>}, {pipeline_mode = #tpu.pipeline_mode<synchronous>, transform_indices = @transform_7, window_bounds = array<i64: 3, 16, 16>}, {pipeline_mode = #tpu.pipeline_mode<synchronous>, transform_indices = @transform_8, window_bounds = array<i64: 3, 256, 256>}, {pipeline_mode = #tpu.pipeline_mode<synchronous>, transform_indices = @transform_9, window_bounds = array<i64: 1, 256>}, {pipeline_mode = #tpu.pipeline_mode<synchronous>, transform_indices = @transform_10, window_bounds = array<i64: 3, 8, 16>}, {pipeline_mode = #tpu.pipeline_mode<synchronous>, transform_indices = @transform_11, window_bounds = array<i64: 3, 256, 256>}, {pipeline_mode = #tpu.pipeline_mode<synchronous>, transform_indices = @transform_12, window_bounds = array<i64: 1, 256>}, {pipeline_mode = #tpu.pipeline_mode<synchronous>, transform_indices = @transform_13, window_bounds = array<i64: 3, 8, 8>}, {pipeline_mode = #tpu.pipeline_mode<synchronous>, transform_indices = @transform_14, window_bounds = array<i64: 3, 256, 256>}, {pipeline_mode = #tpu.pipeline_mode<synchronous>, transform_indices = @transform_15, window_bounds = array<i64: 1, 256>}, {pipeline_mode = #tpu.pipeline_mode<synchronous>, transform_indices = @transform_16, window_bounds = array<i64: 8, 16>}, {pipeline_mode = #tpu.pipeline_mode<synchronous>, transform_indices = @transform_17, window_bounds = array<i64: 256, 256>}, {pipeline_mode = #tpu.pipeline_mode<synchronous>, transform_indices = @transform_18, window_bounds = array<i64: 3, 4, 8>}, {pipeline_mode = #tpu.pipeline_mode<synchronous>, transform_indices = @transform_19, window_bounds = array<i64: 3, 256, 256>}, {pipeline_mode = #tpu.pipeline_mode<synchronous>, transform_indices = @transform_20, window_bounds = array<i64: 1, 256>}, {pipeline_mode = #tpu.pipeline_mode<synchronous>, transform_indices = @transform_21, window_bounds = array<i64: 3, 4, 4>}, {pipeline_mode = #tpu.pipeline_mode<synchronous>, transform_indices = @transform_22, window_bounds = array<i64: 3, 256, 256>}, {pipeline_mode = #tpu.pipeline_mode<synchronous>, transform_indices = @transform_23, window_bounds = array<i64: 1, 256>}, {pipeline_mode = #tpu.pipeline_mode<synchronous>, transform_indices = @transform_24, window_bounds = array<i64: 4, 8>}, {pipeline_mode = #tpu.pipeline_mode<synchronous>, transform_indices = @transform_25, window_bounds = array<i64: 256, 256>}, {pipeline_mode = #tpu.pipeline_mode<synchronous>, transform_indices = @transform_26, window_bounds = array<i64: 8, 4>}, {pipeline_mode = #tpu.pipeline_mode<synchronous>, transform_indices = @transform_27, window_bounds = array<i64: 256, 128>}, {pipeline_mode = #tpu.pipeline_mode<synchronous>, transform_indices = @transform_28, window_bounds = array<i64: 1, 128>}, {transform_indices = @transform_29, window_bounds = array<i64: 8, 128>}]} {
    %c0 = arith.constant 0 : index
    %c0_0 = arith.constant 0 : index
    %0 = vector.load %arg1[%c0, %c0_0] : memref<16x48xbf16, #tpu.memory_space<vmem>>, vector<16x48xbf16>
    %c0_1 = arith.constant 0 : index
    %c0_2 = arith.constant 0 : index
    %c0_3 = arith.constant 0 : index
    %1 = vector.load %arg3[%c0_1, %c0_2, %c0_3] : memref<3x48x256xbf16, #tpu.memory_space<vmem>>, vector<1x48x256xbf16>
    %2 = vector.shape_cast %1 : vector<1x48x256xbf16> to vector<48x256xbf16>
    %cst = arith.constant dense<0.000000e+00> : vector<16x256xf32>
    %3 = tpu.matmul %0, %2, %cst {dimension_numbers = #tpu.dot_dimension_numbers<[1], [0], [0], [1], [0, 0, 1, 1], [], []>} : vector<16x48xbf16>, vector<48x256xbf16>, vector<16x256xf32> -> vector<16x256xf32>
    %c0_4 = arith.constant 0 : index
    %c0_5 = arith.constant 0 : index
    %c0_6 = arith.constant 0 : index
    %4 = vector.load %arg2[%c0_4, %c0_5, %c0_6] : memref<3x16x16xf32, #tpu.memory_space<vmem>>, vector<1x16x16xf32>
    %5 = vector.shape_cast %4 : vector<1x16x16xf32> to vector<16x16xf32>
    %cst_7 = arith.constant dense<0.000000e+00> : vector<16x256xf32>
    %6 = tpu.matmul %5, %3, %cst_7 {dimension_numbers = #tpu.dot_dimension_numbers<[1], [0], [0], [1], [0, 0, 1, 1], [], []>} : vector<16x16xf32>, vector<16x256xf32>, vector<16x256xf32> -> vector<16x256xf32>
    %c1 = arith.constant 1 : index
    %c0_8 = arith.constant 0 : index
    %c0_9 = arith.constant 0 : index
    %7 = vector.load %arg3[%c1, %c0_8, %c0_9] : memref<3x48x256xbf16, #tpu.memory_space<vmem>>, vector<1x48x256xbf16>
    %8 = vector.shape_cast %7 : vector<1x48x256xbf16> to vector<48x256xbf16>
    %cst_10 = arith.constant dense<0.000000e+00> : vector<16x256xf32>
    %9 = tpu.matmul %0, %8, %cst_10 {dimension_numbers = #tpu.dot_dimension_numbers<[1], [0], [0], [1], [0, 0, 1, 1], [], []>} : vector<16x48xbf16>, vector<48x256xbf16>, vector<16x256xf32> -> vector<16x256xf32>
    %c1_11 = arith.constant 1 : index
    %c0_12 = arith.constant 0 : index
    %c0_13 = arith.constant 0 : index
    %10 = vector.load %arg2[%c1_11, %c0_12, %c0_13] : memref<3x16x16xf32, #tpu.memory_space<vmem>>, vector<1x16x16xf32>
    %11 = vector.shape_cast %10 : vector<1x16x16xf32> to vector<16x16xf32>
    %cst_14 = arith.constant dense<0.000000e+00> : vector<16x256xf32>
    %12 = tpu.matmul %11, %9, %cst_14 {dimension_numbers = #tpu.dot_dimension_numbers<[1], [0], [0], [1], [0, 0, 1, 1], [], []>} : vector<16x16xf32>, vector<16x256xf32>, vector<16x256xf32> -> vector<16x256xf32>
    %13 = arith.addf %6, %12 : vector<16x256xf32>
    %c2 = arith.constant 2 : index
    %c0_15 = arith.constant 0 : index
    %c0_16 = arith.constant 0 : index
    %14 = vector.load %arg3[%c2, %c0_15, %c0_16] : memref<3x48x256xbf16, #tpu.memory_space<vmem>>, vector<1x48x256xbf16>
    %15 = vector.shape_cast %14 : vector<1x48x256xbf16> to vector<48x256xbf16>
    %cst_17 = arith.constant dense<0.000000e+00> : vector<16x256xf32>
    %16 = tpu.matmul %0, %15, %cst_17 {dimension_numbers = #tpu.dot_dimension_numbers<[1], [0], [0], [1], [0, 0, 1, 1], [], []>} : vector<16x48xbf16>, vector<48x256xbf16>, vector<16x256xf32> -> vector<16x256xf32>
    %c2_18 = arith.constant 2 : index
    %c0_19 = arith.constant 0 : index
    %c0_20 = arith.constant 0 : index
    %17 = vector.load %arg2[%c2_18, %c0_19, %c0_20] : memref<3x16x16xf32, #tpu.memory_space<vmem>>, vector<1x16x16xf32>
    %18 = vector.shape_cast %17 : vector<1x16x16xf32> to vector<16x16xf32>
    %cst_21 = arith.constant dense<0.000000e+00> : vector<16x256xf32>
    %19 = tpu.matmul %18, %16, %cst_21 {dimension_numbers = #tpu.dot_dimension_numbers<[1], [0], [0], [1], [0, 0, 1, 1], [], []>} : vector<16x16xf32>, vector<16x256xf32>, vector<16x256xf32> -> vector<16x256xf32>
    %20 = arith.addf %13, %19 : vector<16x256xf32>
    %c0_22 = arith.constant 0 : index
    %c0_23 = arith.constant 0 : index
    %21 = vector.load %arg4[%c0_22, %c0_23] : memref<1x256xf32, #tpu.memory_space<vmem>>, vector<1x256xf32>
    %22 = vector.broadcast %21 : vector<1x256xf32> to vector<16x256xf32>
    %23 = arith.addf %20, %22 : vector<16x256xf32>
    %cst_24 = arith.constant 0.000000e+00 : f32
    %24 = vector.broadcast %cst_24 : f32 to vector<16x256xf32>
    %25 = arith.maximumf %23, %24 : vector<16x256xf32>
    %26 = arith.truncf %25 : vector<16x256xf32> to vector<16x256xbf16>
    %27 = arith.extf %26 : vector<16x256xbf16> to vector<16x256xf32>
    %c0_25 = arith.constant 0 : index
    %c0_26 = arith.constant 0 : index
    %c0_27 = arith.constant 0 : index
    %28 = vector.load %arg6[%c0_25, %c0_26, %c0_27] : memref<3x256x256xbf16, #tpu.memory_space<vmem>>, vector<1x256x256xbf16>
    %29 = vector.shape_cast %28 : vector<1x256x256xbf16> to vector<256x256xbf16>
    %cst_28 = arith.constant dense<0.000000e+00> : vector<16x256xf32>
    %30 = tpu.matmul %26, %29, %cst_28 {dimension_numbers = #tpu.dot_dimension_numbers<[1], [0], [0], [1], [0, 0, 1, 1], [], []>} : vector<16x256xbf16>, vector<256x256xbf16>, vector<16x256xf32> -> vector<16x256xf32>
    %c0_29 = arith.constant 0 : index
    %c0_30 = arith.constant 0 : index
    %c0_31 = arith.constant 0 : index
    %31 = vector.load %arg5[%c0_29, %c0_30, %c0_31] : memref<3x16x16xf32, #tpu.memory_space<vmem>>, vector<1x16x16xf32>
    %32 = vector.shape_cast %31 : vector<1x16x16xf32> to vector<16x16xf32>
    %cst_32 = arith.constant dense<0.000000e+00> : vector<16x256xf32>
    %33 = tpu.matmul %32, %30, %cst_32 {dimension_numbers = #tpu.dot_dimension_numbers<[1], [0], [0], [1], [0, 0, 1, 1], [], []>} : vector<16x16xf32>, vector<16x256xf32>, vector<16x256xf32> -> vector<16x256xf32>
    %c1_33 = arith.constant 1 : index
    %c0_34 = arith.constant 0 : index
    %c0_35 = arith.constant 0 : index
    %34 = vector.load %arg6[%c1_33, %c0_34, %c0_35] : memref<3x256x256xbf16, #tpu.memory_space<vmem>>, vector<1x256x256xbf16>
    %35 = vector.shape_cast %34 : vector<1x256x256xbf16> to vector<256x256xbf16>
    %cst_36 = arith.constant dense<0.000000e+00> : vector<16x256xf32>
    %36 = tpu.matmul %26, %35, %cst_36 {dimension_numbers = #tpu.dot_dimension_numbers<[1], [0], [0], [1], [0, 0, 1, 1], [], []>} : vector<16x256xbf16>, vector<256x256xbf16>, vector<16x256xf32> -> vector<16x256xf32>
    %c1_37 = arith.constant 1 : index
    %c0_38 = arith.constant 0 : index
    %c0_39 = arith.constant 0 : index
    %37 = vector.load %arg5[%c1_37, %c0_38, %c0_39] : memref<3x16x16xf32, #tpu.memory_space<vmem>>, vector<1x16x16xf32>
    %38 = vector.shape_cast %37 : vector<1x16x16xf32> to vector<16x16xf32>
    %cst_40 = arith.constant dense<0.000000e+00> : vector<16x256xf32>
    %39 = tpu.matmul %38, %36, %cst_40 {dimension_numbers = #tpu.dot_dimension_numbers<[1], [0], [0], [1], [0, 0, 1, 1], [], []>} : vector<16x16xf32>, vector<16x256xf32>, vector<16x256xf32> -> vector<16x256xf32>
    %40 = arith.addf %33, %39 : vector<16x256xf32>
    %c2_41 = arith.constant 2 : index
    %c0_42 = arith.constant 0 : index
    %c0_43 = arith.constant 0 : index
    %41 = vector.load %arg6[%c2_41, %c0_42, %c0_43] : memref<3x256x256xbf16, #tpu.memory_space<vmem>>, vector<1x256x256xbf16>
    %42 = vector.shape_cast %41 : vector<1x256x256xbf16> to vector<256x256xbf16>
    %cst_44 = arith.constant dense<0.000000e+00> : vector<16x256xf32>
    %43 = tpu.matmul %26, %42, %cst_44 {dimension_numbers = #tpu.dot_dimension_numbers<[1], [0], [0], [1], [0, 0, 1, 1], [], []>} : vector<16x256xbf16>, vector<256x256xbf16>, vector<16x256xf32> -> vector<16x256xf32>
    %c2_45 = arith.constant 2 : index
    %c0_46 = arith.constant 0 : index
    %c0_47 = arith.constant 0 : index
    %44 = vector.load %arg5[%c2_45, %c0_46, %c0_47] : memref<3x16x16xf32, #tpu.memory_space<vmem>>, vector<1x16x16xf32>
    %45 = vector.shape_cast %44 : vector<1x16x16xf32> to vector<16x16xf32>
    %cst_48 = arith.constant dense<0.000000e+00> : vector<16x256xf32>
    %46 = tpu.matmul %45, %43, %cst_48 {dimension_numbers = #tpu.dot_dimension_numbers<[1], [0], [0], [1], [0, 0, 1, 1], [], []>} : vector<16x16xf32>, vector<16x256xf32>, vector<16x256xf32> -> vector<16x256xf32>
    %47 = arith.addf %40, %46 : vector<16x256xf32>
    %c0_49 = arith.constant 0 : index
    %c0_50 = arith.constant 0 : index
    %48 = vector.load %arg7[%c0_49, %c0_50] : memref<1x256xf32, #tpu.memory_space<vmem>>, vector<1x256xf32>
    %49 = vector.broadcast %48 : vector<1x256xf32> to vector<16x256xf32>
    %50 = arith.addf %47, %49 : vector<16x256xf32>
    %cst_51 = arith.constant 0.000000e+00 : f32
    %51 = vector.broadcast %cst_51 : f32 to vector<16x256xf32>
    %52 = arith.maximumf %50, %51 : vector<16x256xf32>
    %53 = arith.truncf %52 : vector<16x256xf32> to vector<16x256xbf16>
    %c0_52 = arith.constant 0 : index
    %c0_53 = arith.constant 0 : index
    %c0_54 = arith.constant 0 : index
    %54 = vector.load %arg9[%c0_52, %c0_53, %c0_54] : memref<3x256x256xbf16, #tpu.memory_space<vmem>>, vector<1x256x256xbf16>
    %55 = vector.shape_cast %54 : vector<1x256x256xbf16> to vector<256x256xbf16>
    %cst_55 = arith.constant dense<0.000000e+00> : vector<16x256xf32>
    %56 = tpu.matmul %53, %55, %cst_55 {dimension_numbers = #tpu.dot_dimension_numbers<[1], [0], [0], [1], [0, 0, 1, 1], [], []>} : vector<16x256xbf16>, vector<256x256xbf16>, vector<16x256xf32> -> vector<16x256xf32>
    %c0_56 = arith.constant 0 : index
    %c0_57 = arith.constant 0 : index
    %c0_58 = arith.constant 0 : index
    %57 = vector.load %arg8[%c0_56, %c0_57, %c0_58] : memref<3x16x16xf32, #tpu.memory_space<vmem>>, vector<1x16x16xf32>
    %58 = vector.shape_cast %57 : vector<1x16x16xf32> to vector<16x16xf32>
    %cst_59 = arith.constant dense<0.000000e+00> : vector<16x256xf32>
    %59 = tpu.matmul %58, %56, %cst_59 {dimension_numbers = #tpu.dot_dimension_numbers<[1], [0], [0], [1], [0, 0, 1, 1], [], []>} : vector<16x16xf32>, vector<16x256xf32>, vector<16x256xf32> -> vector<16x256xf32>
    %c1_60 = arith.constant 1 : index
    %c0_61 = arith.constant 0 : index
    %c0_62 = arith.constant 0 : index
    %60 = vector.load %arg9[%c1_60, %c0_61, %c0_62] : memref<3x256x256xbf16, #tpu.memory_space<vmem>>, vector<1x256x256xbf16>
    %61 = vector.shape_cast %60 : vector<1x256x256xbf16> to vector<256x256xbf16>
    %cst_63 = arith.constant dense<0.000000e+00> : vector<16x256xf32>
    %62 = tpu.matmul %53, %61, %cst_63 {dimension_numbers = #tpu.dot_dimension_numbers<[1], [0], [0], [1], [0, 0, 1, 1], [], []>} : vector<16x256xbf16>, vector<256x256xbf16>, vector<16x256xf32> -> vector<16x256xf32>
    %c1_64 = arith.constant 1 : index
    %c0_65 = arith.constant 0 : index
    %c0_66 = arith.constant 0 : index
    %63 = vector.load %arg8[%c1_64, %c0_65, %c0_66] : memref<3x16x16xf32, #tpu.memory_space<vmem>>, vector<1x16x16xf32>
    %64 = vector.shape_cast %63 : vector<1x16x16xf32> to vector<16x16xf32>
    %cst_67 = arith.constant dense<0.000000e+00> : vector<16x256xf32>
    %65 = tpu.matmul %64, %62, %cst_67 {dimension_numbers = #tpu.dot_dimension_numbers<[1], [0], [0], [1], [0, 0, 1, 1], [], []>} : vector<16x16xf32>, vector<16x256xf32>, vector<16x256xf32> -> vector<16x256xf32>
    %66 = arith.addf %59, %65 : vector<16x256xf32>
    %c2_68 = arith.constant 2 : index
    %c0_69 = arith.constant 0 : index
    %c0_70 = arith.constant 0 : index
    %67 = vector.load %arg9[%c2_68, %c0_69, %c0_70] : memref<3x256x256xbf16, #tpu.memory_space<vmem>>, vector<1x256x256xbf16>
    %68 = vector.shape_cast %67 : vector<1x256x256xbf16> to vector<256x256xbf16>
    %cst_71 = arith.constant dense<0.000000e+00> : vector<16x256xf32>
    %69 = tpu.matmul %53, %68, %cst_71 {dimension_numbers = #tpu.dot_dimension_numbers<[1], [0], [0], [1], [0, 0, 1, 1], [], []>} : vector<16x256xbf16>, vector<256x256xbf16>, vector<16x256xf32> -> vector<16x256xf32>
    %c2_72 = arith.constant 2 : index
    %c0_73 = arith.constant 0 : index
    %c0_74 = arith.constant 0 : index
    %70 = vector.load %arg8[%c2_72, %c0_73, %c0_74] : memref<3x16x16xf32, #tpu.memory_space<vmem>>, vector<1x16x16xf32>
    %71 = vector.shape_cast %70 : vector<1x16x16xf32> to vector<16x16xf32>
    %cst_75 = arith.constant dense<0.000000e+00> : vector<16x256xf32>
    %72 = tpu.matmul %71, %69, %cst_75 {dimension_numbers = #tpu.dot_dimension_numbers<[1], [0], [0], [1], [0, 0, 1, 1], [], []>} : vector<16x16xf32>, vector<16x256xf32>, vector<16x256xf32> -> vector<16x256xf32>
    %73 = arith.addf %66, %72 : vector<16x256xf32>
    %c0_76 = arith.constant 0 : index
    %c0_77 = arith.constant 0 : index
    %74 = vector.load %arg10[%c0_76, %c0_77] : memref<1x256xf32, #tpu.memory_space<vmem>>, vector<1x256xf32>
    %75 = vector.broadcast %74 : vector<1x256xf32> to vector<16x256xf32>
    %76 = arith.addf %73, %75 : vector<16x256xf32>
    %77 = arith.addf %76, %27 : vector<16x256xf32>
    %cst_78 = arith.constant 0.000000e+00 : f32
    %78 = vector.broadcast %cst_78 : f32 to vector<16x256xf32>
    %79 = arith.maximumf %77, %78 : vector<16x256xf32>
    %80 = arith.truncf %79 : vector<16x256xf32> to vector<16x256xbf16>
    %c0_79 = arith.constant 0 : index
    %c0_80 = arith.constant 0 : index
    %81 = vector.load %arg17[%c0_79, %c0_80] : memref<8x16xf32, #tpu.memory_space<vmem>>, vector<8x16xf32>
    %c0_81 = arith.constant 0 : index
    %c0_82 = arith.constant 0 : index
    %82 = vector.load %arg18[%c0_81, %c0_82] : memref<256x256xbf16, #tpu.memory_space<vmem>>, vector<256x256xbf16>
    %cst_83 = arith.constant dense<0.000000e+00> : vector<16x256xf32>
    %83 = tpu.matmul %80, %82, %cst_83 {dimension_numbers = #tpu.dot_dimension_numbers<[1], [0], [0], [1], [0, 0, 1, 1], [], []>} : vector<16x256xbf16>, vector<256x256xbf16>, vector<16x256xf32> -> vector<16x256xf32>
    %cst_84 = arith.constant dense<0.000000e+00> : vector<8x256xf32>
    %84 = tpu.matmul %81, %83, %cst_84 {dimension_numbers = #tpu.dot_dimension_numbers<[1], [0], [0], [1], [0, 0, 1, 1], [], []>} : vector<8x16xf32>, vector<16x256xf32>, vector<8x256xf32> -> vector<8x256xf32>
    %c0_85 = arith.constant 0 : index
    %c0_86 = arith.constant 0 : index
    %c0_87 = arith.constant 0 : index
    %85 = vector.load %arg12[%c0_85, %c0_86, %c0_87] : memref<3x256x256xbf16, #tpu.memory_space<vmem>>, vector<1x256x256xbf16>
    %86 = vector.shape_cast %85 : vector<1x256x256xbf16> to vector<256x256xbf16>
    %cst_88 = arith.constant dense<0.000000e+00> : vector<16x256xf32>
    %87 = tpu.matmul %80, %86, %cst_88 {dimension_numbers = #tpu.dot_dimension_numbers<[1], [0], [0], [1], [0, 0, 1, 1], [], []>} : vector<16x256xbf16>, vector<256x256xbf16>, vector<16x256xf32> -> vector<16x256xf32>
    %c0_89 = arith.constant 0 : index
    %c0_90 = arith.constant 0 : index
    %c0_91 = arith.constant 0 : index
    %88 = vector.load %arg11[%c0_89, %c0_90, %c0_91] : memref<3x8x16xf32, #tpu.memory_space<vmem>>, vector<1x8x16xf32>
    %89 = vector.shape_cast %88 : vector<1x8x16xf32> to vector<8x16xf32>
    %cst_92 = arith.constant dense<0.000000e+00> : vector<8x256xf32>
    %90 = tpu.matmul %89, %87, %cst_92 {dimension_numbers = #tpu.dot_dimension_numbers<[1], [0], [0], [1], [0, 0, 1, 1], [], []>} : vector<8x16xf32>, vector<16x256xf32>, vector<8x256xf32> -> vector<8x256xf32>
    %c1_93 = arith.constant 1 : index
    %c0_94 = arith.constant 0 : index
    %c0_95 = arith.constant 0 : index
    %91 = vector.load %arg12[%c1_93, %c0_94, %c0_95] : memref<3x256x256xbf16, #tpu.memory_space<vmem>>, vector<1x256x256xbf16>
    %92 = vector.shape_cast %91 : vector<1x256x256xbf16> to vector<256x256xbf16>
    %cst_96 = arith.constant dense<0.000000e+00> : vector<16x256xf32>
    %93 = tpu.matmul %80, %92, %cst_96 {dimension_numbers = #tpu.dot_dimension_numbers<[1], [0], [0], [1], [0, 0, 1, 1], [], []>} : vector<16x256xbf16>, vector<256x256xbf16>, vector<16x256xf32> -> vector<16x256xf32>
    %c1_97 = arith.constant 1 : index
    %c0_98 = arith.constant 0 : index
    %c0_99 = arith.constant 0 : index
    %94 = vector.load %arg11[%c1_97, %c0_98, %c0_99] : memref<3x8x16xf32, #tpu.memory_space<vmem>>, vector<1x8x16xf32>
    %95 = vector.shape_cast %94 : vector<1x8x16xf32> to vector<8x16xf32>
    %cst_100 = arith.constant dense<0.000000e+00> : vector<8x256xf32>
    %96 = tpu.matmul %95, %93, %cst_100 {dimension_numbers = #tpu.dot_dimension_numbers<[1], [0], [0], [1], [0, 0, 1, 1], [], []>} : vector<8x16xf32>, vector<16x256xf32>, vector<8x256xf32> -> vector<8x256xf32>
    %97 = arith.addf %90, %96 : vector<8x256xf32>
    %c2_101 = arith.constant 2 : index
    %c0_102 = arith.constant 0 : index
    %c0_103 = arith.constant 0 : index
    %98 = vector.load %arg12[%c2_101, %c0_102, %c0_103] : memref<3x256x256xbf16, #tpu.memory_space<vmem>>, vector<1x256x256xbf16>
    %99 = vector.shape_cast %98 : vector<1x256x256xbf16> to vector<256x256xbf16>
    %cst_104 = arith.constant dense<0.000000e+00> : vector<16x256xf32>
    %100 = tpu.matmul %80, %99, %cst_104 {dimension_numbers = #tpu.dot_dimension_numbers<[1], [0], [0], [1], [0, 0, 1, 1], [], []>} : vector<16x256xbf16>, vector<256x256xbf16>, vector<16x256xf32> -> vector<16x256xf32>
    %c2_105 = arith.constant 2 : index
    %c0_106 = arith.constant 0 : index
    %c0_107 = arith.constant 0 : index
    %101 = vector.load %arg11[%c2_105, %c0_106, %c0_107] : memref<3x8x16xf32, #tpu.memory_space<vmem>>, vector<1x8x16xf32>
    %102 = vector.shape_cast %101 : vector<1x8x16xf32> to vector<8x16xf32>
    %cst_108 = arith.constant dense<0.000000e+00> : vector<8x256xf32>
    %103 = tpu.matmul %102, %100, %cst_108 {dimension_numbers = #tpu.dot_dimension_numbers<[1], [0], [0], [1], [0, 0, 1, 1], [], []>} : vector<8x16xf32>, vector<16x256xf32>, vector<8x256xf32> -> vector<8x256xf32>
    %104 = arith.addf %97, %103 : vector<8x256xf32>
    %c0_109 = arith.constant 0 : index
    %c0_110 = arith.constant 0 : index
    %105 = vector.load %arg13[%c0_109, %c0_110] : memref<1x256xf32, #tpu.memory_space<vmem>>, vector<1x256xf32>
    %106 = vector.broadcast %105 : vector<1x256xf32> to vector<8x256xf32>
    %107 = arith.addf %104, %106 : vector<8x256xf32>
    %cst_111 = arith.constant 0.000000e+00 : f32
    %108 = vector.broadcast %cst_111 : f32 to vector<8x256xf32>
    %109 = arith.maximumf %107, %108 : vector<8x256xf32>
    %110 = arith.truncf %109 : vector<8x256xf32> to vector<8x256xbf16>
    %c0_112 = arith.constant 0 : index
    %c0_113 = arith.constant 0 : index
    %c0_114 = arith.constant 0 : index
    %111 = vector.load %arg15[%c0_112, %c0_113, %c0_114] : memref<3x256x256xbf16, #tpu.memory_space<vmem>>, vector<1x256x256xbf16>
    %112 = vector.shape_cast %111 : vector<1x256x256xbf16> to vector<256x256xbf16>
    %cst_115 = arith.constant dense<0.000000e+00> : vector<8x256xf32>
    %113 = tpu.matmul %110, %112, %cst_115 {dimension_numbers = #tpu.dot_dimension_numbers<[1], [0], [0], [1], [0, 0, 1, 1], [], []>} : vector<8x256xbf16>, vector<256x256xbf16>, vector<8x256xf32> -> vector<8x256xf32>
    %c0_116 = arith.constant 0 : index
    %c0_117 = arith.constant 0 : index
    %c0_118 = arith.constant 0 : index
    %114 = vector.load %arg14[%c0_116, %c0_117, %c0_118] : memref<3x8x8xf32, #tpu.memory_space<vmem>>, vector<1x8x8xf32>
    %115 = vector.shape_cast %114 : vector<1x8x8xf32> to vector<8x8xf32>
    %cst_119 = arith.constant dense<0.000000e+00> : vector<8x256xf32>
    %116 = tpu.matmul %115, %113, %cst_119 {dimension_numbers = #tpu.dot_dimension_numbers<[1], [0], [0], [1], [0, 0, 1, 1], [], []>} : vector<8x8xf32>, vector<8x256xf32>, vector<8x256xf32> -> vector<8x256xf32>
    %c1_120 = arith.constant 1 : index
    %c0_121 = arith.constant 0 : index
    %c0_122 = arith.constant 0 : index
    %117 = vector.load %arg15[%c1_120, %c0_121, %c0_122] : memref<3x256x256xbf16, #tpu.memory_space<vmem>>, vector<1x256x256xbf16>
    %118 = vector.shape_cast %117 : vector<1x256x256xbf16> to vector<256x256xbf16>
    %cst_123 = arith.constant dense<0.000000e+00> : vector<8x256xf32>
    %119 = tpu.matmul %110, %118, %cst_123 {dimension_numbers = #tpu.dot_dimension_numbers<[1], [0], [0], [1], [0, 0, 1, 1], [], []>} : vector<8x256xbf16>, vector<256x256xbf16>, vector<8x256xf32> -> vector<8x256xf32>
    %c1_124 = arith.constant 1 : index
    %c0_125 = arith.constant 0 : index
    %c0_126 = arith.constant 0 : index
    %120 = vector.load %arg14[%c1_124, %c0_125, %c0_126] : memref<3x8x8xf32, #tpu.memory_space<vmem>>, vector<1x8x8xf32>
    %121 = vector.shape_cast %120 : vector<1x8x8xf32> to vector<8x8xf32>
    %cst_127 = arith.constant dense<0.000000e+00> : vector<8x256xf32>
    %122 = tpu.matmul %121, %119, %cst_127 {dimension_numbers = #tpu.dot_dimension_numbers<[1], [0], [0], [1], [0, 0, 1, 1], [], []>} : vector<8x8xf32>, vector<8x256xf32>, vector<8x256xf32> -> vector<8x256xf32>
    %123 = arith.addf %116, %122 : vector<8x256xf32>
    %c2_128 = arith.constant 2 : index
    %c0_129 = arith.constant 0 : index
    %c0_130 = arith.constant 0 : index
    %124 = vector.load %arg15[%c2_128, %c0_129, %c0_130] : memref<3x256x256xbf16, #tpu.memory_space<vmem>>, vector<1x256x256xbf16>
    %125 = vector.shape_cast %124 : vector<1x256x256xbf16> to vector<256x256xbf16>
    %cst_131 = arith.constant dense<0.000000e+00> : vector<8x256xf32>
    %126 = tpu.matmul %110, %125, %cst_131 {dimension_numbers = #tpu.dot_dimension_numbers<[1], [0], [0], [1], [0, 0, 1, 1], [], []>} : vector<8x256xbf16>, vector<256x256xbf16>, vector<8x256xf32> -> vector<8x256xf32>
    %c2_132 = arith.constant 2 : index
    %c0_133 = arith.constant 0 : index
    %c0_134 = arith.constant 0 : index
    %127 = vector.load %arg14[%c2_132, %c0_133, %c0_134] : memref<3x8x8xf32, #tpu.memory_space<vmem>>, vector<1x8x8xf32>
    %128 = vector.shape_cast %127 : vector<1x8x8xf32> to vector<8x8xf32>
    %cst_135 = arith.constant dense<0.000000e+00> : vector<8x256xf32>
    %129 = tpu.matmul %128, %126, %cst_135 {dimension_numbers = #tpu.dot_dimension_numbers<[1], [0], [0], [1], [0, 0, 1, 1], [], []>} : vector<8x8xf32>, vector<8x256xf32>, vector<8x256xf32> -> vector<8x256xf32>
    %130 = arith.addf %123, %129 : vector<8x256xf32>
    %c0_136 = arith.constant 0 : index
    %c0_137 = arith.constant 0 : index
    %131 = vector.load %arg16[%c0_136, %c0_137] : memref<1x256xf32, #tpu.memory_space<vmem>>, vector<1x256xf32>
    %132 = vector.broadcast %131 : vector<1x256xf32> to vector<8x256xf32>
    %133 = arith.addf %130, %132 : vector<8x256xf32>
    %134 = arith.addf %133, %84 : vector<8x256xf32>
    %cst_138 = arith.constant 0.000000e+00 : f32
    %135 = vector.broadcast %cst_138 : f32 to vector<8x256xf32>
    %136 = arith.maximumf %134, %135 : vector<8x256xf32>
    %137 = arith.truncf %136 : vector<8x256xf32> to vector<8x256xbf16>
    %c0_139 = arith.constant 0 : index
    %c0_140 = arith.constant 0 : index
    %138 = vector.load %arg25[%c0_139, %c0_140] : memref<4x8xf32, #tpu.memory_space<vmem>>, vector<4x8xf32>
    %c0_141 = arith.constant 0 : index
    %c0_142 = arith.constant 0 : index
    %139 = vector.load %arg26[%c0_141, %c0_142] : memref<256x256xbf16, #tpu.memory_space<vmem>>, vector<256x256xbf16>
    %cst_143 = arith.constant dense<0.000000e+00> : vector<8x256xf32>
    %140 = tpu.matmul %137, %139, %cst_143 {dimension_numbers = #tpu.dot_dimension_numbers<[1], [0], [0], [1], [0, 0, 1, 1], [], []>} : vector<8x256xbf16>, vector<256x256xbf16>, vector<8x256xf32> -> vector<8x256xf32>
    %cst_144 = arith.constant dense<0.000000e+00> : vector<4x256xf32>
    %141 = tpu.matmul %138, %140, %cst_144 {dimension_numbers = #tpu.dot_dimension_numbers<[1], [0], [0], [1], [0, 0, 1, 1], [], []>} : vector<4x8xf32>, vector<8x256xf32>, vector<4x256xf32> -> vector<4x256xf32>
    %c0_145 = arith.constant 0 : index
    %c0_146 = arith.constant 0 : index
    %c0_147 = arith.constant 0 : index
    %142 = vector.load %arg20[%c0_145, %c0_146, %c0_147] : memref<3x256x256xbf16, #tpu.memory_space<vmem>>, vector<1x256x256xbf16>
    %143 = vector.shape_cast %142 : vector<1x256x256xbf16> to vector<256x256xbf16>
    %cst_148 = arith.constant dense<0.000000e+00> : vector<8x256xf32>
    %144 = tpu.matmul %137, %143, %cst_148 {dimension_numbers = #tpu.dot_dimension_numbers<[1], [0], [0], [1], [0, 0, 1, 1], [], []>} : vector<8x256xbf16>, vector<256x256xbf16>, vector<8x256xf32> -> vector<8x256xf32>
    %c0_149 = arith.constant 0 : index
    %c0_150 = arith.constant 0 : index
    %c0_151 = arith.constant 0 : index
    %145 = vector.load %arg19[%c0_149, %c0_150, %c0_151] : memref<3x4x8xf32, #tpu.memory_space<vmem>>, vector<1x4x8xf32>
    %146 = vector.shape_cast %145 : vector<1x4x8xf32> to vector<4x8xf32>
    %cst_152 = arith.constant dense<0.000000e+00> : vector<4x256xf32>
    %147 = tpu.matmul %146, %144, %cst_152 {dimension_numbers = #tpu.dot_dimension_numbers<[1], [0], [0], [1], [0, 0, 1, 1], [], []>} : vector<4x8xf32>, vector<8x256xf32>, vector<4x256xf32> -> vector<4x256xf32>
    %c1_153 = arith.constant 1 : index
    %c0_154 = arith.constant 0 : index
    %c0_155 = arith.constant 0 : index
    %148 = vector.load %arg20[%c1_153, %c0_154, %c0_155] : memref<3x256x256xbf16, #tpu.memory_space<vmem>>, vector<1x256x256xbf16>
    %149 = vector.shape_cast %148 : vector<1x256x256xbf16> to vector<256x256xbf16>
    %cst_156 = arith.constant dense<0.000000e+00> : vector<8x256xf32>
    %150 = tpu.matmul %137, %149, %cst_156 {dimension_numbers = #tpu.dot_dimension_numbers<[1], [0], [0], [1], [0, 0, 1, 1], [], []>} : vector<8x256xbf16>, vector<256x256xbf16>, vector<8x256xf32> -> vector<8x256xf32>
    %c1_157 = arith.constant 1 : index
    %c0_158 = arith.constant 0 : index
    %c0_159 = arith.constant 0 : index
    %151 = vector.load %arg19[%c1_157, %c0_158, %c0_159] : memref<3x4x8xf32, #tpu.memory_space<vmem>>, vector<1x4x8xf32>
    %152 = vector.shape_cast %151 : vector<1x4x8xf32> to vector<4x8xf32>
    %cst_160 = arith.constant dense<0.000000e+00> : vector<4x256xf32>
    %153 = tpu.matmul %152, %150, %cst_160 {dimension_numbers = #tpu.dot_dimension_numbers<[1], [0], [0], [1], [0, 0, 1, 1], [], []>} : vector<4x8xf32>, vector<8x256xf32>, vector<4x256xf32> -> vector<4x256xf32>
    %154 = arith.addf %147, %153 : vector<4x256xf32>
    %c2_161 = arith.constant 2 : index
    %c0_162 = arith.constant 0 : index
    %c0_163 = arith.constant 0 : index
    %155 = vector.load %arg20[%c2_161, %c0_162, %c0_163] : memref<3x256x256xbf16, #tpu.memory_space<vmem>>, vector<1x256x256xbf16>
    %156 = vector.shape_cast %155 : vector<1x256x256xbf16> to vector<256x256xbf16>
    %cst_164 = arith.constant dense<0.000000e+00> : vector<8x256xf32>
    %157 = tpu.matmul %137, %156, %cst_164 {dimension_numbers = #tpu.dot_dimension_numbers<[1], [0], [0], [1], [0, 0, 1, 1], [], []>} : vector<8x256xbf16>, vector<256x256xbf16>, vector<8x256xf32> -> vector<8x256xf32>
    %c2_165 = arith.constant 2 : index
    %c0_166 = arith.constant 0 : index
    %c0_167 = arith.constant 0 : index
    %158 = vector.load %arg19[%c2_165, %c0_166, %c0_167] : memref<3x4x8xf32, #tpu.memory_space<vmem>>, vector<1x4x8xf32>
    %159 = vector.shape_cast %158 : vector<1x4x8xf32> to vector<4x8xf32>
    %cst_168 = arith.constant dense<0.000000e+00> : vector<4x256xf32>
    %160 = tpu.matmul %159, %157, %cst_168 {dimension_numbers = #tpu.dot_dimension_numbers<[1], [0], [0], [1], [0, 0, 1, 1], [], []>} : vector<4x8xf32>, vector<8x256xf32>, vector<4x256xf32> -> vector<4x256xf32>
    %161 = arith.addf %154, %160 : vector<4x256xf32>
    %c0_169 = arith.constant 0 : index
    %c0_170 = arith.constant 0 : index
    %162 = vector.load %arg21[%c0_169, %c0_170] : memref<1x256xf32, #tpu.memory_space<vmem>>, vector<1x256xf32>
    %163 = vector.broadcast %162 : vector<1x256xf32> to vector<4x256xf32>
    %164 = arith.addf %161, %163 : vector<4x256xf32>
    %cst_171 = arith.constant 0.000000e+00 : f32
    %165 = vector.broadcast %cst_171 : f32 to vector<4x256xf32>
    %166 = arith.maximumf %164, %165 : vector<4x256xf32>
    %167 = arith.truncf %166 : vector<4x256xf32> to vector<4x256xbf16>
    %c0_172 = arith.constant 0 : index
    %c0_173 = arith.constant 0 : index
    %c0_174 = arith.constant 0 : index
    %168 = vector.load %arg23[%c0_172, %c0_173, %c0_174] : memref<3x256x256xbf16, #tpu.memory_space<vmem>>, vector<1x256x256xbf16>
    %169 = vector.shape_cast %168 : vector<1x256x256xbf16> to vector<256x256xbf16>
    %cst_175 = arith.constant dense<0.000000e+00> : vector<4x256xf32>
    %170 = tpu.matmul %167, %169, %cst_175 {dimension_numbers = #tpu.dot_dimension_numbers<[1], [0], [0], [1], [0, 0, 1, 1], [], []>} : vector<4x256xbf16>, vector<256x256xbf16>, vector<4x256xf32> -> vector<4x256xf32>
    %c0_176 = arith.constant 0 : index
    %c0_177 = arith.constant 0 : index
    %c0_178 = arith.constant 0 : index
    %171 = vector.load %arg22[%c0_176, %c0_177, %c0_178] : memref<3x4x4xf32, #tpu.memory_space<vmem>>, vector<1x4x4xf32>
    %172 = vector.shape_cast %171 : vector<1x4x4xf32> to vector<4x4xf32>
    %cst_179 = arith.constant dense<0.000000e+00> : vector<4x256xf32>
    %173 = tpu.matmul %172, %170, %cst_179 {dimension_numbers = #tpu.dot_dimension_numbers<[1], [0], [0], [1], [0, 0, 1, 1], [], []>} : vector<4x4xf32>, vector<4x256xf32>, vector<4x256xf32> -> vector<4x256xf32>
    %c1_180 = arith.constant 1 : index
    %c0_181 = arith.constant 0 : index
    %c0_182 = arith.constant 0 : index
    %174 = vector.load %arg23[%c1_180, %c0_181, %c0_182] : memref<3x256x256xbf16, #tpu.memory_space<vmem>>, vector<1x256x256xbf16>
    %175 = vector.shape_cast %174 : vector<1x256x256xbf16> to vector<256x256xbf16>
    %cst_183 = arith.constant dense<0.000000e+00> : vector<4x256xf32>
    %176 = tpu.matmul %167, %175, %cst_183 {dimension_numbers = #tpu.dot_dimension_numbers<[1], [0], [0], [1], [0, 0, 1, 1], [], []>} : vector<4x256xbf16>, vector<256x256xbf16>, vector<4x256xf32> -> vector<4x256xf32>
    %c1_184 = arith.constant 1 : index
    %c0_185 = arith.constant 0 : index
    %c0_186 = arith.constant 0 : index
    %177 = vector.load %arg22[%c1_184, %c0_185, %c0_186] : memref<3x4x4xf32, #tpu.memory_space<vmem>>, vector<1x4x4xf32>
    %178 = vector.shape_cast %177 : vector<1x4x4xf32> to vector<4x4xf32>
    %cst_187 = arith.constant dense<0.000000e+00> : vector<4x256xf32>
    %179 = tpu.matmul %178, %176, %cst_187 {dimension_numbers = #tpu.dot_dimension_numbers<[1], [0], [0], [1], [0, 0, 1, 1], [], []>} : vector<4x4xf32>, vector<4x256xf32>, vector<4x256xf32> -> vector<4x256xf32>
    %180 = arith.addf %173, %179 : vector<4x256xf32>
    %c2_188 = arith.constant 2 : index
    %c0_189 = arith.constant 0 : index
    %c0_190 = arith.constant 0 : index
    %181 = vector.load %arg23[%c2_188, %c0_189, %c0_190] : memref<3x256x256xbf16, #tpu.memory_space<vmem>>, vector<1x256x256xbf16>
    %182 = vector.shape_cast %181 : vector<1x256x256xbf16> to vector<256x256xbf16>
    %cst_191 = arith.constant dense<0.000000e+00> : vector<4x256xf32>
    %183 = tpu.matmul %167, %182, %cst_191 {dimension_numbers = #tpu.dot_dimension_numbers<[1], [0], [0], [1], [0, 0, 1, 1], [], []>} : vector<4x256xbf16>, vector<256x256xbf16>, vector<4x256xf32> -> vector<4x256xf32>
    %c2_192 = arith.constant 2 : index
    %c0_193 = arith.constant 0 : index
    %c0_194 = arith.constant 0 : index
    %184 = vector.load %arg22[%c2_192, %c0_193, %c0_194] : memref<3x4x4xf32, #tpu.memory_space<vmem>>, vector<1x4x4xf32>
    %185 = vector.shape_cast %184 : vector<1x4x4xf32> to vector<4x4xf32>
    %cst_195 = arith.constant dense<0.000000e+00> : vector<4x256xf32>
    %186 = tpu.matmul %185, %183, %cst_195 {dimension_numbers = #tpu.dot_dimension_numbers<[1], [0], [0], [1], [0, 0, 1, 1], [], []>} : vector<4x4xf32>, vector<4x256xf32>, vector<4x256xf32> -> vector<4x256xf32>
    %187 = arith.addf %180, %186 : vector<4x256xf32>
    %c0_196 = arith.constant 0 : index
    %c0_197 = arith.constant 0 : index
    %188 = vector.load %arg24[%c0_196, %c0_197] : memref<1x256xf32, #tpu.memory_space<vmem>>, vector<1x256xf32>
    %189 = vector.broadcast %188 : vector<1x256xf32> to vector<4x256xf32>
    %190 = arith.addf %187, %189 : vector<4x256xf32>
    %191 = arith.addf %190, %141 : vector<4x256xf32>
    %cst_198 = arith.constant 0.000000e+00 : f32
    %192 = vector.broadcast %cst_198 : f32 to vector<4x256xf32>
    %193 = arith.maximumf %191, %192 : vector<4x256xf32>
    %194 = arith.truncf %193 : vector<4x256xf32> to vector<4x256xbf16>
    %195 = arith.extf %194 : vector<4x256xbf16> to vector<4x256xf32>
    %c0_199 = arith.constant 0 : index
    %c0_200 = arith.constant 0 : index
    %196 = vector.load %arg28[%c0_199, %c0_200] : memref<256x128xf32, #tpu.memory_space<vmem>>, vector<256x128xf32>
    %cst_201 = arith.constant dense<0.000000e+00> : vector<4x128xf32>
    %197 = tpu.matmul %195, %196, %cst_201 {dimension_numbers = #tpu.dot_dimension_numbers<[1], [0], [0], [1], [0, 0, 1, 1], [], []>} : vector<4x256xf32>, vector<256x128xf32>, vector<4x128xf32> -> vector<4x128xf32>
    %c0_202 = arith.constant 0 : index
    %c0_203 = arith.constant 0 : index
    %198 = vector.load %arg27[%c0_202, %c0_203] : memref<8x4xf32, #tpu.memory_space<vmem>>, vector<8x4xf32>
    %cst_204 = arith.constant dense<0.000000e+00> : vector<8x128xf32>
    %199 = tpu.matmul %198, %197, %cst_204 {dimension_numbers = #tpu.dot_dimension_numbers<[1], [0], [0], [1], [0, 0, 1, 1], [], []>} : vector<8x4xf32>, vector<4x128xf32>, vector<8x128xf32> -> vector<8x128xf32>
    %c0_205 = arith.constant 0 : index
    %c0_206 = arith.constant 0 : index
    %200 = vector.load %arg29[%c0_205, %c0_206] : memref<1x128xf32, #tpu.memory_space<vmem>>, vector<1x128xf32>
    %201 = vector.broadcast %200 : vector<1x128xf32> to vector<8x128xf32>
    %202 = arith.addf %199, %201 : vector<8x128xf32>
    %c0_207 = arith.constant 0 : index
    %c0_208 = arith.constant 0 : index
    %203 = vector.load %arg30[%c0_207, %c0_208] : memref<8x128xf32, #tpu.memory_space<vmem>>, vector<8x128xf32>
    tpu.vector_store %arg30[%c0_207, %c0_208], %202 {strides = array<i32>} : memref<8x128xf32, #tpu.memory_space<vmem>>, vector<8x128xf32>,
    return
  }
  func.func @transform_0(%arg0: i32) -> (i32, i32) {
    %c0_i32 = arith.constant 0 : i32
    %c0_i32_0 = arith.constant 0 : i32
    return %arg0, %c0_i32 : i32, i32
  }
  func.func @transform_1(%arg0: i32) -> (i32, i32, i32) {
    %c0_i32 = arith.constant 0 : i32
    %c0_i32_0 = arith.constant 0 : i32
    %c0_i32_1 = arith.constant 0 : i32
    %c0_i32_2 = arith.constant 0 : i32
    return %c0_i32, %c0_i32_0, %c0_i32_1 : i32, i32, i32
  }
  func.func @transform_2(%arg0: i32) -> (i32, i32, i32) {
    %c0_i32 = arith.constant 0 : i32
    %c0_i32_0 = arith.constant 0 : i32
    %c0_i32_1 = arith.constant 0 : i32
    %c0_i32_2 = arith.constant 0 : i32
    return %c0_i32, %c0_i32_0, %c0_i32_1 : i32, i32, i32
  }
  func.func @transform_3(%arg0: i32) -> (i32, i32) {
    %c0_i32 = arith.constant 0 : i32
    %c0_i32_0 = arith.constant 0 : i32
    %c0_i32_1 = arith.constant 0 : i32
    return %c0_i32, %c0_i32_0 : i32, i32
  }
  func.func @transform_4(%arg0: i32) -> (i32, i32, i32) {
    %c0_i32 = arith.constant 0 : i32
    %c0_i32_0 = arith.constant 0 : i32
    %c0_i32_1 = arith.constant 0 : i32
    %c0_i32_2 = arith.constant 0 : i32
    return %c0_i32, %c0_i32_0, %c0_i32_1 : i32, i32, i32
  }
  func.func @transform_5(%arg0: i32) -> (i32, i32, i32) {
    %c0_i32 = arith.constant 0 : i32
    %c0_i32_0 = arith.constant 0 : i32
    %c0_i32_1 = arith.constant 0 : i32
    %c0_i32_2 = arith.constant 0 : i32
    return %c0_i32, %c0_i32_0, %c0_i32_1 : i32, i32, i32
  }
  func.func @transform_6(%arg0: i32) -> (i32, i32) {
    %c0_i32 = arith.constant 0 : i32
    %c0_i32_0 = arith.constant 0 : i32
    %c0_i32_1 = arith.constant 0 : i32
    return %c0_i32, %c0_i32_0 : i32, i32
  }
  func.func @transform_7(%arg0: i32) -> (i32, i32, i32) {
    %c0_i32 = arith.constant 0 : i32
    %c0_i32_0 = arith.constant 0 : i32
    %c0_i32_1 = arith.constant 0 : i32
    %c0_i32_2 = arith.constant 0 : i32
    return %c0_i32, %c0_i32_0, %c0_i32_1 : i32, i32, i32
  }
  func.func @transform_8(%arg0: i32) -> (i32, i32, i32) {
    %c0_i32 = arith.constant 0 : i32
    %c0_i32_0 = arith.constant 0 : i32
    %c0_i32_1 = arith.constant 0 : i32
    %c0_i32_2 = arith.constant 0 : i32
    return %c0_i32, %c0_i32_0, %c0_i32_1 : i32, i32, i32
  }
  func.func @transform_9(%arg0: i32) -> (i32, i32) {
    %c0_i32 = arith.constant 0 : i32
    %c0_i32_0 = arith.constant 0 : i32
    %c0_i32_1 = arith.constant 0 : i32
    return %c0_i32, %c0_i32_0 : i32, i32
  }
  func.func @transform_10(%arg0: i32) -> (i32, i32, i32) {
    %c0_i32 = arith.constant 0 : i32
    %c0_i32_0 = arith.constant 0 : i32
    %c0_i32_1 = arith.constant 0 : i32
    %c0_i32_2 = arith.constant 0 : i32
    return %c0_i32, %c0_i32_0, %c0_i32_1 : i32, i32, i32
  }
  func.func @transform_11(%arg0: i32) -> (i32, i32, i32) {
    %c0_i32 = arith.constant 0 : i32
    %c0_i32_0 = arith.constant 0 : i32
    %c0_i32_1 = arith.constant 0 : i32
    %c0_i32_2 = arith.constant 0 : i32
    return %c0_i32, %c0_i32_0, %c0_i32_1 : i32, i32, i32
  }
  func.func @transform_12(%arg0: i32) -> (i32, i32) {
    %c0_i32 = arith.constant 0 : i32
    %c0_i32_0 = arith.constant 0 : i32
    %c0_i32_1 = arith.constant 0 : i32
    return %c0_i32, %c0_i32_0 : i32, i32
  }
  func.func @transform_13(%arg0: i32) -> (i32, i32, i32) {
    %c0_i32 = arith.constant 0 : i32
    %c0_i32_0 = arith.constant 0 : i32
    %c0_i32_1 = arith.constant 0 : i32
    %c0_i32_2 = arith.constant 0 : i32
    return %c0_i32, %c0_i32_0, %c0_i32_1 : i32, i32, i32
  }
  func.func @transform_14(%arg0: i32) -> (i32, i32, i32) {
    %c0_i32 = arith.constant 0 : i32
    %c0_i32_0 = arith.constant 0 : i32
    %c0_i32_1 = arith.constant 0 : i32
    %c0_i32_2 = arith.constant 0 : i32
    return %c0_i32, %c0_i32_0, %c0_i32_1 : i32, i32, i32
  }
  func.func @transform_15(%arg0: i32) -> (i32, i32) {
    %c0_i32 = arith.constant 0 : i32
    %c0_i32_0 = arith.constant 0 : i32
    %c0_i32_1 = arith.constant 0 : i32
    return %c0_i32, %c0_i32_0 : i32, i32
  }
  func.func @transform_16(%arg0: i32) -> (i32, i32) {
    %c0_i32 = arith.constant 0 : i32
    %c0_i32_0 = arith.constant 0 : i32
    %c0_i32_1 = arith.constant 0 : i32
    return %c0_i32, %c0_i32_0 : i32, i32
  }
  func.func @transform_17(%arg0: i32) -> (i32, i32) {
    %c0_i32 = arith.constant 0 : i32
    %c0_i32_0 = arith.constant 0 : i32
    %c0_i32_1 = arith.constant 0 : i32
    return %c0_i32, %c0_i32_0 : i32, i32
  }
  func.func @transform_18(%arg0: i32) -> (i32, i32, i32) {
    %c0_i32 = arith.constant 0 : i32
    %c0_i32_0 = arith.constant 0 : i32
    %c0_i32_1 = arith.constant 0 : i32
    %c0_i32_2 = arith.constant 0 : i32
    return %c0_i32, %c0_i32_0, %c0_i32_1 : i32, i32, i32
  }
  func.func @transform_19(%arg0: i32) -> (i32, i32, i32) {
    %c0_i32 = arith.constant 0 : i32
    %c0_i32_0 = arith.constant 0 : i32
    %c0_i32_1 = arith.constant 0 : i32
    %c0_i32_2 = arith.constant 0 : i32
    return %c0_i32, %c0_i32_0, %c0_i32_1 : i32, i32, i32
  }
  func.func @transform_20(%arg0: i32) -> (i32, i32) {
    %c0_i32 = arith.constant 0 : i32
    %c0_i32_0 = arith.constant 0 : i32
    %c0_i32_1 = arith.constant 0 : i32
    return %c0_i32, %c0_i32_0 : i32, i32
  }
  func.func @transform_21(%arg0: i32) -> (i32, i32, i32) {
    %c0_i32 = arith.constant 0 : i32
    %c0_i32_0 = arith.constant 0 : i32
    %c0_i32_1 = arith.constant 0 : i32
    %c0_i32_2 = arith.constant 0 : i32
    return %c0_i32, %c0_i32_0, %c0_i32_1 : i32, i32, i32
  }
  func.func @transform_22(%arg0: i32) -> (i32, i32, i32) {
    %c0_i32 = arith.constant 0 : i32
    %c0_i32_0 = arith.constant 0 : i32
    %c0_i32_1 = arith.constant 0 : i32
    %c0_i32_2 = arith.constant 0 : i32
    return %c0_i32, %c0_i32_0, %c0_i32_1 : i32, i32, i32
  }
  func.func @transform_23(%arg0: i32) -> (i32, i32) {
    %c0_i32 = arith.constant 0 : i32
    %c0_i32_0 = arith.constant 0 : i32
    %c0_i32_1 = arith.constant 0 : i32
    return %c0_i32, %c0_i32_0 : i32, i32
  }
  func.func @transform_24(%arg0: i32) -> (i32, i32) {
    %c0_i32 = arith.constant 0 : i32
    %c0_i32_0 = arith.constant 0 : i32
    %c0_i32_1 = arith.constant 0 : i32
    return %c0_i32, %c0_i32_0 : i32, i32
  }
  func.func @transform_25(%arg0: i32) -> (i32, i32) {
    %c0_i32 = arith.constant 0 : i32
    %c0_i32_0 = arith.constant 0 : i32
    %c0_i32_1 = arith.constant 0 : i32
    return %c0_i32, %c0_i32_0 : i32, i32
  }
  func.func @transform_26(%arg0: i32) -> (i32, i32) {
    %c0_i32 = arith.constant 0 : i32
    %c0_i32_0 = arith.constant 0 : i32
    %c0_i32_1 = arith.constant 0 : i32
    return %c0_i32, %c0_i32_0 : i32, i32
  }
  func.func @transform_27(%arg0: i32) -> (i32, i32) {
    %c0_i32 = arith.constant 0 : i32
    %c0_i32_0 = arith.constant 0 : i32
    %c0_i32_1 = arith.constant 0 : i32
    return %c0_i32, %c0_i32_0 : i32, i32
  }
  func.func @transform_28(%arg0: i32) -> (i32, i32) {
    %c0_i32 = arith.constant 0 : i32
    %c0_i32_0 = arith.constant 0 : i32
    %c0_i32_1 = arith.constant 0 : i32
    return %c0_i32, %c0_i32_0 : i32, i32
  }
  func.func @transform_29(%arg0: i32) -> (i32, i32) {
    %c0_i32 = arith.constant 0 : i32
    %c0_i32_0 = arith.constant 0 : i32
    return %arg0, %c0_i32 : i32, i32
  }
}

</mosaic_0001>

<bundles_post_ra>
// kernel: _lambda_.1
= control target key start
LH: loop header
LB: loop body
LE: loop exit
PB: predicated region body
PF: predicated region fallthrough
CT: control target
= control target key end

     0   :  { %s10477_s6 = smov 1   ;;  %s10478_s10 = smov 2   ;;  %s11578_s0 = inlined_call_operand.smem [shape: u32[30], index: -1, kind: input, shape index: {}] }
   0x1   :  { %s10517_s5 = sld [smem:[%s11578_s0]]   ;;  %s10479_s14 = smov 3  }
   0x2   :  { %s10522_s9 = sld [smem:[%s11578_s0 + %s10477_s6]]   ;;  %s10480_s18 = smov 4  }
   0x3   :  { %s10527_s13 = sld [smem:[%s11578_s0 + %s10478_s10]]   ;;  %s10481_s22 = smov 5  }
   0x4   :  { %s10532_s17 = sld [smem:[%s11578_s0 + %s10479_s14]]   ;;  %s10482_s26 = smov 6  }
   0x5   :  { %s10537_s21 = sld [smem:[%s11578_s0 + %s10480_s18]]   ;;  %s10483_s30 = smov 7  }
   0x6   :  { %s10542_s25 = sld [smem:[%s11578_s0 + %s10481_s22]]   ;;  %s10484_s4 = smov 8  }
   0x7   :  { %s10547_s29 = sld [smem:[%s11578_s0 + %s10482_s26]]   ;;  %s10485_s10 = smov 9  }
   0x8   :  { %s10552_s3 = sld [smem:[%s11578_s0 + %s10483_s30]]   ;;  %s10486_s15 = smov 10  }
   0x9   :  { %s10557_s8 = sld [smem:[%s11578_s0 + %s10484_s4]]   ;;  %s10487_s20 = smov 11  }
   0xa   :  { %s10562_s14 = sld [smem:[%s11578_s0 + %s10485_s10]]   ;;  %s10488_s26 = smov 12  }
   0xb   :  { %s10567_s19 = sld [smem:[%s11578_s0 + %s10486_s15]]   ;;  %s10489_s1 = smov 13  }
   0xc   :  { %s10572_s24 = sld [smem:[%s11578_s0 + %s10487_s20]]   ;;  %s10490_s7 = smov 14  }
   0xd   :  { %s10577_s30 = sld [smem:[%s11578_s0 + %s10488_s26]]   ;;  %s10491_s15 = smov 15  }
   0xe   :  { %s10582_s6 = sld [smem:[%s11578_s0 + %s10489_s1]]   ;;  %s10492_s22 = smov 16  }
   0xf   :  { %s10587_s12 = sld [smem:[%s11578_s0 + %s10490_s7]]   ;;  %s10493_s28 = smov 17  }
  0x10   :  { %s10592_s20 = sld [smem:[%s11578_s0 + %s10491_s15]]   ;;  %s10494_s7 = smov 18  }
  0x11   :  { %s10597_s27 = sld [smem:[%s11578_s0 + %s10492_s22]]   ;;  %s10495_s15 = smov 19  }
  0x12   :  { %s10602_s4 = sld [smem:[%s11578_s0 + %s10493_s28]]   ;;  %s10496_s22 = smov 20  }
  0x13   :  { %11586 = sst [smem:[#allocation2_spill]] %s10577_s30  ;;  %s10497_s28 = smov 21  }
  0x14   :  { %11587 = sst [smem:[#allocation3_spill]] %s10582_s6 }
  0x15   :  { %11588 = sst [smem:[#allocation4_spill]] %s10587_s12 }
  0x16   :  { %11589 = sst [smem:[#allocation5_spill]] %s10592_s20 }
  0x17   :  { %s10607_s6 = sld [smem:[%s11578_s0 + %s10494_s7]]   ;;  %s10498_s7 = smov 22  }
  0x18   :  { %s10612_s20 = sld [smem:[%s11578_s0 + %s10495_s15]]   ;;  %s10499_s15 = smov 23  }
  0x19   :  { %s10617_s30 = sld [smem:[%s11578_s0 + %s10496_s22]]   ;;  %s10500_s22 = smov 24  }
  0x1a   :  { %s10622_s12 = sld [smem:[%s11578_s0 + %s10497_s28]]   ;;  %s10501_s28 = smov 25  }
  0x1d   :  { %11590 = sst [smem:[#allocation6_spill]] %s10607_s6 }
  0x1e   :  { %11591 = sst [smem:[#allocation7_spill]] %s10612_s20 }
  0x1f   :  { %11592 = sst [smem:[#allocation8_spill]] %s10617_s30 }
  0x20   :  { %11593 = sst [smem:[#allocation9_spill]] %s10622_s12 }
  0x21   :  { %s10627_s6 = sld [smem:[%s11578_s0 + %s10498_s7]]   ;;  %s10502_s7 = smov 26  }
  0x22   :  { %s10632_s20 = sld [smem:[%s11578_s0 + %s10499_s15]]   ;;  %s10503_s15 = smov 27  }
  0x23   :  { %s10637_s30 = sld [smem:[%s11578_s0 + %s10500_s22]]   ;;  %s10504_s22 = smov 28  }
  0x24   :  { %s10642_s12 = sld [smem:[%s11578_s0 + %s10501_s28]]   ;;  %s10505_s28 = smov 29  }
  0x27   :  { %11594 = sst [smem:[#allocation10_spill]] %s10627_s6 }
  0x28   :  { %11595 = sst [smem:[#allocation11_spill]] %s10632_s20 }
  0x29   :  { %11596 = sst [smem:[#allocation12_spill]] %s10637_s30 }
  0x2a   :  { %11597 = sst [smem:[#allocation13_spill]] %s10642_s12 }
  0x2b   :  { %s10647_s6 = sld [smem:[%s11578_s0 + %s10502_s7]]   ;;  %s10664_s7 = smov 0  }
  0x2c   :  { %s10652_s20 = sld [smem:[%s11578_s0 + %s10503_s15]]  }
  0x2d   :  { %s10657_s30 = sld [smem:[%s11578_s0 + %s10504_s22]]  }
  0x2e   :  { %s10662_s12 = sld [smem:[%s11578_s0 + %s10505_s28]]  }
  0x2f LB: > { %s10670_s10 = sadd.s32 4294967295, %s10475_s7   ;;  %p8142_p0 = scmp.ge.s32.totalorder %s10475_s7, 1  ;;  %s10475_s7 = sphi %s10664_s7, %s69_s7  }
  0x30   : > { %p818_p1 = scmp.lt.s32.totalorder %s10475_s7, 3 }
  0x32   : > { %p819_p2 = pnand %p8142_p0, %p818_p1 }
  0x33   : > { %v9481_v0 = vld [vmem:[%s10527_s13 + $0x34] ss:$8 sps:$4 sm:$0xff] (!%p819_p2)   ;;  %s8143_s0 = sshll.u32 (!%p819_p2), %s10670_s10, 1  ;;  %v9483_v1 = vld [vmem:[%s10527_s13 + $0x30] ss:$8 sps:$4 sm:$0xff] (!%p819_p2)   ;;  %v10506_v2 = vmov (!%p819_p2), 0  }
  0x34   : > { %822 = sbr.rel (%p819_p2) target bundleno = 5716 (0x1654), region = 136  ;;  %1065 = vmatprep.mubr.bf16.mxu1 (!%p819_p2), %v10506_v2  ;;  %p894_p3 = scmp.lt.s32.totalorder (!%p819_p2), %s8143_s0, 3  ;;  %983 = vmatprep.mubr.bf16.mxu0 (!%p819_p2), %v10506_v2  ;;  %v9484_v3 = vld [vmem:[%s10527_s13 + $0x4] ss:$8 sps:$4 sm:$0xff] (!%p819_p2)   ;;  %v9488_v5 = vld [vmem:[%s10527_s13] ss:$8 sps:$4 sm:$0xff] (!%p819_p2)  }
  0x35   : > { %1033 = vmatprep.subr.bf16.mxu1 (!%p819_p2), %v9481_v0  ;;  %v9486_v4 = vld [vmem:[%s10527_s13 + $0x44] ss:$8 sps:$4 sm:$0xff] (!%p819_p2)   ;;  %v9489_v6 = vld [vmem:[%s10527_s13 + $0x40] ss:$8 sps:$4 sm:$0xff] (!%p819_p2)   ;;  %951 = vmatprep.subr.bf16.mxu0 (!%p819_p2), %v9484_v3  ;;  %v9490_v7 = vld [vmem:[%s10527_s13 + $0x14] ss:$8 sps:$4 sm:$0xff] (!%p819_p2)  }
  0x36   : > { %1034 = vmatpush1.bf16.msra.mxu1 (!%p819_p2), %v9483_v1  ;;  %952 = vmatpush1.bf16.msra.mxu0 (!%p819_p2), %v9488_v5  ;;  %v9492_v8 = vld [vmem:[%s10527_s13 + $0x54] ss:$8 sps:$4 sm:$0xff] (!%p819_p2)   ;;  %v9494_v9 = vld [vmem:[%s10527_s13 + $0x10] ss:$8 sps:$4 sm:$0xff] (!%p819_p2)   ;;  %v9496_v11 = vld [vmem:[%s10527_s13 + $0x24] ss:$8 sps:$4 sm:$0xff] (!%p819_p2)  }
  0x37   : > { %1035 = vmatprep.subr.bf16.mxu1 (!%p819_p2), %v9486_v4  ;;  %953 = vmatprep.subr.bf16.mxu0 (!%p819_p2), %v9490_v7  ;;  %v9495_v10 = vld [vmem:[%s10527_s13 + $0x50] ss:$8 sps:$4 sm:$0xff] (!%p819_p2)   ;;  %v9501_v13 = vld [vmem:[%s10527_s13 + $0x64] ss:$8 sps:$4 sm:$0xff] (!%p819_p2)   ;;  %v9502_v14 = vld [vmem:[%s10527_s13 + $0x20] ss:$8 sps:$4 sm:$0xff] (!%p819_p2)  }
  0x38   : > { %vm947_vm0 = vcmask (!%p819_p2), 392192   ;;  %v9499_v15 = vld [vmem:[%s10527_s13 + $0x60] ss:$8 sps:$4 sm:$0xff] (!%p819_p2)   ;;  %v9505_v16 = vld [vmem:[%s10527_s13 + $0x74] ss:$8 sps:$4 sm:$0xff] (!%p819_p2)   ;;  %v10507_v20 = vmov (!%p819_p2), 0.0  }
  0x39   : > { %v9503_v17 = vld [vmem:[%s10527_s13 + $0x70] ss:$8 sps:$4 sm:$0xff] (!%p819_p2)   ;;  %v9508_v18 = vld [vmem:[%s10527_s13 + $0x84] ss:$8 sps:$4 sm:$0xff] (!%p819_p2)   ;;  %v9506_v19 = vld [vmem:[%s10527_s13 + $0x80] ss:$8 sps:$4 sm:$0xff] (!%p819_p2)  }
  0x3a   : > { %1036 = vmatpush1.bf16.msra.mxu1 (!%p819_p2), %v9489_v6  ;;  %954 = vmatpush1.bf16.msra.mxu0 (!%p819_p2), %v9494_v9  ;;  %v9509_v21 = vld [vmem:[%s10542_s25] ss:$8 sps:$4 sm:$0xff] (!%p819_p2)   ;;  %v9511_v22 = vld [vmem:[%s10542_s25 + $0x4] ss:$8 sps:$4 sm:$0xff] (!%p819_p2)   ;;  %v9517_v23 = vld [vmem:[%s10542_s25 + $0x14] ss:$8 sps:$4 sm:$0xff] (!%p819_p2)  }
  0x3b   : > { %s11611_s0 = smov (!%p894_p3, %s8143_s0), 3  ;;  %1037 = vmatprep.subr.bf16.mxu1 %v9492_v8  ;;  %955 = vmatprep.subr.bf16.mxu0 %v9496_v11  ;;  %v9515_v24 = vld [vmem:[%s10542_s25 + $0x10] ss:$8 sps:$4 sm:$0xff]   ;;  %v9523_v25 = vld [vmem:[%s10542_s25 + $0x24] ss:$8 sps:$4 sm:$0xff]   ;;  %vm1079_vm1 = vcmask 130048  }
  0x3c   : > { %s8144_s11 = sshll.u32 %s11611_s0, 2  ;;  %v9521_v26 = vld [vmem:[%s10542_s25 + $0x20] ss:$8 sps:$4 sm:$0xff]   ;;  %v9529_v27 = vld [vmem:[%s10542_s25 + $0x34] ss:$8 sps:$4 sm:$0xff]   ;;  %s11598_s16 = sld [smem:[#allocation4_spill]] }
  0x3d   : > { %s897_s15 = scalar_lea.vmem %s10517_s5, %s8144_s11  ;;  %v9527_v28 = vld [vmem:[%s10542_s25 + $0x30] ss:$8 sps:$4 sm:$0xff]   ;;  %v9535_v29 = vld [vmem:[%s10542_s25 + $0x44] ss:$8 sps:$4 sm:$0xff]   ;;  %v9533_v30 = vld [vmem:[%s10542_s25 + $0x40] ss:$8 sps:$4 sm:$0xff]  }
  0x3e   : > { %v9498_v12 = vld [vmem:[%s897_s15] sm:$0xff]   ;;  %1038 = vmatpush1.bf16.msra.mxu1 %v9495_v10  ;;  %956 = vmatpush1.bf16.msra.mxu0 %v9502_v14  ;;  %v9541_v31 = vld [vmem:[%s10542_s25 + $0x54] ss:$8 sps:$4 sm:$0xff]   ;;  %v9539_v32 = vld [vmem:[%s10542_s25 + $0x50] ss:$8 sps:$4 sm:$0xff]   ;;  %s11599_s18 = sld [smem:[#allocation2_spill]] }
  0x3f   : > { %1283 = vmatprep.subr.bf16.mxu1 %v9501_v13  ;;  %v9547_v33 = vld [vmem:[%s10542_s25 + $0x64] ss:$8 sps:$4 sm:$0xff]   ;;  %v9545_v34 = vld [vmem:[%s10542_s25 + $0x60] ss:$8 sps:$4 sm:$0xff]   ;;  %v9553_v35 = vld [vmem:[%s10542_s25 + $0x74] ss:$8 sps:$4 sm:$0xff]  }
  0x40   : > { %v9551_v36 = vld [vmem:[%s10542_s25 + $0x70] ss:$8 sps:$4 sm:$0xff]   ;;  %v9559_v37 = vld [vmem:[%s10542_s25 + $0x84] ss:$8 sps:$4 sm:$0xff]   ;;  %v9557_v38 = vld [vmem:[%s10542_s25 + $0x80] ss:$8 sps:$4 sm:$0xff]  }
  0x41   : > { %8166 = vmatmul.mubr.msk.bf16.vlgmr.msra.gmra.mrb[0].mxu1 %vm947_vm0, %v9498_v12  ;;  %8153 = vmatmul.mubr.msk.bf16.vlgmr.msra.gmra.mrb[0].mxu0 %vm947_vm0, %v9498_v12  ;;  %v9565_v39 = vld [vmem:[%s10542_s25 + $0x94] ss:$8 sps:$4 sm:$0xff]   ;;  %v9563_v40 = vld [vmem:[%s10542_s25 + $0x90] ss:$8 sps:$4 sm:$0xff]   ;;  %v9571_v41 = vld [vmem:[%s10542_s25 + $0xa4] ss:$8 sps:$4 sm:$0xff]  }
  0x42   : > { %1284 = vmatpush1.bf16.msra.mxu1 %v9499_v15  ;;  %1315 = vmatprep.mubr.bf16.mxu1 %v10506_v2  ;;  %v9569_v42 = vld [vmem:[%s10542_s25 + $0xa0] ss:$8 sps:$4 sm:$0xff]   ;;  %v9577_v43 = vld [vmem:[%s10542_s25 + $0xb4] ss:$8 sps:$4 sm:$0xff]   ;;  %v9575_v44 = vld [vmem:[%s10542_s25 + $0xb0] ss:$8 sps:$4 sm:$0xff]  }
  0x43   : > { %1285 = vmatprep.subr.bf16.mxu1 %v9505_v16  ;;  %1150 = vmatprep.mubr.f32.mxu0 %v10507_v20  ;;  %v9583_v45 = vld [vmem:[%s10542_s25 + $0xc4] ss:$8 sps:$4 sm:$0xff]   ;;  %v9581_v46 = vld [vmem:[%s10542_s25 + $0xc0] ss:$8 sps:$4 sm:$0xff]   ;;  %v8167_v58 = vld [vmem:[%s10522_s9 + $0x10] sm:$0xff]  ;;  %s11600_s22 = sld [smem:[#allocation3_spill]] }
  0x44   : > { %v8168_v60 = vld [vmem:[%s10522_s9 + $0x18] sm:$0xff]  ;;  %v994_v63 = vld [vmem:[%s10522_s9] sm:$0xff]  ;;  %v995_v5 = vld [vmem:[%s10522_s9 + $0x8] sm:$0xff]  ;;  %vm5160_vm2 = vcmask 64512   ;;  %s11601_s23 = sld [smem:[#allocation13_spill]]  ;;  %s11602_s26 = sld [smem:[#allocation7_spill]] }
  0x45   : > { %v9514_v1 = vld [vmem:[%s10542_s25 + $0x104] ss:$8 sps:$4 sm:$0xff]   ;;  %v9512_v7 = vld [vmem:[%s10542_s25 + $0x100] ss:$8 sps:$4 sm:$0xff]   ;;  %v9520_v8 = vld [vmem:[%s10542_s25 + $0x114] ss:$8 sps:$4 sm:$0xff]  }
  0x46   : > { %1286 = vmatpush1.bf16.msra.mxu1 %v9503_v17  ;;  %v8186_v6 = vld [vmem:[%s10522_s9 + $0x20] sm:$0xff]  ;;  %v8187_v9 = vld [vmem:[%s10522_s9 + $0x28] sm:$0xff]  ;;  %v9518_v10 = vld [vmem:[%s10542_s25 + $0x110] ss:$8 sps:$4 sm:$0xff]   ;;  %s11603_s28 = sld [smem:[#allocation5_spill]]  ;;  %s11604_s1 = sld [smem:[#allocation12_spill]] }
  0x47   : > { %1287 = vmatprep.subr.bf16.mxu1 %v9508_v18  ;;  %v9526_v11 = vld [vmem:[%s10542_s25 + $0x124] ss:$8 sps:$4 sm:$0xff]   ;;  %v9532_v13 = vld [vmem:[%s10542_s25 + $0x134] ss:$8 sps:$4 sm:$0xff]   ;;  %v9530_v14 = vld [vmem:[%s10542_s25 + $0x130] ss:$8 sps:$4 sm:$0xff]  }
  0x48   : > { %v9538_v15 = vld [vmem:[%s10542_s25 + $0x144] ss:$8 sps:$4 sm:$0xff]   ;;  %v9536_v16 = vld [vmem:[%s10542_s25 + $0x140] ss:$8 sps:$4 sm:$0xff]   ;;  %v9544_v17 = vld [vmem:[%s10542_s25 + $0x154] ss:$8 sps:$4 sm:$0xff]  }
  0x49   : > { %v9542_v18 = vld [vmem:[%s10542_s25 + $0x150] ss:$8 sps:$4 sm:$0xff]   ;;  %s11605_s2 = sld [smem:[#allocation6_spill]]  ;;  %s11606_s0 = sld [smem:[#allocation10_spill]]  ;;  %vm7371_vm3 = vcmask 1043456   ;;  %vm7367_vm4 = vcmask 31744  }
  0x4a   : > { %1288 = vmatpush1.bf16.msra.mxu1 %v9506_v19  ;;  %v9550_v19 = vld [vmem:[%s10542_s25 + $0x164] ss:$8 sps:$4 sm:$0xff]   ;;  %s11607_s11 = sld [smem:[#allocation8_spill]]  ;;  %s11608_s15 = sld [smem:[#allocation9_spill]]  ;;  %vm10508_vm5 = vmmov 0  }
  0x4b   : > { %1634 = vmatprep.subr.bf16.mxu1 %v9511_v22  ;;  %v9556_v22 = vld [vmem:[%s10542_s25 + $0x174] ss:$8 sps:$4 sm:$0xff]   ;;  %p899_p4 = scmp.lt.s32.totalorder %s10670_s10, 1 }
  0x4d   : > { %8185 = vmatmul.mubr.msk.bf16.vlgmr.msra.gmra.mrb[4].mxu1 %vm947_vm0, %v9498_v12  ;;  %v9524_v12 = vld [vmem:[%s10542_s25 + $0x120] ss:$8 sps:$4 sm:$0xff]   ;;  %s11613_s10 = smov (!%p899_p4, %s10670_s10), 1 }
  0x4e   : > { %1635 = vmatpush1.bf16.msra.mxu1 %v9509_v21  ;;  %v9548_v21 = vld [vmem:[%s10542_s25 + $0x160] ss:$8 sps:$4 sm:$0xff]  }
  0x4f   : > { %1636 = vmatprep.subr.bf16.mxu1 %v9517_v23  ;;  %v9554_v23 = vld [vmem:[%s10542_s25 + $0x170] ss:$8 sps:$4 sm:$0xff]  }
  0x52   : > { %1637 = vmatpush1.bf16.msra.mxu1 %v9515_v24  ;;  %v9562_v24 = vld [vmem:[%s10542_s25 + $0x184] ss:$8 sps:$4 sm:$0xff]  }
  0x53   : > { %1638 = vmatprep.subr.bf16.mxu1 %v9523_v25  ;;  %v9560_v25 = vld [vmem:[%s10542_s25 + $0x180] ss:$8 sps:$4 sm:$0xff]  }
  0x56   : > { %1639 = vmatpush1.bf16.msra.mxu1 %v9521_v26  ;;  %v9568_v26 = vld [vmem:[%s10542_s25 + $0x194] ss:$8 sps:$4 sm:$0xff]  }
  0x57   : > { %1640 = vmatprep.subr.bf16.mxu1 %v9529_v27  ;;  %v9566_v27 = vld [vmem:[%s10542_s25 + $0x190] ss:$8 sps:$4 sm:$0xff]  }
  0x5a   : > { %1641 = vmatpush1.bf16.msra.mxu1 %v9527_v28  ;;  %v9574_v28 = vld [vmem:[%s10542_s25 + $0x1a4] ss:$8 sps:$4 sm:$0xff]  }
  0x5b   : > { %1642 = vmatprep.subr.bf16.mxu1 %v9535_v29  ;;  %v9572_v29 = vld [vmem:[%s10542_s25 + $0x1a0] ss:$8 sps:$4 sm:$0xff]  }
  0x5e   : > { %1643 = vmatpush1.bf16.msra.mxu1 %v9533_v30  ;;  %v9580_v30 = vld [vmem:[%s10542_s25 + $0x1b4] ss:$8 sps:$4 sm:$0xff]  }
  0x5f   : > { %1644 = vmatprep.subr.bf16.mxu1 %v9541_v31  ;;  %v9578_v31 = vld [vmem:[%s10542_s25 + $0x1b0] ss:$8 sps:$4 sm:$0xff]  }
  0x62   : > { %1645 = vmatpush1.bf16.msra.mxu1 %v9539_v32  ;;  %v9586_v32 = vld [vmem:[%s10542_s25 + $0x1c4] ss:$8 sps:$4 sm:$0xff]  }
  0x63   : > { %1646 = vmatprep.subr.bf16.mxu1 %v9547_v33  ;;  %v9584_v33 = vld [vmem:[%s10542_s25 + $0x1c0] ss:$8 sps:$4 sm:$0xff]  }
  0x66   : > { %1647 = vmatpush1.bf16.msra.mxu1 %v9545_v34  ;;  %v9589_v34 = vld [vmem:[%s10542_s25 + $0xd4] ss:$8 sps:$4 sm:$0xff]  }
  0x67   : > { %1648 = vmatprep.subr.bf16.mxu1 %v9553_v35  ;;  %v9592_v35 = vld [vmem:[%s10542_s25 + $0x1d4] ss:$8 sps:$4 sm:$0xff]  }
  0x6a   : > { %1649 = vmatpush1.bf16.msra.mxu1 %v9551_v36  ;;  %v9587_v36 = vld [vmem:[%s10542_s25 + $0xd0] ss:$8 sps:$4 sm:$0xff]  }
  0x6b   : > { %1650 = vmatprep.subr.bf16.mxu1 %v9559_v37  ;;  %v9590_v37 = vld [vmem:[%s10542_s25 + $0x1d0] ss:$8 sps:$4 sm:$0xff]  }
  0x6e   : > { %1651 = vmatpush1.bf16.msra.mxu1 %v9557_v38  ;;  %v9595_v38 = vld [vmem:[%s10542_s25 + $0xe4] ss:$8 sps:$4 sm:$0xff]  }
  0x6f   : > { %1652 = vmatprep.subr.bf16.mxu1 %v9565_v39  ;;  %v9598_v39 = vld [vmem:[%s10542_s25 + $0x1e4] ss:$8 sps:$4 sm:$0xff]  }
  0x72   : > { %1653 = vmatpush1.bf16.msra.mxu1 %v9563_v40  ;;  %v9593_v40 = vld [vmem:[%s10542_s25 + $0xe0] ss:$8 sps:$4 sm:$0xff]  }
  0x73   : > { %1654 = vmatprep.subr.bf16.mxu1 %v9571_v41  ;;  %v9596_v41 = vld [vmem:[%s10542_s25 + $0x1e0] ss:$8 sps:$4 sm:$0xff]  }
  0x76   : > { %1655 = vmatpush1.bf16.msra.mxu1 %v9569_v42  ;;  %v9601_v42 = vld [vmem:[%s10542_s25 + $0xf4] ss:$8 sps:$4 sm:$0xff]  }
  0x77   : > { %1656 = vmatprep.subr.bf16.mxu1 %v9577_v43  ;;  %v9604_v43 = vld [vmem:[%s10542_s25 + $0x1f4] ss:$8 sps:$4 sm:$0xff]  }
  0x7a   : > { %1657 = vmatpush1.bf16.msra.mxu1 %v9575_v44  ;;  %v9599_v44 = vld [vmem:[%s10542_s25 + $0xf0] ss:$8 sps:$4 sm:$0xff]  }
  0x7b   : > { %1658 = vmatprep.subr.bf16.mxu1 %v9583_v45  ;;  %v9602_v45 = vld [vmem:[%s10542_s25 + $0x1f0] ss:$8 sps:$4 sm:$0xff]  }
  0x7e   : > { %1659 = vmatpush1.bf16.msra.mxu1 %v9581_v46  ;;  %v1418_v46 = vlaneseq }
  0x7f   : > { %1660 = vmatprep.subr.bf16.mxu1 %v9589_v34  ;;  %v9631_v34 = vld [vmem:[%s10542_s25 + $0x284] ss:$8 sps:$4 sm:$0xff]  }
  0x82   : > { %1661 = vmatpush1.bf16.msra.mxu1 %v9587_v36  ;;  %v9634_v36 = vld [vmem:[%s10542_s25 + $0x294] ss:$8 sps:$4 sm:$0xff]  }
  0x83   : > { %1662 = vmatprep.subr.bf16.mxu1 %v9595_v38  ;;  %v9637_v38 = vld [vmem:[%s10542_s25 + $0x2a4] ss:$8 sps:$4 sm:$0xff]  }
  0x86   : > { %1663 = vmatpush1.bf16.msra.mxu1 %v9593_v40  ;;  %v9640_v40 = vld [vmem:[%s10542_s25 + $0x2b4] ss:$8 sps:$4 sm:$0xff]  }
  0x87   : > { %1664 = vmatprep.subr.bf16.mxu1 %v9601_v42  ;;  %v9643_v42 = vld [vmem:[%s10542_s25 + $0x2c4] ss:$8 sps:$4 sm:$0xff]  }
  0x8a   : > { %1665 = vmatpush1.bf16.msra.mxu1 %v9599_v44  ;;  %v9646_v44 = vld [vmem:[%s10542_s25 + $0x2d4] ss:$8 sps:$4 sm:$0xff]  }
 0x114   : > { %v1067_v47 = vpop.f32.mrb[0].mxu1  ;;  %v985_v50 = vpop.f32.mrb[0].mxu0 }
 0x115   : > { %v1069_v48 = vpop.f32.mrb[1].mxu1  ;;  %v987_v53 = vpop.f32.mrb[1].mxu0 }
 0x116   : > { %v1071_v49 = vpop.f32.mrb[2].mxu1  ;;  %v989_v55 = vpop.f32.mrb[2].mxu0 }
 0x117   : > { %v9311_v51 = vpack.c.bf16 %v1071_v49, %v1067_v47  ;;  %v1073_v52 = vpop.f32.mrb[3].mxu1  ;;  %v9315_v56 = vpack.c.bf16 %v989_v55, %v985_v50  ;;  %v991_v57 = vpop.f32.mrb[3].mxu0  ;;  %v1419_v47 = vshrl.u32 %v1418_v46, 7  ;;  %v1416_v49 = vld [vmem:[%s10532_s17] sm:$0x3] }
 0x118   : > { %v9309_v54 = vpack.c.bf16 %v1073_v52, %v1069_v48  ;;  %v9313_v59 = vpack.c.bf16 %v991_v57, %v987_v53  ;;  %v9649_v46 = vld [vmem:[%s10542_s25 + $0x2e4] ss:$8 sps:$4 sm:$0xff]  }
 0x119   : > { %v10779_v48 = vsub.s32 0, %v1419_v47  ;;  %v10782_v50 = vsub.s32 1, %v1419_v47  ;;  %v9647_v47 = vld [vmem:[%s10542_s25 + $0x2e0] ss:$8 sps:$4 sm:$0xff]  }
 0x11a   : > { %9310 = vmatprep.subr.bf16.mxu0 %v9309_v54 }
 0x11b   : > { %9312 = vmatpush1.bf16.msra.mxu0 %v9311_v51  ;;  %v1421_v51 = vrot.slane %v1416_v49, %v10779_v48  ;;  %v1425_v53 = vrot.slane %v1416_v49, %v10782_v50  ;;  %v9652_v49 = vld [vmem:[%s10542_s25 + $0x2f4] ss:$8 sps:$4 sm:$0xff]  }
 0x11c   : > { %9314 = vmatprep.subr.bf16.mxu0 %v9313_v59 }
 0x11e   : > { %8169 = vmatmul.mubr.msk.f32.vlgmr.msra.gmra.mrb[4].mxu0 %vm1079_vm1, %v8167_v58 }
 0x11f   : > { %9316 = vmatpush1.bf16.msra.mxu0 %v9315_v56  ;;  %1156 = vmatprep.mubr.f32.mxu0 %v10507_v20 }
 0x120   : > { %v1317_v61 = vpop.f32.mrb[4].mxu1 }
 0x121   : > { %v1319_v62 = vpop.f32.mrb[5].mxu1 }
 0x122   : > { %8170 = vmatmul.mubr.msk.f32.gmra.mrb[6].mxu0 %vm1079_vm1, %v8168_v60  ;;  %v1321_v0 = vpop.f32.mrb[6].mxu1 }
 0x123   : > { %v9319_v2 = vpack.c.bf16 %v1321_v0, %v1317_v61  ;;  %v1323_v3 = vpop.f32.mrb[7].mxu1  ;;  %1233 = vmatprep.mubr.f32.mxu0 %v10507_v20 }
 0x124   : > { %v9317_v4 = vpack.c.bf16 %v1323_v3, %v1319_v62 }
 0x126   : > { %8171 = vmatmul.mubr.msk.f32.vlgmr.msra.gmra.mrb[4].mxu0 %vm1079_vm1, %v994_v63  ;;  %9318 = vmatprep.subr.bf16.mxu0 %v9317_v4 }
 0x127   : > { %9320 = vmatpush1.bf16.msra.mxu0 %v9319_v2  ;;  %1239 = vmatprep.mubr.f32.mxu0 %v10507_v20 }
 0x128   : > { %1872 = vmatprep.subr.bf16.mxu0 %v9514_v1 }
 0x12a   : > { %8172 = vmatmul.mubr.msk.f32.gmra.mrb[6].mxu0 %vm1079_vm1, %v995_v5 }
 0x12b   : > { %1399 = vmatprep.mubr.f32.mxu0 %v10507_v20 }
 0x12e   : > { %8188 = vmatmul.mubr.msk.f32.vlgmr.msra.gmra.mrb[4].mxu0 %vm1079_vm1, %v8186_v6 }
 0x12f   : > { %1405 = vmatprep.mubr.f32.mxu0 %v10507_v20  ;;  %1873 = vmatpush1.bf16.msra.mxu0 %v9512_v7 }
 0x130   : > { %1874 = vmatprep.subr.bf16.mxu0 %v9520_v8 }
 0x132   : > { %8189 = vmatmul.mubr.msk.f32.gmra.mrb[6].mxu0 %vm1079_vm1, %v8187_v9 }
 0x133   : > { %1875 = vmatpush1.bf16.msra.mxu0 %v9518_v10 }
 0x134   : > { %1876 = vmatprep.subr.bf16.mxu0 %v9526_v11 }
 0x137   : > { %1877 = vmatpush1.bf16.msra.mxu0 %v9524_v12 }
 0x138   : > { %1878 = vmatprep.subr.bf16.mxu0 %v9532_v13 }
 0x13b   : > { %1879 = vmatpush1.bf16.msra.mxu0 %v9530_v14 }
 0x13c   : > { %1880 = vmatprep.subr.bf16.mxu0 %v9538_v15  ;;  %v9607_v15 = vld [vmem:[%s10542_s25 + $0x204] ss:$8 sps:$4 sm:$0xff]  }
 0x13f   : > { %1881 = vmatpush1.bf16.msra.mxu0 %v9536_v16  ;;  %v8286_v16 = vld [vmem:[%s10537_s21 + $0x10] sm:$0xff] }
 0x140   : > { %1882 = vmatprep.subr.bf16.mxu0 %v9544_v17  ;;  %v9605_v17 = vld [vmem:[%s10542_s25 + $0x200] ss:$8 sps:$4 sm:$0xff]  }
 0x143   : > { %1883 = vmatpush1.bf16.msra.mxu0 %v9542_v18  ;;  %v9610_v18 = vld [vmem:[%s10542_s25 + $0x214] ss:$8 sps:$4 sm:$0xff]  }
 0x144   : > { %1884 = vmatprep.subr.bf16.mxu0 %v9550_v19  ;;  %v8287_v19 = vld [vmem:[%s10537_s21 + $0x18] sm:$0xff] }
 0x147   : > { %1885 = vmatpush1.bf16.msra.mxu0 %v9548_v21  ;;  %v9608_v21 = vld [vmem:[%s10542_s25 + $0x210] ss:$8 sps:$4 sm:$0xff]  }
 0x148   : > { %1886 = vmatprep.subr.bf16.mxu0 %v9556_v22  ;;  %v9613_v22 = vld [vmem:[%s10542_s25 + $0x224] ss:$8 sps:$4 sm:$0xff]  }
 0x14b   : > { %1887 = vmatpush1.bf16.msra.mxu0 %v9554_v23  ;;  %v9611_v23 = vld [vmem:[%s10542_s25 + $0x220] ss:$8 sps:$4 sm:$0xff]  }
 0x14c   : > { %1888 = vmatprep.subr.bf16.mxu0 %v9562_v24  ;;  %v9616_v24 = vld [vmem:[%s10542_s25 + $0x234] ss:$8 sps:$4 sm:$0xff]  }
 0x14f   : > { %1889 = vmatpush1.bf16.msra.mxu0 %v9560_v25  ;;  %v9614_v25 = vld [vmem:[%s10542_s25 + $0x230] ss:$8 sps:$4 sm:$0xff]  }
 0x150   : > { %1890 = vmatprep.subr.bf16.mxu0 %v9568_v26  ;;  %v9619_v26 = vld [vmem:[%s10542_s25 + $0x244] ss:$8 sps:$4 sm:$0xff]  }
 0x153   : > { %1891 = vmatpush1.bf16.msra.mxu0 %v9566_v27  ;;  %v9617_v27 = vld [vmem:[%s10542_s25 + $0x240] ss:$8 sps:$4 sm:$0xff]  }
 0x154   : > { %1892 = vmatprep.subr.bf16.mxu0 %v9574_v28  ;;  %v9622_v28 = vld [vmem:[%s10542_s25 + $0x254] ss:$8 sps:$4 sm:$0xff]  }
 0x157   : > { %1893 = vmatpush1.bf16.msra.mxu0 %v9572_v29  ;;  %v9620_v29 = vld [vmem:[%s10542_s25 + $0x250] ss:$8 sps:$4 sm:$0xff]  }
 0x158   : > { %1894 = vmatprep.subr.bf16.mxu0 %v9580_v30  ;;  %v9625_v30 = vld [vmem:[%s10542_s25 + $0x264] ss:$8 sps:$4 sm:$0xff]  }
 0x15b   : > { %1895 = vmatpush1.bf16.msra.mxu0 %v9578_v31  ;;  %v9623_v31 = vld [vmem:[%s10542_s25 + $0x260] ss:$8 sps:$4 sm:$0xff]  }
 0x15c   : > { %1896 = vmatprep.subr.bf16.mxu0 %v9586_v32  ;;  %v9628_v32 = vld [vmem:[%s10542_s25 + $0x274] ss:$8 sps:$4 sm:$0xff]  }
 0x15f   : > { %1897 = vmatpush1.bf16.msra.mxu0 %v9584_v33  ;;  %v9626_v33 = vld [vmem:[%s10542_s25 + $0x270] ss:$8 sps:$4 sm:$0xff]  }
 0x160   : > { %1898 = vmatprep.subr.bf16.mxu0 %v9592_v35  ;;  %v9629_v35 = vld [vmem:[%s10542_s25 + $0x280] ss:$8 sps:$4 sm:$0xff]  }
 0x163   : > { %1899 = vmatpush1.bf16.msra.mxu0 %v9590_v37  ;;  %v9632_v37 = vld [vmem:[%s10542_s25 + $0x290] ss:$8 sps:$4 sm:$0xff]  }
 0x164   : > { %1900 = vmatprep.subr.bf16.mxu0 %v9598_v39  ;;  %v9635_v39 = vld [vmem:[%s10542_s25 + $0x2a0] ss:$8 sps:$4 sm:$0xff]  }
 0x167   : > { %1901 = vmatpush1.bf16.msra.mxu0 %v9596_v41  ;;  %v9638_v41 = vld [vmem:[%s10542_s25 + $0x2b0] ss:$8 sps:$4 sm:$0xff]  }
 0x168   : > { %1902 = vmatprep.subr.bf16.mxu0 %v9604_v43  ;;  %v9641_v43 = vld [vmem:[%s10542_s25 + $0x2c0] ss:$8 sps:$4 sm:$0xff]  }
 0x16b   : > { %1903 = vmatpush1.bf16.msra.mxu0 %v9602_v45  ;;  %v9644_v45 = vld [vmem:[%s10542_s25 + $0x2d0] ss:$8 sps:$4 sm:$0xff]  }
 0x201   : > { %v1401_v52 = vpop.f32.mrb[4].mxu0 }
 0x202   : > { %v1403_v54 = vpop.f32.mrb[5].mxu0  ;;  %v1428_v55 = vadd.f32 %v1421_v51, %v1401_v52  ;;  %v1677_v52 = vld [vmem:[%s10537_s21] sm:$0xff] }
 0x203   : > { %v1429_v56 = vadd.f32 %v1425_v53, %v1403_v54  ;;  %v9656_v54 = vld [vmem:[%s10557_s8 + $0x100] ss:$8 sps:$4 sm:$0xff]  }
 0x204   : > { %v1432_v61 = vmax.f32 %v1428_v55, 0.0  ;;  %v9658_v55 = vld [vmem:[%s10557_s8 + $0x104] ss:$8 sps:$4 sm:$0xff]  }
 0x205   : > { %v1407_v57 = vpop.f32.mrb[6].mxu0  ;;  %v1433_v63 = vmax.f32 %v1429_v56, 0.0  ;;  %v9664_v56 = vld [vmem:[%s10557_s8 + $0x114] ss:$8 sps:$4 sm:$0xff]  }
 0x206   : > { %v1430_v58 = vadd.f32 %v1421_v51, %v1407_v57  ;;  %v1409_v59 = vpop.f32.mrb[7].mxu0  ;;  %v9650_v51 = vld [vmem:[%s10542_s25 + $0x2f0] ss:$8 sps:$4 sm:$0xff]  }
 0x207   : > { %v1431_v60 = vadd.f32 %v1425_v53, %v1409_v59  ;;  %v1678_v53 = vld [vmem:[%s10537_s21 + $0x8] sm:$0xff]  ;;  %v9662_v57 = vld [vmem:[%s10557_s8 + $0x110] ss:$8 sps:$4 sm:$0xff]  }
 0x208   : > { %v1434_v62 = vmax.f32 %v1430_v58, 0.0  ;;  %v9670_v58 = vld [vmem:[%s10557_s8 + $0x124] ss:$8 sps:$4 sm:$0xff]   ;;  %v9668_v59 = vld [vmem:[%s10557_s8 + $0x120] ss:$8 sps:$4 sm:$0xff]  }
 0x209   : > { %v1435_v0 = vmax.f32 %v1431_v60, 0.0  ;;  %v9676_v60 = vld [vmem:[%s10557_s8 + $0x134] ss:$8 sps:$4 sm:$0xff]  }
 0x20a   : > { %v10786_v1 = vpack.c.bf16 %v1434_v62, %v1432_v61  ;;  %v9674_v61 = vld [vmem:[%s10557_s8 + $0x130] ss:$8 sps:$4 sm:$0xff]   ;;  %v9682_v62 = vld [vmem:[%s10557_s8 + $0x144] ss:$8 sps:$4 sm:$0xff]  }
 0x20b   : > { %v10788_v2 = vpack.c.bf16 %v1435_v0, %v1433_v63  ;;  %v9680_v63 = vld [vmem:[%s10557_s8 + $0x140] ss:$8 sps:$4 sm:$0xff]   ;;  %v9688_v0 = vld [vmem:[%s10557_s8 + $0x154] ss:$8 sps:$4 sm:$0xff]  }
 0x20d   : > { %1666 = vmatprep.mubr.bf16.mxu1 %v10788_v2  ;;  %1904 = vmatprep.mubr.bf16.mxu0 %v10788_v2 }
 0x20e   : > { %1667 = vmatmul.mubr.bf16.vlgmr.msra.gmra.mrb[8].mxu1 %v10786_v1  ;;  %1905 = vmatmul.mubr.bf16.vlgmr.msra.gmra.mrb[8].mxu0 %v10786_v1 }
 0x20f   : > { %1988 = vmatprep.mubr.f32.mxu0 %v10507_v20  ;;  %2071 = vmatprep.mubr.f32.mxu1 %v10507_v20 }
 0x2e1   : > { %v1668_v3 = vpop.f32.mrb[8].mxu1  ;;  %v1906_v4 = vpop.f32.mrb[8].mxu0 }
 0x2e2   : > { %v1670_v5 = vpop.f32.mrb[9].mxu1  ;;  %v1908_v6 = vpop.f32.mrb[9].mxu0 }
 0x2e3   : > { %v1672_v7 = vpop.f32.mrb[10].mxu1  ;;  %v1910_v8 = vpop.f32.mrb[10].mxu0 }
 0x2e4   : > { %v9327_v9 = vpack.c.bf16 %v1672_v7, %v1668_v3  ;;  %v9323_v10 = vpack.c.bf16 %v1910_v8, %v1906_v4  ;;  %v1674_v11 = vpop.f32.mrb[11].mxu1  ;;  %v1912_v12 = vpop.f32.mrb[11].mxu0  ;;  %v9686_v3 = vld [vmem:[%s10557_s8 + $0x150] ss:$8 sps:$4 sm:$0xff]   ;;  %v9694_v4 = vld [vmem:[%s10557_s8 + $0x164] ss:$8 sps:$4 sm:$0xff]  }
 0x2e5   : > { %v9325_v13 = vpack.c.bf16 %v1674_v11, %v1670_v5  ;;  %v9321_v14 = vpack.c.bf16 %v1912_v12, %v1908_v6  ;;  %v9692_v5 = vld [vmem:[%s10557_s8 + $0x160] ss:$8 sps:$4 sm:$0xff]   ;;  %v9700_v6 = vld [vmem:[%s10557_s8 + $0x174] ss:$8 sps:$4 sm:$0xff]   ;;  %v9698_v7 = vld [vmem:[%s10557_s8 + $0x170] ss:$8 sps:$4 sm:$0xff]  }
 0x2e6   : > { %v9706_v8 = vld [vmem:[%s10557_s8 + $0x184] ss:$8 sps:$4 sm:$0xff]   ;;  %v9710_v11 = vld [vmem:[%s10557_s8 + $0x190] ss:$8 sps:$4 sm:$0xff]  }
 0x2e7   : > { %9322 = vmatprep.subr.bf16.mxu0 %v9321_v14  ;;  %9326 = vmatprep.subr.bf16.mxu1 %v9325_v13  ;;  %v9718_v12 = vld [vmem:[%s10557_s8 + $0x1a4] ss:$8 sps:$4 sm:$0xff]   ;;  %v9716_v13 = vld [vmem:[%s10557_s8 + $0x1a0] ss:$8 sps:$4 sm:$0xff]   ;;  %v9724_v14 = vld [vmem:[%s10557_s8 + $0x1b4] ss:$8 sps:$4 sm:$0xff]  }
 0x2e8   : > { %9324 = vmatpush1.bf16.msra.mxu0 %v9323_v10  ;;  %9328 = vmatpush1.bf16.msra.mxu1 %v9327_v9  ;;  %v9704_v9 = vld [vmem:[%s10557_s8 + $0x180] ss:$8 sps:$4 sm:$0xff]   ;;  %v9712_v10 = vld [vmem:[%s10557_s8 + $0x194] ss:$8 sps:$4 sm:$0xff]  }
 0x2e9   : > { %2277 = vmatprep.subr.bf16.mxu0 %v9607_v15  ;;  %v9722_v15 = vld [vmem:[%s10557_s8 + $0x1b0] ss:$8 sps:$4 sm:$0xff]  }
 0x2eb   : > { %8288 = vmatmul.mubr.msk.f32.vlgmr.msra.gmra.mrb[12].mxu0 %vm1079_vm1, %v8286_v16  ;;  %8290 = vmatmul.mubr.msk.f32.vlgmr.msra.gmra.mrb[12].mxu1 %vm1079_vm1, %v1677_v52  ;;  %v9730_v16 = vld [vmem:[%s10557_s8 + $0x1c4] ss:$8 sps:$4 sm:$0xff]   ;;  %v9707_v52 = vld [vmem:[%s10557_s8 + $0x90] ss:$8 sps:$4 sm:$0xff]  }
 0x2ec   : > { %2278 = vmatpush1.bf16.msra.mxu0 %v9605_v17  ;;  %1994 = vmatprep.mubr.f32.mxu0 %v10507_v20  ;;  %v9728_v17 = vld [vmem:[%s10557_s8 + $0x1c0] ss:$8 sps:$4 sm:$0xff]  }
 0x2ed   : > { %2279 = vmatprep.subr.bf16.mxu0 %v9610_v18  ;;  %2077 = vmatprep.mubr.f32.mxu1 %v10507_v20 }
 0x2ef   : > { %8289 = vmatmul.mubr.msk.f32.gmra.mrb[14].mxu0 %vm1079_vm1, %v8287_v19  ;;  %8291 = vmatmul.mubr.msk.f32.gmra.mrb[14].mxu1 %vm1079_vm1, %v1678_v53  ;;  %v9715_v53 = vld [vmem:[%s10557_s8 + $0xa4] ss:$8 sps:$4 sm:$0xff]  }
 0x2f0   : > { %2280 = vmatpush1.bf16.msra.mxu0 %v9608_v21  ;;  %2309 = vmatprep.mubr.bf16.mxu0 %v10788_v2 }
 0x2f1   : > { %2281 = vmatprep.subr.bf16.mxu0 %v9613_v22  ;;  %2393 = vmatprep.mubr.f32.mxu1 %v10507_v20 }
 0x2f4   : > { %2282 = vmatpush1.bf16.msra.mxu0 %v9611_v23 }
 0x2f5   : > { %2283 = vmatprep.subr.bf16.mxu0 %v9616_v24 }
 0x2f8   : > { %2284 = vmatpush1.bf16.msra.mxu0 %v9614_v25 }
 0x2f9   : > { %2285 = vmatprep.subr.bf16.mxu0 %v9619_v26 }
 0x2fc   : > { %2286 = vmatpush1.bf16.msra.mxu0 %v9617_v27 }
 0x2fd   : > { %2287 = vmatprep.subr.bf16.mxu0 %v9622_v28 }
 0x300   : > { %2288 = vmatpush1.bf16.msra.mxu0 %v9620_v29  ;;  %v9655_v29 = vld [vmem:[%s10557_s8 + $0x4] ss:$8 sps:$4 sm:$0xff]  }
 0x301   : > { %2289 = vmatprep.subr.bf16.mxu0 %v9625_v30  ;;  %v8356_v30 = vld [vmem:[%s10537_s21 + $0x20] sm:$0xff] }
 0x304   : > { %2290 = vmatpush1.bf16.msra.mxu0 %v9623_v31  ;;  %v9653_v31 = vld [vmem:[%s10557_s8] ss:$8 sps:$4 sm:$0xff]  }
 0x305   : > { %2291 = vmatprep.subr.bf16.mxu0 %v9628_v32  ;;  %v9661_v32 = vld [vmem:[%s10557_s8 + $0x14] ss:$8 sps:$4 sm:$0xff]  }
 0x308   : > { %2292 = vmatpush1.bf16.msra.mxu0 %v9626_v33  ;;  %v8357_v33 = vld [vmem:[%s10537_s21 + $0x28] sm:$0xff] }
 0x309   : > { %2293 = vmatprep.subr.bf16.mxu0 %v9631_v34  ;;  %v9659_v34 = vld [vmem:[%s10557_s8 + $0x10] ss:$8 sps:$4 sm:$0xff]  }
 0x30c   : > { %2294 = vmatpush1.bf16.msra.mxu0 %v9629_v35  ;;  %v9667_v35 = vld [vmem:[%s10557_s8 + $0x24] ss:$8 sps:$4 sm:$0xff]  }
 0x30d   : > { %2295 = vmatprep.subr.bf16.mxu0 %v9634_v36  ;;  %v9665_v36 = vld [vmem:[%s10557_s8 + $0x20] ss:$8 sps:$4 sm:$0xff]  }
 0x310   : > { %2296 = vmatpush1.bf16.msra.mxu0 %v9632_v37  ;;  %v9673_v37 = vld [vmem:[%s10557_s8 + $0x34] ss:$8 sps:$4 sm:$0xff]  }
 0x311   : > { %2297 = vmatprep.subr.bf16.mxu0 %v9637_v38  ;;  %v9671_v38 = vld [vmem:[%s10557_s8 + $0x30] ss:$8 sps:$4 sm:$0xff]  }
 0x314   : > { %2298 = vmatpush1.bf16.msra.mxu0 %v9635_v39  ;;  %v9679_v39 = vld [vmem:[%s10557_s8 + $0x44] ss:$8 sps:$4 sm:$0xff]  }
 0x315   : > { %2299 = vmatprep.subr.bf16.mxu0 %v9640_v40  ;;  %v9677_v40 = vld [vmem:[%s10557_s8 + $0x40] ss:$8 sps:$4 sm:$0xff]  }
 0x318   : > { %2300 = vmatpush1.bf16.msra.mxu0 %v9638_v41  ;;  %v9685_v41 = vld [vmem:[%s10557_s8 + $0x54] ss:$8 sps:$4 sm:$0xff]  }
 0x319   : > { %2301 = vmatprep.subr.bf16.mxu0 %v9643_v42  ;;  %v9683_v42 = vld [vmem:[%s10557_s8 + $0x50] ss:$8 sps:$4 sm:$0xff]  }
 0x31c   : > { %2302 = vmatpush1.bf16.msra.mxu0 %v9641_v43  ;;  %v9691_v43 = vld [vmem:[%s10557_s8 + $0x64] ss:$8 sps:$4 sm:$0xff]  }
 0x31d   : > { %2303 = vmatprep.subr.bf16.mxu0 %v9646_v44  ;;  %v9689_v44 = vld [vmem:[%s10557_s8 + $0x60] ss:$8 sps:$4 sm:$0xff]  }
 0x320   : > { %2304 = vmatpush1.bf16.msra.mxu0 %v9644_v45  ;;  %v9697_v45 = vld [vmem:[%s10557_s8 + $0x74] ss:$8 sps:$4 sm:$0xff]  }
 0x321   : > { %2305 = vmatprep.subr.bf16.mxu0 %v9649_v46  ;;  %v9695_v46 = vld [vmem:[%s10557_s8 + $0x70] ss:$8 sps:$4 sm:$0xff]  }
 0x324   : > { %2306 = vmatpush1.bf16.msra.mxu0 %v9647_v47  ;;  %v9703_v47 = vld [vmem:[%s10557_s8 + $0x84] ss:$8 sps:$4 sm:$0xff]  }
 0x325   : > { %2307 = vmatprep.subr.bf16.mxu0 %v9652_v49  ;;  %v9701_v49 = vld [vmem:[%s10557_s8 + $0x80] ss:$8 sps:$4 sm:$0xff]  }
 0x328   : > { %2308 = vmatpush1.bf16.msra.mxu0 %v9650_v51  ;;  %v9709_v51 = vld [vmem:[%s10557_s8 + $0x94] ss:$8 sps:$4 sm:$0xff]  }
 0x329   : > { %2862 = vmatprep.subr.bf16.mxu0 %v9658_v55  ;;  %v9721_v55 = vld [vmem:[%s10557_s8 + $0xb4] ss:$8 sps:$4 sm:$0xff]  }
 0x32b   : > { %2310 = vmatmul.mubr.bf16.vlgmr.msra.gmra.mrb[16].mxu0 %v10786_v1 }
 0x32c   : > { %2863 = vmatpush1.bf16.msra.mxu0 %v9656_v54  ;;  %v9713_v54 = vld [vmem:[%s10557_s8 + $0xa0] ss:$8 sps:$4 sm:$0xff]  }
 0x32d   : > { %2864 = vmatprep.subr.bf16.mxu0 %v9664_v56  ;;  %v9719_v56 = vld [vmem:[%s10557_s8 + $0xb0] ss:$8 sps:$4 sm:$0xff]  }
 0x330   : > { %2865 = vmatpush1.bf16.msra.mxu0 %v9662_v57  ;;  %v9727_v57 = vld [vmem:[%s10557_s8 + $0xc4] ss:$8 sps:$4 sm:$0xff]  }
 0x331   : > { %2866 = vmatprep.subr.bf16.mxu0 %v9670_v58  ;;  %v9725_v58 = vld [vmem:[%s10557_s8 + $0xc0] ss:$8 sps:$4 sm:$0xff]  }
 0x334   : > { %2867 = vmatpush1.bf16.msra.mxu0 %v9668_v59  ;;  %v9733_v59 = vld [vmem:[%s10557_s8 + $0xd4] ss:$8 sps:$4 sm:$0xff]  }
 0x335   : > { %2868 = vmatprep.subr.bf16.mxu0 %v9676_v60  ;;  %v9736_v60 = vld [vmem:[%s10557_s8 + $0x1d4] ss:$8 sps:$4 sm:$0xff]  }
 0x338   : > { %2869 = vmatpush1.bf16.msra.mxu0 %v9674_v61  ;;  %v9731_v61 = vld [vmem:[%s10557_s8 + $0xd0] ss:$8 sps:$4 sm:$0xff]  }
 0x339   : > { %2870 = vmatprep.subr.bf16.mxu0 %v9682_v62  ;;  %v9734_v62 = vld [vmem:[%s10557_s8 + $0x1d0] ss:$8 sps:$4 sm:$0xff]  }
 0x33c   : > { %2871 = vmatpush1.bf16.msra.mxu0 %v9680_v63  ;;  %v9739_v63 = vld [vmem:[%s10557_s8 + $0xe4] ss:$8 sps:$4 sm:$0xff]  }
 0x33d   : > { %2872 = vmatprep.subr.bf16.mxu0 %v9688_v0  ;;  %v9742_v0 = vld [vmem:[%s10557_s8 + $0x1e4] ss:$8 sps:$4 sm:$0xff]  }
 0x340   : > { %2873 = vmatpush1.bf16.msra.mxu0 %v9686_v3  ;;  %v9737_v3 = vld [vmem:[%s10557_s8 + $0xe0] ss:$8 sps:$4 sm:$0xff]  }
 0x341   : > { %2874 = vmatprep.subr.bf16.mxu0 %v9694_v4  ;;  %v9740_v4 = vld [vmem:[%s10557_s8 + $0x1e0] ss:$8 sps:$4 sm:$0xff]  }
 0x344   : > { %2875 = vmatpush1.bf16.msra.mxu0 %v9692_v5  ;;  %v9745_v5 = vld [vmem:[%s10557_s8 + $0xf4] ss:$8 sps:$4 sm:$0xff]  }
 0x345   : > { %2876 = vmatprep.subr.bf16.mxu0 %v9700_v6  ;;  %v9748_v6 = vld [vmem:[%s10557_s8 + $0x1f4] ss:$8 sps:$4 sm:$0xff]  }
 0x348   : > { %2877 = vmatpush1.bf16.msra.mxu0 %v9698_v7  ;;  %v9743_v7 = vld [vmem:[%s10557_s8 + $0xf0] ss:$8 sps:$4 sm:$0xff]  }
 0x349   : > { %2878 = vmatprep.subr.bf16.mxu0 %v9706_v8  ;;  %v9746_v8 = vld [vmem:[%s10557_s8 + $0x1f0] ss:$8 sps:$4 sm:$0xff]  }
 0x34c   : > { %2879 = vmatpush1.bf16.msra.mxu0 %v9704_v9  ;;  %v2410_v9 = vld [vmem:[%s10547_s29] sm:$0x3] }
 0x34d   : > { %2880 = vmatprep.subr.bf16.mxu0 %v9712_v10 }
 0x350   : > { %2881 = vmatpush1.bf16.msra.mxu0 %v9710_v11 }
 0x351   : > { %2882 = vmatprep.subr.bf16.mxu0 %v9718_v12  ;;  %v2415_v12 = vrot.slane %v2410_v9, %v10779_v48 }
 0x354   : > { %2883 = vmatpush1.bf16.msra.mxu0 %v9716_v13 }
 0x355   : > { %2884 = vmatprep.subr.bf16.mxu0 %v9724_v14 }
 0x358   : > { %2885 = vmatpush1.bf16.msra.mxu0 %v9722_v15  ;;  %v2419_v15 = vrot.slane %v2410_v9, %v10782_v50  ;;  %v9784_v9 = vld [vmem:[%s10557_s8 + $0x2b4] ss:$8 sps:$4 sm:$0xff]  }
 0x359   : > { %2886 = vmatprep.subr.bf16.mxu0 %v9730_v16 }
 0x35c   : > { %2887 = vmatpush1.bf16.msra.mxu0 %v9728_v17 }
 0x35d   : > { %2888 = vmatprep.subr.bf16.mxu0 %v9736_v60  ;;  %v9764_v60 = vld [vmem:[%s10557_s8 + $0x250] ss:$8 sps:$4 sm:$0xff]  }
 0x360   : > { %2889 = vmatpush1.bf16.msra.mxu0 %v9734_v62  ;;  %v9767_v62 = vld [vmem:[%s10557_s8 + $0x260] ss:$8 sps:$4 sm:$0xff]  }
 0x361   : > { %2890 = vmatprep.subr.bf16.mxu0 %v9742_v0  ;;  %v9770_v0 = vld [vmem:[%s10557_s8 + $0x270] ss:$8 sps:$4 sm:$0xff]  }
 0x364   : > { %2891 = vmatpush1.bf16.msra.mxu0 %v9740_v4  ;;  %v9773_v4 = vld [vmem:[%s10557_s8 + $0x280] ss:$8 sps:$4 sm:$0xff]  }
 0x365   : > { %2892 = vmatprep.subr.bf16.mxu0 %v9748_v6  ;;  %v9776_v6 = vld [vmem:[%s10557_s8 + $0x290] ss:$8 sps:$4 sm:$0xff]  }
 0x368   : > { %2893 = vmatpush1.bf16.msra.mxu0 %v9746_v8  ;;  %v9779_v8 = vld [vmem:[%s10557_s8 + $0x2a0] ss:$8 sps:$4 sm:$0xff]  }
 0x3be   : > { %v10867_v18 = vpop.f32.mrb[12].mxu0 }
 0x3bf   : > { %v10869_v19 = vpop.f32.mrb[13].mxu0 }
 0x3c2   : > { %v10871_v21 = vpop.f32.mrb[14].mxu0 }
 0x3c3   : > { %v10873_v22 = vpop.f32.mrb[15].mxu0 }
 0x3fe   : > { %v2311_v23 = vpop.f32.mrb[16].mxu0 }
 0x3ff   : > { %v2313_v24 = vpop.f32.mrb[17].mxu0 }
 0x400   : > { %v2315_v25 = vpop.f32.mrb[18].mxu0 }
 0x401   : > { %v9331_v26 = vpack.c.bf16 %v2315_v25, %v2311_v23  ;;  %v2317_v27 = vpop.f32.mrb[19].mxu0 }
 0x402   : > { %v9329_v28 = vpack.c.bf16 %v2317_v27, %v2313_v24 }
 0x404   : > { %9330 = vmatprep.subr.bf16.mxu1 %v9329_v28 }
 0x405   : > { %9332 = vmatpush1.bf16.msra.mxu1 %v9331_v26 }
 0x406   : > { %2624 = vmatprep.subr.bf16.mxu1 %v9655_v29 }
 0x408   : > { %8358 = vmatmul.mubr.msk.f32.vlgmr.msra.gmra.mrb[12].mxu1 %vm1079_vm1, %v8356_v30 }
 0x409   : > { %2399 = vmatprep.mubr.f32.mxu1 %v10507_v20  ;;  %2625 = vmatpush1.bf16.msra.mxu1 %v9653_v31 }
 0x40a   : > { %2626 = vmatprep.subr.bf16.mxu1 %v9661_v32 }
 0x40c   : > { %8359 = vmatmul.mubr.msk.f32.gmra.mrb[14].mxu1 %vm1079_vm1, %v8357_v33 }
 0x40d   : > { %2627 = vmatpush1.bf16.msra.mxu1 %v9659_v34 }
 0x40e   : > { %2628 = vmatprep.subr.bf16.mxu1 %v9667_v35 }
 0x411   : > { %2629 = vmatpush1.bf16.msra.mxu1 %v9665_v36 }
 0x412   : > { %2630 = vmatprep.subr.bf16.mxu1 %v9673_v37 }
 0x415   : > { %2631 = vmatpush1.bf16.msra.mxu1 %v9671_v38 }
 0x416   : > { %2632 = vmatprep.subr.bf16.mxu1 %v9679_v39 }
 0x419   : > { %2633 = vmatpush1.bf16.msra.mxu1 %v9677_v40 }
 0x41a   : > { %2634 = vmatprep.subr.bf16.mxu1 %v9685_v41 }
 0x41d   : > { %2635 = vmatpush1.bf16.msra.mxu1 %v9683_v42 }
 0x41e   : > { %2636 = vmatprep.subr.bf16.mxu1 %v9691_v43  ;;  %v8456_v43 = vld [vmem:[%s10552_s3 + $0x10] sm:$0xff] }
 0x421   : > { %2637 = vmatpush1.bf16.msra.mxu1 %v9689_v44  ;;  %v9751_v44 = vld [vmem:[%s10557_s8 + $0x204] ss:$8 sps:$4 sm:$0xff]  }
 0x422   : > { %2638 = vmatprep.subr.bf16.mxu1 %v9697_v45  ;;  %v8457_v45 = vld [vmem:[%s10552_s3 + $0x18] sm:$0xff] }
 0x425   : > { %2639 = vmatpush1.bf16.msra.mxu1 %v9695_v46  ;;  %v9749_v46 = vld [vmem:[%s10557_s8 + $0x200] ss:$8 sps:$4 sm:$0xff]  }
 0x426   : > { %2640 = vmatprep.subr.bf16.mxu1 %v9703_v47  ;;  %v2667_v47 = vld [vmem:[%s10552_s3] sm:$0xff] }
 0x429   : > { %2641 = vmatpush1.bf16.msra.mxu1 %v9701_v49  ;;  %v9754_v49 = vld [vmem:[%s10557_s8 + $0x214] ss:$8 sps:$4 sm:$0xff]  }
 0x42a   : > { %2642 = vmatprep.subr.bf16.mxu1 %v9709_v51  ;;  %v9752_v51 = vld [vmem:[%s10557_s8 + $0x210] ss:$8 sps:$4 sm:$0xff]  }
 0x42d   : > { %2643 = vmatpush1.bf16.msra.mxu1 %v9707_v52  ;;  %v2668_v52 = vld [vmem:[%s10552_s3 + $0x8] sm:$0xff] }
 0x42e   : > { %2644 = vmatprep.subr.bf16.mxu1 %v9715_v53  ;;  %v9757_v53 = vld [vmem:[%s10557_s8 + $0x224] ss:$8 sps:$4 sm:$0xff]  }
 0x431   : > { %2645 = vmatpush1.bf16.msra.mxu1 %v9713_v54  ;;  %v9755_v54 = vld [vmem:[%s10557_s8 + $0x220] ss:$8 sps:$4 sm:$0xff]  }
 0x432   : > { %2646 = vmatprep.subr.bf16.mxu1 %v9721_v55  ;;  %v9760_v55 = vld [vmem:[%s10557_s8 + $0x234] ss:$8 sps:$4 sm:$0xff]  }
 0x435   : > { %2647 = vmatpush1.bf16.msra.mxu1 %v9719_v56  ;;  %v9758_v56 = vld [vmem:[%s10557_s8 + $0x230] ss:$8 sps:$4 sm:$0xff]  }
 0x436   : > { %2648 = vmatprep.subr.bf16.mxu1 %v9727_v57  ;;  %v9763_v57 = vld [vmem:[%s10557_s8 + $0x244] ss:$8 sps:$4 sm:$0xff]  }
 0x439   : > { %2649 = vmatpush1.bf16.msra.mxu1 %v9725_v58  ;;  %v9761_v58 = vld [vmem:[%s10557_s8 + $0x240] ss:$8 sps:$4 sm:$0xff]  }
 0x43a   : > { %2650 = vmatprep.subr.bf16.mxu1 %v9733_v59  ;;  %v9766_v59 = vld [vmem:[%s10557_s8 + $0x254] ss:$8 sps:$4 sm:$0xff]  }
 0x43d   : > { %2651 = vmatpush1.bf16.msra.mxu1 %v9731_v61  ;;  %v9769_v61 = vld [vmem:[%s10557_s8 + $0x264] ss:$8 sps:$4 sm:$0xff]  }
 0x43e   : > { %2652 = vmatprep.subr.bf16.mxu1 %v9739_v63  ;;  %v9772_v63 = vld [vmem:[%s10557_s8 + $0x274] ss:$8 sps:$4 sm:$0xff]  }
 0x441   : > { %2653 = vmatpush1.bf16.msra.mxu1 %v9737_v3  ;;  %v9775_v3 = vld [vmem:[%s10557_s8 + $0x284] ss:$8 sps:$4 sm:$0xff]  }
 0x442   : > { %2654 = vmatprep.subr.bf16.mxu1 %v9745_v5  ;;  %v9778_v5 = vld [vmem:[%s10557_s8 + $0x294] ss:$8 sps:$4 sm:$0xff]  }
 0x445   : > { %2655 = vmatpush1.bf16.msra.mxu1 %v9743_v7  ;;  %v9781_v7 = vld [vmem:[%s10557_s8 + $0x2a4] ss:$8 sps:$4 sm:$0xff]  }
 0x4db   : > { %v2395_v10 = vpop.f32.mrb[12].mxu1 }
 0x4dc   : > { %v9393_v11 = vadd.f32 %v2395_v10, %v10867_v18  ;;  %v2397_v13 = vpop.f32.mrb[13].mxu1  ;;  %v9782_v10 = vld [vmem:[%s10557_s8 + $0x2b0] ss:$8 sps:$4 sm:$0xff]  }
 0x4dd   : > { %v9394_v14 = vadd.f32 %v2397_v13, %v10869_v19  ;;  %v9790_v13 = vld [vmem:[%s10557_s8 + $0x2d4] ss:$8 sps:$4 sm:$0xff]  }
 0x4de   : > { %v2422_v17 = vadd.f32 %v9393_v11, %v2415_v12  ;;  %v9787_v11 = vld [vmem:[%s10557_s8 + $0x2c4] ss:$8 sps:$4 sm:$0xff]  }
 0x4df   : > { %v2401_v16 = vpop.f32.mrb[14].mxu1  ;;  %v2423_v25 = vadd.f32 %v9394_v14, %v2419_v15  ;;  %v9788_v14 = vld [vmem:[%s10557_s8 + $0x2d0] ss:$8 sps:$4 sm:$0xff]  }
 0x4e0   : > { %v9395_v23 = vadd.f32 %v2401_v16, %v10871_v21  ;;  %v2403_v24 = vpop.f32.mrb[15].mxu1  ;;  %v2426_v29 = vmax.f32 %v2422_v17, 0.0  ;;  %v9791_v16 = vld [vmem:[%s10557_s8 + $0x2e0] ss:$8 sps:$4 sm:$0xff]   ;;  %v9796_v17 = vld [vmem:[%s10557_s8 + $0x2f4] ss:$8 sps:$4 sm:$0xff]  }
 0x4e1   : > { %v9396_v26 = vadd.f32 %v2403_v24, %v10873_v22  ;;  %v2427_v18 = vmax.f32 %v2423_v25, 0.0  ;;  %v9797_v24 = vld [vmem:[%s10602_s4] ss:$8 sps:$4 sm:$0xff]   ;;  %v9799_v25 = vld [vmem:[%s10602_s4 + $0x4] ss:$8 sps:$4 sm:$0xff]  }
 0x4e2   : > { %v2424_v27 = vadd.f32 %v9395_v23, %v2415_v12  ;;  %v9785_v12 = vld [vmem:[%s10557_s8 + $0x2c0] ss:$8 sps:$4 sm:$0xff]   ;;  %v9794_v23 = vld [vmem:[%s10557_s8 + $0x2f0] ss:$8 sps:$4 sm:$0xff]   ;;  %3619 = vmatprep.subr.bf16.mxu0 %v9799_v25 }
 0x4e3   : > { %v2425_v28 = vadd.f32 %v9396_v26, %v2419_v15  ;;  %v9793_v15 = vld [vmem:[%s10557_s8 + $0x2e4] ss:$8 sps:$4 sm:$0xff]   ;;  %v9802_v26 = vld [vmem:[%s10602_s4 + $0x14] ss:$8 sps:$4 sm:$0xff]  }
 0x4e4   : > { %v2428_v30 = vmax.f32 %v2424_v27, 0.0  ;;  %v9800_v27 = vld [vmem:[%s10602_s4 + $0x10] ss:$8 sps:$4 sm:$0xff]  }
 0x4e5   : > { %v2429_v31 = vmax.f32 %v2425_v28, 0.0  ;;  %v9805_v28 = vld [vmem:[%s10602_s4 + $0x24] ss:$8 sps:$4 sm:$0xff]  }
 0x4e6   : > { %v10925_v32 = vpack.c.bf16 %v2428_v30, %v2426_v29  ;;  %v9803_v29 = vld [vmem:[%s10602_s4 + $0x20] ss:$8 sps:$4 sm:$0xff]   ;;  %v9808_v30 = vld [vmem:[%s10602_s4 + $0x34] ss:$8 sps:$4 sm:$0xff]  }
 0x4e7   : > { %v2431_v33 = vpack.c.bf16 %v2429_v31, %v2427_v18  ;;  %v9806_v18 = vld [vmem:[%s10602_s4 + $0x30] ss:$8 sps:$4 sm:$0xff]   ;;  %v9811_v31 = vld [vmem:[%s10602_s4 + $0x44] ss:$8 sps:$4 sm:$0xff]  }
 0x4e9   : > { %2656 = vmatprep.mubr.bf16.mxu1 %v2431_v33  ;;  %2894 = vmatprep.mubr.bf16.mxu0 %v2431_v33 }
 0x4ea   : > { %2657 = vmatmul.mubr.bf16.vlgmr.msra.gmra.mrb[16].mxu1 %v10925_v32  ;;  %2895 = vmatmul.mubr.bf16.vlgmr.msra.gmra.mrb[20].mxu0 %v10925_v32 }
 0x4eb   : > { %2978 = vmatprep.mubr.f32.mxu1 %v10507_v20  ;;  %3620 = vmatpush1.bf16.msra.mxu0 %v9797_v24 }
 0x4ec   : > { %3621 = vmatprep.subr.bf16.mxu0 %v9802_v26 }
 0x4ef   : > { %3622 = vmatpush1.bf16.msra.mxu0 %v9800_v27 }
 0x4f0   : > { %3623 = vmatprep.subr.bf16.mxu0 %v9805_v28 }
 0x4f3   : > { %3624 = vmatpush1.bf16.msra.mxu0 %v9803_v29 }
 0x4f4   : > { %3625 = vmatprep.subr.bf16.mxu0 %v9808_v30  ;;  %v9845_v30 = vld [vmem:[%s10572_s24 + $0x100] ss:$8 sps:$4 sm:$0xff]  }
 0x4f7   : > { %3626 = vmatpush1.bf16.msra.mxu0 %v9806_v18  ;;  %v9850_v18 = vld [vmem:[%s10572_s24 + $0x114] ss:$8 sps:$4 sm:$0xff]  }
 0x4f8   : > { %3627 = vmatprep.subr.bf16.mxu0 %v9811_v31  ;;  %v9853_v31 = vld [vmem:[%s10572_s24 + $0x124] ss:$8 sps:$4 sm:$0xff]  }
 0x5bd   : > { %v2658_v19 = vpop.f32.mrb[16].mxu1  ;;  %v2896_v21 = vpop.f32.mrb[20].mxu0 }
 0x5be   : > { %v2660_v22 = vpop.f32.mrb[17].mxu1  ;;  %v2898_v34 = vpop.f32.mrb[21].mxu0 }
 0x5bf   : > { %v2662_v35 = vpop.f32.mrb[18].mxu1  ;;  %v2900_v36 = vpop.f32.mrb[22].mxu0 }
 0x5c0   : > { %v9339_v37 = vpack.c.bf16 %v2662_v35, %v2658_v19  ;;  %v9335_v38 = vpack.c.bf16 %v2900_v36, %v2896_v21  ;;  %v2664_v39 = vpop.f32.mrb[19].mxu1  ;;  %v2902_v40 = vpop.f32.mrb[23].mxu0  ;;  %v9812_v19 = vld [vmem:[%s10602_s4 + $0x50] ss:$8 sps:$4 sm:$0xff]   ;;  %v9817_v21 = vld [vmem:[%s10602_s4 + $0x64] ss:$8 sps:$4 sm:$0xff]  }
 0x5c1   : > { %v9337_v41 = vpack.c.bf16 %v2664_v39, %v2660_v22  ;;  %v9333_v42 = vpack.c.bf16 %v2902_v40, %v2898_v34  ;;  %v9815_v22 = vld [vmem:[%s10602_s4 + $0x60] ss:$8 sps:$4 sm:$0xff]   ;;  %v9820_v34 = vld [vmem:[%s10602_s4 + $0x74] ss:$8 sps:$4 sm:$0xff]   ;;  %v9818_v35 = vld [vmem:[%s10602_s4 + $0x70] ss:$8 sps:$4 sm:$0xff]  }
 0x5c2   : > { %v9823_v36 = vld [vmem:[%s10602_s4 + $0x84] ss:$8 sps:$4 sm:$0xff]   ;;  %v9824_v39 = vld [vmem:[%s10602_s4 + $0x90] ss:$8 sps:$4 sm:$0xff]  }
 0x5c3   : > { %9334 = vmatprep.subr.bf16.mxu1 %v9333_v42  ;;  %v9829_v40 = vld [vmem:[%s10602_s4 + $0xa4] ss:$8 sps:$4 sm:$0xff]   ;;  %v9832_v42 = vld [vmem:[%s10602_s4 + $0xb4] ss:$8 sps:$4 sm:$0xff]  }
 0x5c4   : > { %9336 = vmatpush1.bf16.msra.mxu1 %v9335_v38  ;;  %v9826_v38 = vld [vmem:[%s10602_s4 + $0x94] ss:$8 sps:$4 sm:$0xff]  }
 0x5c5   : > { %9338 = vmatprep.subr.bf16.mxu1 %v9337_v41  ;;  %v9827_v41 = vld [vmem:[%s10602_s4 + $0xa0] ss:$8 sps:$4 sm:$0xff]  }
 0x5c7   : > { %8458 = vmatmul.mubr.msk.f32.vlgmr.msra.gmra.mrb[20].mxu1 %vm1079_vm1, %v8456_v43  ;;  %v9830_v43 = vld [vmem:[%s10602_s4 + $0xb0] ss:$8 sps:$4 sm:$0xff]  }
 0x5c8   : > { %9340 = vmatpush1.bf16.msra.mxu1 %v9339_v37  ;;  %2984 = vmatprep.mubr.f32.mxu1 %v10507_v20  ;;  %v9821_v37 = vld [vmem:[%s10602_s4 + $0x80] ss:$8 sps:$4 sm:$0xff]  }
 0x5c9   : > { %3267 = vmatprep.subr.bf16.mxu1 %v9751_v44  ;;  %v9835_v44 = vld [vmem:[%s10602_s4 + $0xc4] ss:$8 sps:$4 sm:$0xff]  }
 0x5cb   : > { %8459 = vmatmul.mubr.msk.f32.gmra.mrb[22].mxu1 %vm1079_vm1, %v8457_v45  ;;  %v9833_v45 = vld [vmem:[%s10602_s4 + $0xc0] ss:$8 sps:$4 sm:$0xff]  }
 0x5cc   : > { %3061 = vmatprep.mubr.f32.mxu1 %v10507_v20 }
 0x5cf   : > { %8460 = vmatmul.mubr.msk.f32.vlgmr.msra.gmra.mrb[20].mxu1 %vm1079_vm1, %v2667_v47 }
 0x5d0   : > { %3268 = vmatpush1.bf16.msra.mxu1 %v9749_v46  ;;  %3067 = vmatprep.mubr.f32.mxu1 %v10507_v20 }
 0x5d1   : > { %3269 = vmatprep.subr.bf16.mxu1 %v9754_v49 }
 0x5d3   : > { %8461 = vmatmul.mubr.msk.f32.gmra.mrb[22].mxu1 %vm1079_vm1, %v2668_v52 }
 0x5d4   : > { %3270 = vmatpush1.bf16.msra.mxu1 %v9752_v51  ;;  %3299 = vmatprep.mubr.bf16.mxu1 %v2431_v33  ;;  %v9814_v33 = vld [vmem:[%s10602_s4 + $0x54] ss:$8 sps:$4 sm:$0xff]  }
 0x5d5   : > { %3271 = vmatprep.subr.bf16.mxu1 %v9757_v53 }
 0x5d8   : > { %3272 = vmatpush1.bf16.msra.mxu1 %v9755_v54  ;;  %v8526_v54 = vld [vmem:[%s10552_s3 + $0x20] sm:$0xff] }
 0x5d9   : > { %3273 = vmatprep.subr.bf16.mxu1 %v9760_v55  ;;  %v8527_v55 = vld [vmem:[%s10552_s3 + $0x28] sm:$0xff] }
 0x5dc   : > { %3274 = vmatpush1.bf16.msra.mxu1 %v9758_v56  ;;  %v9838_v56 = vld [vmem:[%s10602_s4 + $0xd4] ss:$8 sps:$4 sm:$0xff]  }
 0x5dd   : > { %3275 = vmatprep.subr.bf16.mxu1 %v9763_v57  ;;  %v9836_v57 = vld [vmem:[%s10602_s4 + $0xd0] ss:$8 sps:$4 sm:$0xff]  }
 0x5e0   : > { %3276 = vmatpush1.bf16.msra.mxu1 %v9761_v58  ;;  %v9841_v58 = vld [vmem:[%s10602_s4 + $0xe4] ss:$8 sps:$4 sm:$0xff]  }
 0x5e1   : > { %3277 = vmatprep.subr.bf16.mxu1 %v9766_v59  ;;  %v9839_v59 = vld [vmem:[%s10602_s4 + $0xe0] ss:$8 sps:$4 sm:$0xff]  }
 0x5e4   : > { %3278 = vmatpush1.bf16.msra.mxu1 %v9764_v60  ;;  %v9844_v60 = vld [vmem:[%s10602_s4 + $0xf4] ss:$8 sps:$4 sm:$0xff]  }
 0x5e5   : > { %3279 = vmatprep.subr.bf16.mxu1 %v9769_v61  ;;  %v9842_v61 = vld [vmem:[%s10602_s4 + $0xf0] ss:$8 sps:$4 sm:$0xff]  }
 0x5e8   : > { %3280 = vmatpush1.bf16.msra.mxu1 %v9767_v62  ;;  %v9847_v62 = vld [vmem:[%s10572_s24 + $0x104] ss:$8 sps:$4 sm:$0xff]  }
 0x5e9   : > { %3281 = vmatprep.subr.bf16.mxu1 %v9772_v63  ;;  %v3400_v63 = vld [vmem:[%s10562_s14] sm:$0x3] }
 0x5ec   : > { %3282 = vmatpush1.bf16.msra.mxu1 %v9770_v0  ;;  %v3405_v0 = vrot.slane %v3400_v63, %v10779_v48 }
 0x5ed   : > { %3283 = vmatprep.subr.bf16.mxu1 %v9775_v3  ;;  %v3409_v3 = vrot.slane %v3400_v63, %v10782_v50 }
 0x5f0   : > { %3284 = vmatpush1.bf16.msra.mxu1 %v9773_v4 }
 0x5f1   : > { %3285 = vmatprep.subr.bf16.mxu1 %v9778_v5 }
 0x5f4   : > { %3286 = vmatpush1.bf16.msra.mxu1 %v9776_v6 }
 0x5f5   : > { %3287 = vmatprep.subr.bf16.mxu1 %v9781_v7 }
 0x5f8   : > { %3288 = vmatpush1.bf16.msra.mxu1 %v9779_v8  ;;  %v1438_v8 = vunpack.c.l.bf16 %v10786_v1 }
 0x5f9   : > { %3289 = vmatprep.subr.bf16.mxu1 %v9784_v9  ;;  %v1439_v9 = vunpack.c.l.bf16 %v10788_v2 }
 0x5fc   : > { %3290 = vmatpush1.bf16.msra.mxu1 %v9782_v10 }
 0x5fd   : > { %3291 = vmatprep.subr.bf16.mxu1 %v9787_v11 }
 0x600   : > { %3292 = vmatpush1.bf16.msra.mxu1 %v9785_v12  ;;  %v1440_v12 = vunpack.c.h.bf16 %v10786_v1 }
 0x601   : > { %3293 = vmatprep.subr.bf16.mxu1 %v9790_v13 }
 0x604   : > { %3294 = vmatpush1.bf16.msra.mxu1 %v9788_v14 }
 0x605   : > { %3295 = vmatprep.subr.bf16.mxu1 %v9793_v15 }
 0x608   : > { %3296 = vmatpush1.bf16.msra.mxu1 %v9791_v16  ;;  %v1441_v16 = vunpack.c.h.bf16 %v10788_v2  ;;  %v9848_v2 = vld [vmem:[%s10572_s24 + $0x110] ss:$8 sps:$4 sm:$0xff]  }
 0x609   : > { %3297 = vmatprep.subr.bf16.mxu1 %v9796_v17 }
 0x60c   : > { %3298 = vmatpush1.bf16.msra.mxu1 %v9794_v23 }
 0x60f   : > { %3300 = vmatmul.mubr.bf16.vlgmr.msra.gmra.mrb[24].mxu1 %v10925_v32  ;;  %v9809_v32 = vld [vmem:[%s10602_s4 + $0x40] ss:$8 sps:$4 sm:$0xff]  }
 0x610   : > { %3383 = vmatprep.mubr.f32.mxu1 %v10507_v20  ;;  %3628 = vmatpush1.bf16.msra.mxu0 %v9809_v32  ;;  %v9851_v32 = vld [vmem:[%s10572_s24 + $0x120] ss:$8 sps:$4 sm:$0xff]  }
 0x611   : > { %3629 = vmatprep.subr.bf16.mxu0 %v9814_v33  ;;  %v9856_v33 = vld [vmem:[%s10572_s24 + $0x134] ss:$8 sps:$4 sm:$0xff]  }
 0x614   : > { %3630 = vmatpush1.bf16.msra.mxu0 %v9812_v19  ;;  %v9854_v19 = vld [vmem:[%s10572_s24 + $0x130] ss:$8 sps:$4 sm:$0xff]  }
 0x615   : > { %3631 = vmatprep.subr.bf16.mxu0 %v9817_v21  ;;  %v9859_v21 = vld [vmem:[%s10572_s24 + $0x144] ss:$8 sps:$4 sm:$0xff]  }
 0x618   : > { %3632 = vmatpush1.bf16.msra.mxu0 %v9815_v22  ;;  %v9857_v22 = vld [vmem:[%s10572_s24 + $0x140] ss:$8 sps:$4 sm:$0xff]  }
 0x619   : > { %3633 = vmatprep.subr.bf16.mxu0 %v9820_v34  ;;  %v9862_v34 = vld [vmem:[%s10572_s24 + $0x154] ss:$8 sps:$4 sm:$0xff]  }
 0x61c   : > { %3634 = vmatpush1.bf16.msra.mxu0 %v9818_v35  ;;  %v9860_v35 = vld [vmem:[%s10572_s24 + $0x150] ss:$8 sps:$4 sm:$0xff]  }
 0x61d   : > { %3635 = vmatprep.subr.bf16.mxu0 %v9823_v36  ;;  %v9865_v36 = vld [vmem:[%s10572_s24 + $0x164] ss:$8 sps:$4 sm:$0xff]  }
 0x620   : > { %3636 = vmatpush1.bf16.msra.mxu0 %v9821_v37  ;;  %v9863_v37 = vld [vmem:[%s10572_s24 + $0x160] ss:$8 sps:$4 sm:$0xff]  }
 0x621   : > { %3637 = vmatprep.subr.bf16.mxu0 %v9826_v38  ;;  %v9868_v38 = vld [vmem:[%s10572_s24 + $0x174] ss:$8 sps:$4 sm:$0xff]  }
 0x624   : > { %3638 = vmatpush1.bf16.msra.mxu0 %v9824_v39  ;;  %v9866_v39 = vld [vmem:[%s10572_s24 + $0x170] ss:$8 sps:$4 sm:$0xff]  }
 0x625   : > { %3639 = vmatprep.subr.bf16.mxu0 %v9829_v40  ;;  %v9871_v40 = vld [vmem:[%s10572_s24 + $0x184] ss:$8 sps:$4 sm:$0xff]  }
 0x628   : > { %3640 = vmatpush1.bf16.msra.mxu0 %v9827_v41  ;;  %v9869_v41 = vld [vmem:[%s10572_s24 + $0x180] ss:$8 sps:$4 sm:$0xff]  }
 0x629   : > { %3641 = vmatprep.subr.bf16.mxu0 %v9832_v42  ;;  %v9874_v42 = vld [vmem:[%s10572_s24 + $0x194] ss:$8 sps:$4 sm:$0xff]  }
 0x62c   : > { %3642 = vmatpush1.bf16.msra.mxu0 %v9830_v43  ;;  %v9872_v43 = vld [vmem:[%s10572_s24 + $0x190] ss:$8 sps:$4 sm:$0xff]  }
 0x62d   : > { %3643 = vmatprep.subr.bf16.mxu0 %v9835_v44  ;;  %v9877_v44 = vld [vmem:[%s10572_s24 + $0x1a4] ss:$8 sps:$4 sm:$0xff]  }
 0x630   : > { %3644 = vmatpush1.bf16.msra.mxu0 %v9833_v45  ;;  %v9875_v45 = vld [vmem:[%s10572_s24 + $0x1a0] ss:$8 sps:$4 sm:$0xff]  }
 0x631   : > { %3645 = vmatprep.subr.bf16.mxu0 %v9838_v56  ;;  %v9892_v56 = vld [vmem:[%s10572_s24 + $0x1f4] ss:$8 sps:$4 sm:$0xff]  }
 0x634   : > { %3646 = vmatpush1.bf16.msra.mxu0 %v9836_v57  ;;  %v9890_v57 = vld [vmem:[%s10572_s24 + $0x1f0] ss:$8 sps:$4 sm:$0xff]  }
 0x635   : > { %3647 = vmatprep.subr.bf16.mxu0 %v9841_v58 }
 0x638   : > { %3648 = vmatpush1.bf16.msra.mxu0 %v9839_v59 }
 0x639   : > { %3649 = vmatprep.subr.bf16.mxu0 %v9844_v60 }
 0x63c   : > { %3650 = vmatpush1.bf16.msra.mxu0 %v9842_v61 }
 0x63d   : > { %4165 = vmatprep.subr.bf16.mxu0 %v9847_v62 }
 0x6e2   : > { %v3301_v46 = vpop.f32.mrb[24].mxu1 }
 0x6e3   : > { %v3303_v47 = vpop.f32.mrb[25].mxu1 }
 0x6e4   : > { %v3305_v49 = vpop.f32.mrb[26].mxu1 }
 0x6e5   : > { %v9343_v51 = vpack.c.bf16 %v3305_v49, %v3301_v46  ;;  %v3307_v52 = vpop.f32.mrb[27].mxu1  ;;  %v9880_v46 = vld [vmem:[%s10572_s24 + $0x1b4] ss:$8 sps:$4 sm:$0xff]   ;;  %v9883_v49 = vld [vmem:[%s10572_s24 + $0x1c4] ss:$8 sps:$4 sm:$0xff]  }
 0x6e6   : > { %v9341_v53 = vpack.c.bf16 %v3307_v52, %v3303_v47  ;;  %v9878_v47 = vld [vmem:[%s10572_s24 + $0x1b0] ss:$8 sps:$4 sm:$0xff]   ;;  %v9886_v52 = vld [vmem:[%s10572_s24 + $0x1d4] ss:$8 sps:$4 sm:$0xff]  }
 0x6e8   : > { %9342 = vmatprep.subr.bf16.mxu1 %v9341_v53  ;;  %v9884_v53 = vld [vmem:[%s10572_s24 + $0x1d0] ss:$8 sps:$4 sm:$0xff]  }
 0x6e9   : > { %9344 = vmatpush1.bf16.msra.mxu1 %v9343_v51  ;;  %v9881_v51 = vld [vmem:[%s10572_s24 + $0x1c0] ss:$8 sps:$4 sm:$0xff]  }
 0x6ec   : > { %8528 = vmatmul.mubr.msk.f32.vlgmr.msra.gmra.mrb[20].mxu1 %vm1079_vm1, %v8526_v54  ;;  %v9889_v54 = vld [vmem:[%s10572_s24 + $0x1e4] ss:$8 sps:$4 sm:$0xff]  }
 0x6ed   : > { %3389 = vmatprep.mubr.f32.mxu1 %v10507_v20 }
 0x6f0   : > { %8529 = vmatmul.mubr.msk.f32.gmra.mrb[22].mxu1 %vm1079_vm1, %v8527_v55  ;;  %v9887_v55 = vld [vmem:[%s10572_s24 + $0x1e0] ss:$8 sps:$4 sm:$0xff]  }
 0x6f1   : > { %3729 = vmatprep.mubr.f32.mxu1 %v10507_v20 }
 0x7bf   : > { %v3385_v4 = vpop.f32.mrb[20].mxu1 }
 0x7c0   : > { %v3412_v5 = vadd.f32 %v3405_v0, %v3385_v4  ;;  %v3387_v6 = vpop.f32.mrb[21].mxu1  ;;  %v9893_v4 = vld [vmem:[%s10572_s24] ss:$8 sps:$4 sm:$0xff]  }
 0x7c1   : > { %v3413_v7 = vadd.f32 %v3409_v3, %v3387_v6  ;;  %v9896_v6 = vld [vmem:[%s10572_s24 + $0x10] ss:$8 sps:$4 sm:$0xff]  }
 0x7c2   : > { %v3416_v11 = vadd.f32 %v3412_v5, %v1438_v8  ;;  %v9898_v5 = vld [vmem:[%s10572_s24 + $0x14] ss:$8 sps:$4 sm:$0xff]   ;;  %v9899_v8 = vld [vmem:[%s10572_s24 + $0x20] ss:$8 sps:$4 sm:$0xff]  }
 0x7c3   : > { %v3391_v10 = vpop.f32.mrb[22].mxu1  ;;  %v3417_v15 = vadd.f32 %v3413_v7, %v1439_v9  ;;  %v9901_v7 = vld [vmem:[%s10572_s24 + $0x24] ss:$8 sps:$4 sm:$0xff]   ;;  %v9904_v9 = vld [vmem:[%s10572_s24 + $0x34] ss:$8 sps:$4 sm:$0xff]  }
 0x7c4   : > { %v3414_v13 = vadd.f32 %v3405_v0, %v3391_v10  ;;  %v3393_v14 = vpop.f32.mrb[23].mxu1  ;;  %v3420_v25 = vmax.f32 %v3416_v11, 0.0  ;;  %v9895_v0 = vld [vmem:[%s10572_s24 + $0x4] ss:$8 sps:$4 sm:$0xff]   ;;  %v9902_v10 = vld [vmem:[%s10572_s24 + $0x30] ss:$8 sps:$4 sm:$0xff]  }
 0x7c5   : > { %v3415_v17 = vadd.f32 %v3409_v3, %v3393_v14  ;;  %v3421_v27 = vmax.f32 %v3417_v15, 0.0  ;;  %v3426_v3 = vld [vmem:[%s10597_s27] sm:$0xff]  ;;  %v9908_v14 = vld [vmem:[%s10572_s24 + $0x50] ss:$8 sps:$4 sm:$0xff]  }
 0x7c6   : > { %v3418_v23 = vadd.f32 %v3414_v13, %v1440_v12  ;;  %v9907_v11 = vld [vmem:[%s10572_s24 + $0x44] ss:$8 sps:$4 sm:$0xff]   ;;  %v9905_v12 = vld [vmem:[%s10572_s24 + $0x40] ss:$8 sps:$4 sm:$0xff]   ;;  %v9910_v13 = vld [vmem:[%s10572_s24 + $0x54] ss:$8 sps:$4 sm:$0xff]  }
 0x7c7   : > { %v3419_v24 = vadd.f32 %v3415_v17, %v1441_v16  ;;  %v9913_v15 = vld [vmem:[%s10572_s24 + $0x64] ss:$8 sps:$4 sm:$0xff]   ;;  %v9911_v16 = vld [vmem:[%s10572_s24 + $0x60] ss:$8 sps:$4 sm:$0xff]   ;;  %v9916_v17 = vld [vmem:[%s10572_s24 + $0x74] ss:$8 sps:$4 sm:$0xff]  }
 0x7c8   : > { %v3422_v26 = vmax.f32 %v3418_v23, 0.0  ;;  %v9914_v23 = vld [vmem:[%s10572_s24 + $0x70] ss:$8 sps:$4 sm:$0xff]  }
 0x7c9   : > { %v3423_v28 = vmax.f32 %v3419_v24, 0.0  ;;  %v9919_v24 = vld [vmem:[%s10572_s24 + $0x84] ss:$8 sps:$4 sm:$0xff]  }
 0x7ca   : > { %v11021_v29 = vpack.c.bf16 %v3422_v26, %v3420_v25  ;;  %v9917_v25 = vld [vmem:[%s10572_s24 + $0x80] ss:$8 sps:$4 sm:$0xff]   ;;  %v9922_v26 = vld [vmem:[%s10572_s24 + $0x94] ss:$8 sps:$4 sm:$0xff]  }
 0x7cb   : > { %v11023_v1 = vpack.c.bf16 %v3423_v28, %v3421_v27  ;;  %v9920_v27 = vld [vmem:[%s10572_s24 + $0x90] ss:$8 sps:$4 sm:$0xff]   ;;  %v9925_v28 = vld [vmem:[%s10572_s24 + $0xa4] ss:$8 sps:$4 sm:$0xff]  }
 0x7cd   : > { %3651 = vmatprep.mubr.bf16.mxu0 %v11023_v1 }
 0x7ce   : > { %3652 = vmatmul.mubr.bf16.vlgmr.msra.gmra.mrb[24].mxu0 %v11021_v29 }
 0x7cf   : > { %4166 = vmatpush1.bf16.msra.mxu0 %v9845_v30  ;;  %4197 = vmatprep.mubr.bf16.mxu0 %v11023_v1  ;;  %v9923_v30 = vld [vmem:[%s10572_s24 + $0xa0] ss:$8 sps:$4 sm:$0xff]  }
 0x7d0   : > { %4167 = vmatprep.subr.bf16.mxu0 %v9850_v18  ;;  %v9928_v18 = vld [vmem:[%s10572_s24 + $0xb4] ss:$8 sps:$4 sm:$0xff]  }
 0x7d3   : > { %4168 = vmatpush1.bf16.msra.mxu0 %v9848_v2  ;;  %v9926_v2 = vld [vmem:[%s10572_s24 + $0xb0] ss:$8 sps:$4 sm:$0xff]  }
 0x7d4   : > { %4169 = vmatprep.subr.bf16.mxu0 %v9853_v31  ;;  %v9931_v31 = vld [vmem:[%s10572_s24 + $0xc4] ss:$8 sps:$4 sm:$0xff]  }
 0x7d7   : > { %4170 = vmatpush1.bf16.msra.mxu0 %v9851_v32  ;;  %v9929_v32 = vld [vmem:[%s10572_s24 + $0xc0] ss:$8 sps:$4 sm:$0xff]  }
 0x7d8   : > { %4171 = vmatprep.subr.bf16.mxu0 %v9856_v33  ;;  %v9934_v33 = vld [vmem:[%s10572_s24 + $0xd4] ss:$8 sps:$4 sm:$0xff]  }
 0x7db   : > { %4172 = vmatpush1.bf16.msra.mxu0 %v9854_v19  ;;  %v9932_v19 = vld [vmem:[%s10572_s24 + $0xd0] ss:$8 sps:$4 sm:$0xff]  }
 0x7dc   : > { %4173 = vmatprep.subr.bf16.mxu0 %v9859_v21  ;;  %v9937_v21 = vld [vmem:[%s10572_s24 + $0xe4] ss:$8 sps:$4 sm:$0xff]  }
 0x7df   : > { %4174 = vmatpush1.bf16.msra.mxu0 %v9857_v22  ;;  %v9935_v22 = vld [vmem:[%s10572_s24 + $0xe0] ss:$8 sps:$4 sm:$0xff]  }
 0x7e0   : > { %4175 = vmatprep.subr.bf16.mxu0 %v9862_v34 }
 0x7e3   : > { %4176 = vmatpush1.bf16.msra.mxu0 %v9860_v35  ;;  %v9940_v35 = vld [vmem:[%s10572_s24 + $0xf4] ss:$8 sps:$4 sm:$0xff]  }
 0x7e4   : > { %4177 = vmatprep.subr.bf16.mxu0 %v9865_v36 }
 0x7e7   : > { %4178 = vmatpush1.bf16.msra.mxu0 %v9863_v37 }
 0x7e8   : > { %4179 = vmatprep.subr.bf16.mxu0 %v9868_v38 }
 0x7eb   : > { %4180 = vmatpush1.bf16.msra.mxu0 %v9866_v39 }
 0x7ec   : > { %4181 = vmatprep.subr.bf16.mxu0 %v9871_v40  ;;  %v9938_v40 = vld [vmem:[%s10572_s24 + $0xf0] ss:$8 sps:$4 sm:$0xff]  }
 0x7ef   : > { %4182 = vmatpush1.bf16.msra.mxu0 %v9869_v41 }
 0x7f0   : > { %4183 = vmatprep.subr.bf16.mxu0 %v9874_v42  ;;  %v8659_v42 = vld [vmem:[%s10567_s19 + $0x8] sm:$0xff] }
 0x7f3   : > { %4184 = vmatpush1.bf16.msra.mxu0 %v9872_v43 }
 0x7f4   : > { %4185 = vmatprep.subr.bf16.mxu0 %v9877_v44 }
 0x7f7   : > { %4186 = vmatpush1.bf16.msra.mxu0 %v9875_v45 }
 0x7f8   : > { %4187 = vmatprep.subr.bf16.mxu0 %v9880_v46 }
 0x7fb   : > { %4188 = vmatpush1.bf16.msra.mxu0 %v9878_v47 }
 0x7fc   : > { %4189 = vmatprep.subr.bf16.mxu0 %v9883_v49 }
 0x7ff   : > { %4190 = vmatpush1.bf16.msra.mxu0 %v9881_v51  ;;  %v9943_v51 = vld [vmem:[%s10572_s24 + $0x204] ss:$8 sps:$4 sm:$0xff]  }
 0x800   : > { %4191 = vmatprep.subr.bf16.mxu0 %v9886_v52  ;;  %v3971_v52 = vld [vmem:[%s10567_s19] sm:$0xff] }
 0x803   : > { %4192 = vmatpush1.bf16.msra.mxu0 %v9884_v53  ;;  %v9941_v53 = vld [vmem:[%s10572_s24 + $0x200] ss:$8 sps:$4 sm:$0xff]  }
 0x804   : > { %4193 = vmatprep.subr.bf16.mxu0 %v9889_v54  ;;  %v9946_v54 = vld [vmem:[%s10572_s24 + $0x214] ss:$8 sps:$4 sm:$0xff]  }
 0x807   : > { %4194 = vmatpush1.bf16.msra.mxu0 %v9887_v55  ;;  %v9944_v55 = vld [vmem:[%s10572_s24 + $0x210] ss:$8 sps:$4 sm:$0xff]  }
 0x808   : > { %4195 = vmatprep.subr.bf16.mxu0 %v9892_v56  ;;  %v9949_v56 = vld [vmem:[%s10572_s24 + $0x224] ss:$8 sps:$4 sm:$0xff]  }
 0x80b   : > { %4196 = vmatpush1.bf16.msra.mxu0 %v9890_v57  ;;  %v9947_v57 = vld [vmem:[%s10572_s24 + $0x220] ss:$8 sps:$4 sm:$0xff]  }
 0x80e   : > { %4198 = vmatmul.mubr.bf16.vlgmr.msra.gmra.mrb[28].mxu0 %v11021_v29 }
 0x8a1   : > { %v3653_v58 = vpop.f32.mrb[24].mxu0 }
 0x8a2   : > { %v3655_v59 = vpop.f32.mrb[25].mxu0 }
 0x8a3   : > { %v3657_v60 = vpop.f32.mrb[26].mxu0 }
 0x8a4   : > { %v9347_v61 = vpack.c.bf16 %v3657_v60, %v3653_v58  ;;  %v3659_v62 = vpop.f32.mrb[27].mxu0  ;;  %v9952_v58 = vld [vmem:[%s10572_s24 + $0x234] ss:$8 sps:$4 sm:$0xff]   ;;  %v9955_v60 = vld [vmem:[%s10572_s24 + $0x244] ss:$8 sps:$4 sm:$0xff]  }
 0x8a5   : > { %v9345_v63 = vpack.c.bf16 %v3659_v62, %v3655_v59  ;;  %v9950_v59 = vld [vmem:[%s10572_s24 + $0x230] ss:$8 sps:$4 sm:$0xff]  }
 0x8a6   : > { %v9956_v62 = vld [vmem:[%s10572_s24 + $0x250] ss:$8 sps:$4 sm:$0xff]  }
 0x8a7   : > { %9346 = vmatprep.subr.bf16.mxu1 %v9345_v63  ;;  %v9961_v63 = vld [vmem:[%s10572_s24 + $0x264] ss:$8 sps:$4 sm:$0xff]  }
 0x8a8   : > { %9348 = vmatpush1.bf16.msra.mxu1 %v9347_v61  ;;  %v9953_v61 = vld [vmem:[%s10572_s24 + $0x240] ss:$8 sps:$4 sm:$0xff]  }
 0x8a9   : > { %3928 = vmatprep.subr.bf16.mxu1 %v9895_v0  ;;  %v9959_v0 = vld [vmem:[%s10572_s24 + $0x260] ss:$8 sps:$4 sm:$0xff]  }
 0x8ab   : > { %8562 = vmatmul.mubr.msk.f32.vlgmr.msra.gmra.mrb[28].mxu1 %vm1079_vm1, %v3426_v3  ;;  %v9964_v3 = vld [vmem:[%s10572_s24 + $0x274] ss:$8 sps:$4 sm:$0xff]  }
 0x8ac   : > { %3929 = vmatpush1.bf16.msra.mxu1 %v9893_v4  ;;  %3960 = vmatprep.mubr.bf16.mxu1 %v11023_v1  ;;  %v9962_v4 = vld [vmem:[%s10572_s24 + $0x270] ss:$8 sps:$4 sm:$0xff]  }
 0x8ad   : > { %3930 = vmatprep.subr.bf16.mxu1 %v9898_v5  ;;  %v9967_v5 = vld [vmem:[%s10572_s24 + $0x284] ss:$8 sps:$4 sm:$0xff]  }
 0x8b0   : > { %3931 = vmatpush1.bf16.msra.mxu1 %v9896_v6  ;;  %v9965_v6 = vld [vmem:[%s10572_s24 + $0x280] ss:$8 sps:$4 sm:$0xff]  }
 0x8b1   : > { %3932 = vmatprep.subr.bf16.mxu1 %v9901_v7  ;;  %v9970_v7 = vld [vmem:[%s10572_s24 + $0x294] ss:$8 sps:$4 sm:$0xff]  }
 0x8b4   : > { %3933 = vmatpush1.bf16.msra.mxu1 %v9899_v8  ;;  %v9968_v8 = vld [vmem:[%s10572_s24 + $0x290] ss:$8 sps:$4 sm:$0xff]  }
 0x8b5   : > { %3934 = vmatprep.subr.bf16.mxu1 %v9904_v9  ;;  %v9973_v9 = vld [vmem:[%s10572_s24 + $0x2a4] ss:$8 sps:$4 sm:$0xff]  }
 0x8b8   : > { %3935 = vmatpush1.bf16.msra.mxu1 %v9902_v10  ;;  %v9971_v10 = vld [vmem:[%s10572_s24 + $0x2a0] ss:$8 sps:$4 sm:$0xff]  }
 0x8b9   : > { %3936 = vmatprep.subr.bf16.mxu1 %v9907_v11  ;;  %v9976_v11 = vld [vmem:[%s10572_s24 + $0x2b4] ss:$8 sps:$4 sm:$0xff]  }
 0x8bc   : > { %3937 = vmatpush1.bf16.msra.mxu1 %v9905_v12  ;;  %v9974_v12 = vld [vmem:[%s10572_s24 + $0x2b0] ss:$8 sps:$4 sm:$0xff]  }
 0x8bd   : > { %3938 = vmatprep.subr.bf16.mxu1 %v9910_v13  ;;  %v9979_v13 = vld [vmem:[%s10572_s24 + $0x2c4] ss:$8 sps:$4 sm:$0xff]  }
 0x8c0   : > { %3939 = vmatpush1.bf16.msra.mxu1 %v9908_v14  ;;  %v9977_v14 = vld [vmem:[%s10572_s24 + $0x2c0] ss:$8 sps:$4 sm:$0xff]  }
 0x8c1   : > { %3940 = vmatprep.subr.bf16.mxu1 %v9913_v15  ;;  %v9982_v15 = vld [vmem:[%s10572_s24 + $0x2d4] ss:$8 sps:$4 sm:$0xff]  }
 0x8c4   : > { %3941 = vmatpush1.bf16.msra.mxu1 %v9911_v16  ;;  %v9980_v16 = vld [vmem:[%s10572_s24 + $0x2d0] ss:$8 sps:$4 sm:$0xff]  }
 0x8c5   : > { %3942 = vmatprep.subr.bf16.mxu1 %v9916_v17  ;;  %v9985_v17 = vld [vmem:[%s10572_s24 + $0x2e4] ss:$8 sps:$4 sm:$0xff]  }
 0x8c8   : > { %3943 = vmatpush1.bf16.msra.mxu1 %v9914_v23  ;;  %v9983_v23 = vld [vmem:[%s10572_s24 + $0x2e0] ss:$8 sps:$4 sm:$0xff]  }
 0x8c9   : > { %3944 = vmatprep.subr.bf16.mxu1 %v9919_v24  ;;  %v9988_v24 = vld [vmem:[%s10572_s24 + $0x2f4] ss:$8 sps:$4 sm:$0xff]  }
 0x8cc   : > { %3945 = vmatpush1.bf16.msra.mxu1 %v9917_v25  ;;  %v9986_v25 = vld [vmem:[%s10572_s24 + $0x2f0] ss:$8 sps:$4 sm:$0xff]  }
 0x8cd   : > { %3946 = vmatprep.subr.bf16.mxu1 %v9922_v26  ;;  %v9989_v26 = vld [vmem:[%s11598_s16] ss:$8 sps:$4 sm:$0xff]  }
 0x8d0   : > { %3947 = vmatpush1.bf16.msra.mxu1 %v9920_v27  ;;  %v9991_v27 = vld [vmem:[%s11598_s16 + $0x4] ss:$8 sps:$4 sm:$0xff]  }
 0x8d1   : > { %3948 = vmatprep.subr.bf16.mxu1 %v9925_v28  ;;  %v9994_v28 = vld [vmem:[%s11598_s16 + $0x14] ss:$8 sps:$4 sm:$0xff]   ;;  %4882 = vmatprep.subr.bf16.mxu0 %v9991_v27  ;;  %v10057_v27 = vld [vmem:[%s11598_s16 + $0x164] ss:$8 sps:$4 sm:$0xff]  }
 0x8d2   : > { %4883 = vmatpush1.bf16.msra.mxu0 %v9989_v26  ;;  %v10052_v26 = vld [vmem:[%s11598_s16 + $0x150] ss:$8 sps:$4 sm:$0xff]  }
 0x8d3   : > { %4884 = vmatprep.subr.bf16.mxu0 %v9994_v28  ;;  %v10055_v28 = vld [vmem:[%s11598_s16 + $0x160] ss:$8 sps:$4 sm:$0xff]  }
 0x8d4   : > { %3949 = vmatpush1.bf16.msra.mxu1 %v9923_v30  ;;  %v9992_v30 = vld [vmem:[%s11598_s16 + $0x10] ss:$8 sps:$4 sm:$0xff]  }
 0x8d5   : > { %3950 = vmatprep.subr.bf16.mxu1 %v9928_v18  ;;  %v9997_v18 = vld [vmem:[%s11598_s16 + $0x24] ss:$8 sps:$4 sm:$0xff]  }
 0x8d6   : > { %4885 = vmatpush1.bf16.msra.mxu0 %v9992_v30  ;;  %v10060_v30 = vld [vmem:[%s11598_s16 + $0x174] ss:$8 sps:$4 sm:$0xff]  }
 0x8d7   : > { %4886 = vmatprep.subr.bf16.mxu0 %v9997_v18  ;;  %v10058_v18 = vld [vmem:[%s11598_s16 + $0x170] ss:$8 sps:$4 sm:$0xff]  }
 0x8d8   : > { %3951 = vmatpush1.bf16.msra.mxu1 %v9926_v2  ;;  %v9995_v2 = vld [vmem:[%s11598_s16 + $0x20] ss:$8 sps:$4 sm:$0xff]  }
 0x8d9   : > { %3952 = vmatprep.subr.bf16.mxu1 %v9931_v31  ;;  %v9998_v31 = vld [vmem:[%s11598_s16 + $0x30] ss:$8 sps:$4 sm:$0xff]  }
 0x8da   : > { %4887 = vmatpush1.bf16.msra.mxu0 %v9995_v2  ;;  %v10063_v2 = vld [vmem:[%s11598_s16 + $0x184] ss:$8 sps:$4 sm:$0xff]  }
 0x8dc   : > { %3953 = vmatpush1.bf16.msra.mxu1 %v9929_v32  ;;  %v10003_v32 = vld [vmem:[%s11598_s16 + $0x44] ss:$8 sps:$4 sm:$0xff]  }
 0x8dd   : > { %3954 = vmatprep.subr.bf16.mxu1 %v9934_v33  ;;  %v10001_v33 = vld [vmem:[%s11598_s16 + $0x40] ss:$8 sps:$4 sm:$0xff]  }
 0x8e0   : > { %3955 = vmatpush1.bf16.msra.mxu1 %v9932_v19  ;;  %v10006_v19 = vld [vmem:[%s11598_s16 + $0x54] ss:$8 sps:$4 sm:$0xff]  }
 0x8e1   : > { %v4199_v34 = vpop.f32.mrb[28].mxu0  ;;  %3956 = vmatprep.subr.bf16.mxu1 %v9937_v21  ;;  %v10004_v21 = vld [vmem:[%s11598_s16 + $0x50] ss:$8 sps:$4 sm:$0xff]  }
 0x8e2   : > { %v4201_v36 = vpop.f32.mrb[29].mxu0 }
 0x8e3   : > { %v4203_v37 = vpop.f32.mrb[30].mxu0 }
 0x8e4   : > { %v9351_v38 = vpack.c.bf16 %v4203_v37, %v4199_v34  ;;  %v4205_v39 = vpop.f32.mrb[31].mxu0  ;;  %3957 = vmatpush1.bf16.msra.mxu1 %v9935_v22  ;;  %v10009_v22 = vld [vmem:[%s11598_s16 + $0x64] ss:$8 sps:$4 sm:$0xff]   ;;  %v10007_v34 = vld [vmem:[%s11598_s16 + $0x60] ss:$8 sps:$4 sm:$0xff]  }
 0x8e5   : > { %v9349_v41 = vpack.c.bf16 %v4205_v39, %v4201_v36  ;;  %3958 = vmatprep.subr.bf16.mxu1 %v9940_v35  ;;  %v10012_v35 = vld [vmem:[%s11598_s16 + $0x74] ss:$8 sps:$4 sm:$0xff]   ;;  %v10010_v36 = vld [vmem:[%s11598_s16 + $0x70] ss:$8 sps:$4 sm:$0xff]   ;;  %v10015_v37 = vld [vmem:[%s11598_s16 + $0x84] ss:$8 sps:$4 sm:$0xff]  }
 0x8e6   : > { %v10018_v39 = vld [vmem:[%s11598_s16 + $0x94] ss:$8 sps:$4 sm:$0xff]  }
 0x8e8   : > { %3959 = vmatpush1.bf16.msra.mxu1 %v9938_v40  ;;  %v10016_v40 = vld [vmem:[%s11598_s16 + $0x90] ss:$8 sps:$4 sm:$0xff]  }
 0x8e9   : > { %9350 = vmatprep.subr.bf16.mxu1 %v9349_v41  ;;  %v10021_v41 = vld [vmem:[%s11598_s16 + $0xa4] ss:$8 sps:$4 sm:$0xff]  }
 0x8eb   : > { %3961 = vmatmul.mubr.bf16.vlgmr.msra.gmra.mrb[32].mxu1 %v11021_v29 }
 0x8ec   : > { %9352 = vmatpush1.bf16.msra.mxu1 %v9351_v38  ;;  %4277 = vmatprep.mubr.f32.mxu1 %v10507_v20  ;;  %v10013_v38 = vld [vmem:[%s11598_s16 + $0x80] ss:$8 sps:$4 sm:$0xff]  }
 0x8f3   : > { %8660 = vmatmul.mubr.msk.f32.vlgmr.msra.gmra.mrb[30].mxu1 %vm1079_vm1, %v8659_v42  ;;  %v10019_v42 = vld [vmem:[%s11598_s16 + $0xa0] ss:$8 sps:$4 sm:$0xff]  }
 0x8f4   : > { %4351 = vmatprep.mubr.f32.mxu1 %v10507_v20 }
 0x9be   : > { %v3962_v43 = vpop.f32.mrb[32].mxu1 }
 0x9bf   : > { %v3964_v44 = vpop.f32.mrb[33].mxu1 }
 0x9c0   : > { %v3966_v45 = vpop.f32.mrb[34].mxu1 }
 0x9c1   : > { %v9355_v46 = vpack.c.bf16 %v3966_v45, %v3962_v43  ;;  %v3968_v47 = vpop.f32.mrb[35].mxu1  ;;  %v10024_v43 = vld [vmem:[%s11598_s16 + $0xb4] ss:$8 sps:$4 sm:$0xff]   ;;  %v10027_v45 = vld [vmem:[%s11598_s16 + $0xc4] ss:$8 sps:$4 sm:$0xff]  }
 0x9c2   : > { %v9353_v49 = vpack.c.bf16 %v3968_v47, %v3964_v44  ;;  %v10022_v44 = vld [vmem:[%s11598_s16 + $0xb0] ss:$8 sps:$4 sm:$0xff]   ;;  %v10030_v47 = vld [vmem:[%s11598_s16 + $0xd4] ss:$8 sps:$4 sm:$0xff]  }
 0x9c4   : > { %9354 = vmatprep.subr.bf16.mxu1 %v9353_v49  ;;  %v10028_v49 = vld [vmem:[%s11598_s16 + $0xd0] ss:$8 sps:$4 sm:$0xff]  }
 0x9c5   : > { %9356 = vmatpush1.bf16.msra.mxu1 %v9355_v46  ;;  %v10025_v46 = vld [vmem:[%s11598_s16 + $0xc0] ss:$8 sps:$4 sm:$0xff]  }
 0x9c6   : > { %4551 = vmatprep.subr.bf16.mxu1 %v9943_v51 }
 0x9c8   : > { %8661 = vmatmul.mubr.msk.f32.vlgmr.msra.gmra.mrb[30].mxu1 %vm1079_vm1, %v3971_v52 }
 0x9c9   : > { %4552 = vmatpush1.bf16.msra.mxu1 %v9941_v53  ;;  %4583 = vmatprep.mubr.bf16.mxu1 %v11023_v1  ;;  %v9958_v1 = vld [vmem:[%s10572_s24 + $0x254] ss:$8 sps:$4 sm:$0xff]  }
 0x9ca   : > { %4553 = vmatprep.subr.bf16.mxu1 %v9946_v54 }
 0x9cd   : > { %4554 = vmatpush1.bf16.msra.mxu1 %v9944_v55 }
 0x9ce   : > { %4555 = vmatprep.subr.bf16.mxu1 %v9949_v56 }
 0x9d1   : > { %4556 = vmatpush1.bf16.msra.mxu1 %v9947_v57  ;;  %v8726_v57 = vld [vmem:[%s10567_s19 + $0x10] sm:$0xff] }
 0x9d2   : > { %4557 = vmatprep.subr.bf16.mxu1 %v9952_v58  ;;  %v10033_v58 = vld [vmem:[%s11598_s16 + $0xe4] ss:$8 sps:$4 sm:$0xff]  }
 0x9d5   : > { %4558 = vmatpush1.bf16.msra.mxu1 %v9950_v59  ;;  %v10031_v59 = vld [vmem:[%s11598_s16 + $0xe0] ss:$8 sps:$4 sm:$0xff]  }
 0x9d6   : > { %4559 = vmatprep.subr.bf16.mxu1 %v9955_v60  ;;  %v10036_v60 = vld [vmem:[%s11598_s16 + $0xf4] ss:$8 sps:$4 sm:$0xff]  }
 0x9d9   : > { %4560 = vmatpush1.bf16.msra.mxu1 %v9953_v61  ;;  %v10034_v61 = vld [vmem:[%s11598_s16 + $0xf0] ss:$8 sps:$4 sm:$0xff]  }
 0x9da   : > { %4561 = vmatprep.subr.bf16.mxu1 %v9958_v1  ;;  %v10039_v1 = vld [vmem:[%s11598_s16 + $0x104] ss:$8 sps:$4 sm:$0xff]  }
 0x9dd   : > { %4562 = vmatpush1.bf16.msra.mxu1 %v9956_v62  ;;  %v4672_v62 = vld [vmem:[%s11599_s18] sm:$0x3]  ;;  %s11609_s18 = sld [smem:[#allocation11_spill]] }
 0x9de   : > { %4563 = vmatprep.subr.bf16.mxu1 %v9961_v63  ;;  %v4677_v63 = vrot.slane %v4672_v62, %v10779_v48 }
 0x9e1   : > { %4564 = vmatpush1.bf16.msra.mxu1 %v9959_v0  ;;  %v4681_v0 = vrot.slane %v4672_v62, %v10782_v50  ;;  %v10097_v62 = vld [vmem:[%s11598_s16 + $0x240] ss:$8 sps:$4 sm:$0xff]  }
 0x9e2   : > { %4565 = vmatprep.subr.bf16.mxu1 %v9964_v3 }
 0x9e5   : > { %4566 = vmatpush1.bf16.msra.mxu1 %v9962_v4 }
 0x9e6   : > { %4567 = vmatprep.subr.bf16.mxu1 %v9967_v5 }
 0x9e9   : > { %4568 = vmatpush1.bf16.msra.mxu1 %v9965_v6 }
 0x9ea   : > { %4569 = vmatprep.subr.bf16.mxu1 %v9970_v7 }
 0x9ed   : > { %4570 = vmatpush1.bf16.msra.mxu1 %v9968_v8 }
 0x9ee   : > { %4571 = vmatprep.subr.bf16.mxu1 %v9973_v9 }
 0x9f1   : > { %4572 = vmatpush1.bf16.msra.mxu1 %v9971_v10  ;;  %v10037_v10 = vld [vmem:[%s11598_s16 + $0x100] ss:$8 sps:$4 sm:$0xff]  }
 0x9f2   : > { %4573 = vmatprep.subr.bf16.mxu1 %v9976_v11 }
 0x9f5   : > { %4574 = vmatpush1.bf16.msra.mxu1 %v9974_v12  ;;  %v10042_v12 = vld [vmem:[%s11598_s16 + $0x114] ss:$8 sps:$4 sm:$0xff]  }
 0x9f6   : > { %4575 = vmatprep.subr.bf16.mxu1 %v9979_v13  ;;  %v10040_v13 = vld [vmem:[%s11598_s16 + $0x110] ss:$8 sps:$4 sm:$0xff]  }
 0x9f9   : > { %4576 = vmatpush1.bf16.msra.mxu1 %v9977_v14  ;;  %v10045_v14 = vld [vmem:[%s11598_s16 + $0x124] ss:$8 sps:$4 sm:$0xff]  }
 0x9fa   : > { %4577 = vmatprep.subr.bf16.mxu1 %v9982_v15  ;;  %v10043_v15 = vld [vmem:[%s11598_s16 + $0x120] ss:$8 sps:$4 sm:$0xff]  }
 0x9fd   : > { %4578 = vmatpush1.bf16.msra.mxu1 %v9980_v16  ;;  %v10048_v16 = vld [vmem:[%s11598_s16 + $0x134] ss:$8 sps:$4 sm:$0xff]  }
 0x9fe   : > { %4579 = vmatprep.subr.bf16.mxu1 %v9985_v17  ;;  %v10046_v17 = vld [vmem:[%s11598_s16 + $0x130] ss:$8 sps:$4 sm:$0xff]  }
 0xa01   : > { %4580 = vmatpush1.bf16.msra.mxu1 %v9983_v23  ;;  %v10051_v23 = vld [vmem:[%s11598_s16 + $0x144] ss:$8 sps:$4 sm:$0xff]  }
 0xa02   : > { %4581 = vmatprep.subr.bf16.mxu1 %v9988_v24  ;;  %v10049_v24 = vld [vmem:[%s11598_s16 + $0x140] ss:$8 sps:$4 sm:$0xff]  }
 0xa05   : > { %4582 = vmatpush1.bf16.msra.mxu1 %v9986_v25  ;;  %v10054_v25 = vld [vmem:[%s11598_s16 + $0x154] ss:$8 sps:$4 sm:$0xff]  }
 0xa08   : > { %4584 = vmatmul.mubr.bf16.vlgmr.msra.gmra.mrb[36].mxu1 %v11021_v29  ;;  %v10000_v29 = vld [vmem:[%s11598_s16 + $0x34] ss:$8 sps:$4 sm:$0xff]  }
 0xa09   : > { %4663 = vmatprep.mubr.f32.mxu1 %v10507_v20  ;;  %4888 = vmatprep.subr.bf16.mxu0 %v10000_v29  ;;  %v10061_v29 = vld [vmem:[%s11598_s16 + $0x180] ss:$8 sps:$4 sm:$0xff]  }
 0xa0a   : > { %4889 = vmatpush1.bf16.msra.mxu0 %v9998_v31  ;;  %v10066_v31 = vld [vmem:[%s11598_s16 + $0x194] ss:$8 sps:$4 sm:$0xff]  }
 0xa0b   : > { %4890 = vmatprep.subr.bf16.mxu0 %v10003_v32  ;;  %v10064_v32 = vld [vmem:[%s11598_s16 + $0x190] ss:$8 sps:$4 sm:$0xff]  }
 0xa0e   : > { %4891 = vmatpush1.bf16.msra.mxu0 %v10001_v33  ;;  %v10069_v33 = vld [vmem:[%s11598_s16 + $0x1a4] ss:$8 sps:$4 sm:$0xff]  }
 0xa0f   : > { %4892 = vmatprep.subr.bf16.mxu0 %v10006_v19  ;;  %v10067_v19 = vld [vmem:[%s11598_s16 + $0x1a0] ss:$8 sps:$4 sm:$0xff]  }
 0xa12   : > { %4893 = vmatpush1.bf16.msra.mxu0 %v10004_v21  ;;  %v10072_v21 = vld [vmem:[%s11598_s16 + $0x1b4] ss:$8 sps:$4 sm:$0xff]  }
 0xa13   : > { %4894 = vmatprep.subr.bf16.mxu0 %v10009_v22  ;;  %v10070_v22 = vld [vmem:[%s11598_s16 + $0x1b0] ss:$8 sps:$4 sm:$0xff]  }
 0xa16   : > { %4895 = vmatpush1.bf16.msra.mxu0 %v10007_v34  ;;  %v10075_v34 = vld [vmem:[%s11598_s16 + $0x1c4] ss:$8 sps:$4 sm:$0xff]  }
 0xa17   : > { %4896 = vmatprep.subr.bf16.mxu0 %v10012_v35  ;;  %v10073_v35 = vld [vmem:[%s11598_s16 + $0x1c0] ss:$8 sps:$4 sm:$0xff]  }
 0xa1a   : > { %4897 = vmatpush1.bf16.msra.mxu0 %v10010_v36  ;;  %v10078_v36 = vld [vmem:[%s11598_s16 + $0x1d4] ss:$8 sps:$4 sm:$0xff]  }
 0xa1b   : > { %4898 = vmatprep.subr.bf16.mxu0 %v10015_v37  ;;  %v10076_v37 = vld [vmem:[%s11598_s16 + $0x1d0] ss:$8 sps:$4 sm:$0xff]  }
 0xa1e   : > { %4899 = vmatpush1.bf16.msra.mxu0 %v10013_v38  ;;  %v10081_v38 = vld [vmem:[%s11598_s16 + $0x1e4] ss:$8 sps:$4 sm:$0xff]  }
 0xa1f   : > { %4900 = vmatprep.subr.bf16.mxu0 %v10018_v39  ;;  %v10079_v39 = vld [vmem:[%s11598_s16 + $0x1e0] ss:$8 sps:$4 sm:$0xff]  }
 0xa22   : > { %4901 = vmatpush1.bf16.msra.mxu0 %v10016_v40  ;;  %v10084_v40 = vld [vmem:[%s11598_s16 + $0x1f4] ss:$8 sps:$4 sm:$0xff]  }
 0xa23   : > { %4902 = vmatprep.subr.bf16.mxu0 %v10021_v41  ;;  %v10082_v41 = vld [vmem:[%s11598_s16 + $0x1f0] ss:$8 sps:$4 sm:$0xff]  }
 0xa26   : > { %4903 = vmatpush1.bf16.msra.mxu0 %v10019_v42 }
 0xa27   : > { %4904 = vmatprep.subr.bf16.mxu0 %v10024_v43 }
 0xa2a   : > { %4905 = vmatpush1.bf16.msra.mxu0 %v10022_v44 }
 0xa2b   : > { %4906 = vmatprep.subr.bf16.mxu0 %v10027_v45 }
 0xa2e   : > { %4907 = vmatpush1.bf16.msra.mxu0 %v10025_v46 }
 0xa2f   : > { %4908 = vmatprep.subr.bf16.mxu0 %v10030_v47 }
 0xa32   : > { %4909 = vmatpush1.bf16.msra.mxu0 %v10028_v49  ;;  %v8824_v49 = vld [vmem:[%s11600_s22 + $0x8] sm:$0xff] }
 0xa33   : > { %4910 = vmatprep.subr.bf16.mxu0 %v10033_v58  ;;  %v10093_v58 = vld [vmem:[%s11598_s16 + $0x224] ss:$8 sps:$4 sm:$0xff]  }
 0xa36   : > { %4911 = vmatpush1.bf16.msra.mxu0 %v10031_v59  ;;  %v10091_v59 = vld [vmem:[%s11598_s16 + $0x220] ss:$8 sps:$4 sm:$0xff]  }
 0xa37   : > { %4912 = vmatprep.subr.bf16.mxu0 %v10036_v60  ;;  %v10096_v60 = vld [vmem:[%s11598_s16 + $0x234] ss:$8 sps:$4 sm:$0xff]  }
 0xa3a   : > { %4913 = vmatpush1.bf16.msra.mxu0 %v10034_v61  ;;  %v10094_v61 = vld [vmem:[%s11598_s16 + $0x230] ss:$8 sps:$4 sm:$0xff]  }
 0xa3b   : > { %5117 = vmatprep.subr.bf16.mxu0 %v10039_v1  ;;  %v10099_v1 = vld [vmem:[%s11598_s16 + $0x244] ss:$8 sps:$4 sm:$0xff]  }
 0xadb   : > { %v4585_v51 = vpop.f32.mrb[36].mxu1 }
 0xadc   : > { %v4587_v52 = vpop.f32.mrb[37].mxu1 }
 0xadd   : > { %v4589_v53 = vpop.f32.mrb[38].mxu1 }
 0xade   : > { %v9359_v54 = vpack.c.bf16 %v4589_v53, %v4585_v51  ;;  %v4591_v55 = vpop.f32.mrb[39].mxu1 }
 0xadf   : > { %v9357_v56 = vpack.c.bf16 %v4591_v55, %v4587_v52  ;;  %v10087_v52 = vld [vmem:[%s11598_s16 + $0x204] ss:$8 sps:$4 sm:$0xff]  }
 0xae0   : > { %v4923_v55 = vld [vmem:[%s11600_s22] sm:$0xff] }
 0xae1   : > { %9358 = vmatprep.subr.bf16.mxu1 %v9357_v56  ;;  %v10090_v56 = vld [vmem:[%s11598_s16 + $0x214] ss:$8 sps:$4 sm:$0xff]  }
 0xae2   : > { %9360 = vmatpush1.bf16.msra.mxu1 %v9359_v54  ;;  %v10085_v54 = vld [vmem:[%s11598_s16 + $0x200] ss:$8 sps:$4 sm:$0xff]  }
 0xae5   : > { %8727 = vmatmul.mubr.msk.f32.vlgmr.msra.gmra.mrb[30].mxu1 %vm1079_vm1, %v8726_v57  ;;  %v10088_v57 = vld [vmem:[%s11598_s16 + $0x210] ss:$8 sps:$4 sm:$0xff]  }
 0xae6   : > { %5228 = vmatprep.mubr.f32.mxu1 %v10507_v20 }
 0xbb8   : > { %v4665_v3 = vpop.f32.mrb[30].mxu1 }
 0xbb9   : > { %v4684_v4 = vadd.f32 %v4677_v63, %v4665_v3  ;;  %v4667_v5 = vpop.f32.mrb[31].mxu1  ;;  %v10102_v63 = vld [vmem:[%s11598_s16 + $0x254] ss:$8 sps:$4 sm:$0xff]   ;;  %v10105_v3 = vld [vmem:[%s11598_s16 + $0x264] ss:$8 sps:$4 sm:$0xff]  }
 0xbba   : > { %v4685_v6 = vadd.f32 %v4681_v0, %v4667_v5  ;;  %v10100_v0 = vld [vmem:[%s11598_s16 + $0x250] ss:$8 sps:$4 sm:$0xff]   ;;  %v10108_v5 = vld [vmem:[%s11598_s16 + $0x274] ss:$8 sps:$4 sm:$0xff]  }
 0xbbb   : > { %v4686_v7 = vmax.f32 %v4684_v4, 0.0  ;;  %v10103_v4 = vld [vmem:[%s11598_s16 + $0x260] ss:$8 sps:$4 sm:$0xff]  }
 0xbbc   : > { %v4687_v8 = vmax.f32 %v4685_v6, 0.0  ;;  %v10106_v6 = vld [vmem:[%s11598_s16 + $0x270] ss:$8 sps:$4 sm:$0xff]  }
 0xbbd   : > { %v11179_v11 = vpack.c.bf16 %v4686_v7, %v4686_v7  ;;  %v10111_v7 = vld [vmem:[%s11598_s16 + $0x284] ss:$8 sps:$4 sm:$0xff]  }
 0xbbe   : > { %v11176_v9 = vpack.c.bf16 %v4687_v8, %v4687_v8  ;;  %v10109_v8 = vld [vmem:[%s11598_s16 + $0x280] ss:$8 sps:$4 sm:$0xff]  }
 0xbc0   : > { %4914 = vmatprep.mubr.bf16.mxu0 %v11176_v9 }
 0xbc1   : > { %4915 = vmatmul.mubr.bf16.vlgmr.msra.gmra.mrb[32].mxu0 %v11179_v11 }
 0xbc2   : > { %5118 = vmatpush1.bf16.msra.mxu0 %v10037_v10  ;;  %5149 = vmatprep.mubr.bf16.mxu0 %v11176_v9  ;;  %v10112_v10 = vld [vmem:[%s11598_s16 + $0x290] ss:$8 sps:$4 sm:$0xff]  }
 0xbc3   : > { %5119 = vmatprep.subr.bf16.mxu0 %v10042_v12  ;;  %v10117_v12 = vld [vmem:[%s11598_s16 + $0x2a4] ss:$8 sps:$4 sm:$0xff]  }
 0xbc6   : > { %5120 = vmatpush1.bf16.msra.mxu0 %v10040_v13  ;;  %v10115_v13 = vld [vmem:[%s11598_s16 + $0x2a0] ss:$8 sps:$4 sm:$0xff]  }
 0xbc7   : > { %5121 = vmatprep.subr.bf16.mxu0 %v10045_v14  ;;  %v10120_v14 = vld [vmem:[%s11598_s16 + $0x2b4] ss:$8 sps:$4 sm:$0xff]  }
 0xbca   : > { %5122 = vmatpush1.bf16.msra.mxu0 %v10043_v15  ;;  %v10118_v15 = vld [vmem:[%s11598_s16 + $0x2b0] ss:$8 sps:$4 sm:$0xff]  }
 0xbcb   : > { %5123 = vmatprep.subr.bf16.mxu0 %v10048_v16  ;;  %v10123_v16 = vld [vmem:[%s11598_s16 + $0x2c4] ss:$8 sps:$4 sm:$0xff]  }
 0xbce   : > { %5124 = vmatpush1.bf16.msra.mxu0 %v10046_v17  ;;  %v10121_v17 = vld [vmem:[%s11598_s16 + $0x2c0] ss:$8 sps:$4 sm:$0xff]  }
 0xbcf   : > { %5125 = vmatprep.subr.bf16.mxu0 %v10051_v23  ;;  %v10126_v23 = vld [vmem:[%s11598_s16 + $0x2d4] ss:$8 sps:$4 sm:$0xff]  }
 0xbd2   : > { %5126 = vmatpush1.bf16.msra.mxu0 %v10049_v24  ;;  %v10124_v24 = vld [vmem:[%s11598_s16 + $0x2d0] ss:$8 sps:$4 sm:$0xff]  }
 0xbd3   : > { %5127 = vmatprep.subr.bf16.mxu0 %v10054_v25  ;;  %v10129_v25 = vld [vmem:[%s11598_s16 + $0x2e4] ss:$8 sps:$4 sm:$0xff]  }
 0xbd6   : > { %5128 = vmatpush1.bf16.msra.mxu0 %v10052_v26  ;;  %v10127_v26 = vld [vmem:[%s11598_s16 + $0x2e0] ss:$8 sps:$4 sm:$0xff]  }
 0xbd7   : > { %5129 = vmatprep.subr.bf16.mxu0 %v10057_v27  ;;  %v10132_v27 = vld [vmem:[%s11598_s16 + $0x2f4] ss:$8 sps:$4 sm:$0xff]  }
 0xbda   : > { %5130 = vmatpush1.bf16.msra.mxu0 %v10055_v28  ;;  %v10130_v28 = vld [vmem:[%s11598_s16 + $0x2f0] ss:$8 sps:$4 sm:$0xff]  }
 0xbdb   : > { %5131 = vmatprep.subr.bf16.mxu0 %v10060_v30  ;;  %v10133_v30 = vld [vmem:[%s11601_s23] ss:$8 sps:$4 sm:$0xff]  }
 0xbde   : > { %5132 = vmatpush1.bf16.msra.mxu0 %v10058_v18  ;;  %v10135_v18 = vld [vmem:[%s11601_s23 + $0x4] ss:$8 sps:$4 sm:$0xff]  }
 0xbdf   : > { %5133 = vmatprep.subr.bf16.mxu0 %v10063_v2  ;;  %v10138_v2 = vld [vmem:[%s11601_s23 + $0x14] ss:$8 sps:$4 sm:$0xff]  }
 0xbe2   : > { %5134 = vmatpush1.bf16.msra.mxu0 %v10061_v29  ;;  %v10136_v29 = vld [vmem:[%s11601_s23 + $0x10] ss:$8 sps:$4 sm:$0xff]  }
 0xbe3   : > { %5135 = vmatprep.subr.bf16.mxu0 %v10066_v31  ;;  %v10141_v31 = vld [vmem:[%s11601_s23 + $0x24] ss:$8 sps:$4 sm:$0xff]  }
 0xbe6   : > { %5136 = vmatpush1.bf16.msra.mxu0 %v10064_v32  ;;  %v10139_v32 = vld [vmem:[%s11601_s23 + $0x20] ss:$8 sps:$4 sm:$0xff]  }
 0xbe7   : > { %5137 = vmatprep.subr.bf16.mxu0 %v10069_v33  ;;  %v10142_v33 = vld [vmem:[%s11601_s23 + $0x30] ss:$8 sps:$4 sm:$0xff]  }
 0xbea   : > { %5138 = vmatpush1.bf16.msra.mxu0 %v10067_v19  ;;  %v10147_v19 = vld [vmem:[%s11601_s23 + $0x44] ss:$8 sps:$4 sm:$0xff]  }
 0xbeb   : > { %5139 = vmatprep.subr.bf16.mxu0 %v10072_v21  ;;  %v10145_v21 = vld [vmem:[%s11601_s23 + $0x40] ss:$8 sps:$4 sm:$0xff]  }
 0xbee   : > { %5140 = vmatpush1.bf16.msra.mxu0 %v10070_v22  ;;  %v10150_v22 = vld [vmem:[%s11601_s23 + $0x54] ss:$8 sps:$4 sm:$0xff]  }
 0xbef   : > { %5141 = vmatprep.subr.bf16.mxu0 %v10075_v34  ;;  %v10148_v34 = vld [vmem:[%s11601_s23 + $0x50] ss:$8 sps:$4 sm:$0xff]  }
 0xbf2   : > { %5142 = vmatpush1.bf16.msra.mxu0 %v10073_v35  ;;  %v10153_v35 = vld [vmem:[%s11601_s23 + $0x64] ss:$8 sps:$4 sm:$0xff]  }
 0xbf3   : > { %5143 = vmatprep.subr.bf16.mxu0 %v10078_v36  ;;  %v10151_v36 = vld [vmem:[%s11601_s23 + $0x60] ss:$8 sps:$4 sm:$0xff]  }
 0xbf6   : > { %5144 = vmatpush1.bf16.msra.mxu0 %v10076_v37  ;;  %v10156_v37 = vld [vmem:[%s11601_s23 + $0x74] ss:$8 sps:$4 sm:$0xff]  }
 0xbf7   : > { %5145 = vmatprep.subr.bf16.mxu0 %v10081_v38  ;;  %v10154_v38 = vld [vmem:[%s11601_s23 + $0x70] ss:$8 sps:$4 sm:$0xff]  }
 0xbfa   : > { %5146 = vmatpush1.bf16.msra.mxu0 %v10079_v39  ;;  %v10159_v39 = vld [vmem:[%s11601_s23 + $0x84] ss:$8 sps:$4 sm:$0xff]  }
 0xbfb   : > { %5147 = vmatprep.subr.bf16.mxu0 %v10084_v40  ;;  %v10157_v40 = vld [vmem:[%s11601_s23 + $0x80] ss:$8 sps:$4 sm:$0xff]  }
 0xbfe   : > { %5148 = vmatpush1.bf16.msra.mxu0 %v10082_v41  ;;  %v10162_v41 = vld [vmem:[%s11601_s23 + $0x94] ss:$8 sps:$4 sm:$0xff]  }
 0xbff   : > { %5834 = vmatprep.subr.bf16.mxu0 %v10135_v18  ;;  %v10204_v18 = vld [vmem:[%s11602_s26 + $0x174] ss:$8 sps:$4 sm:$0xff]  }
 0xc01   : > { %5150 = vmatmul.mubr.bf16.vlgmr.msra.gmra.mrb[36].mxu0 %v11179_v11 }
 0xc02   : > { %5835 = vmatpush1.bf16.msra.mxu0 %v10133_v30  ;;  %v10199_v30 = vld [vmem:[%s11602_s26 + $0x160] ss:$8 sps:$4 sm:$0xff]  }
 0xc03   : > { %5836 = vmatprep.subr.bf16.mxu0 %v10138_v2  ;;  %v10202_v2 = vld [vmem:[%s11602_s26 + $0x170] ss:$8 sps:$4 sm:$0xff]  }
 0xc06   : > { %5837 = vmatpush1.bf16.msra.mxu0 %v10136_v29  ;;  %v10207_v29 = vld [vmem:[%s11602_s26 + $0x184] ss:$8 sps:$4 sm:$0xff]  }
 0xc07   : > { %5838 = vmatprep.subr.bf16.mxu0 %v10141_v31  ;;  %v10205_v31 = vld [vmem:[%s11602_s26 + $0x180] ss:$8 sps:$4 sm:$0xff]  }
 0xc0a   : > { %5839 = vmatpush1.bf16.msra.mxu0 %v10139_v32  ;;  %v10210_v32 = vld [vmem:[%s11602_s26 + $0x194] ss:$8 sps:$4 sm:$0xff]  }
 0xc94   : > { %v4916_v42 = vpop.f32.mrb[32].mxu0 }
 0xc95   : > { %v4918_v43 = vpop.f32.mrb[33].mxu0 }
 0xc96   : > { %v4920_v44 = vpop.f32.mrb[34].mxu0 }
 0xc97   : > { %v4921_v45 = vpop.f32.mrb[35].mxu0  ;;  %v10163_v44 = vld [vmem:[%s11601_s23 + $0xa0] ss:$8 sps:$4 sm:$0xff]  }
 0xc98   : > { %v10168_v45 = vld [vmem:[%s11601_s23 + $0xb4] ss:$8 sps:$4 sm:$0xff]  }
 0xcd4   : > { %v5151_v46 = vpop.f32.mrb[36].mxu0 }
 0xcd5   : > { %v5153_v47 = vpop.f32.mrb[37].mxu0 }
 0xcd6   : > { %v5155_v51 = vpop.f32.mrb[38].mxu0  ;;  %5164 = vmatprep.subr.mxu1 %v5153_v47  ;;  %v10171_v47 = vld [vmem:[%s11601_s23 + $0xc4] ss:$8 sps:$4 sm:$0xff]  }
 0xcd7   : > { %v5156_v53 = vpop.f32.mrb[39].mxu0  ;;  %5165 = vmatpush1.msra.mxu1 %v5151_v46  ;;  %v10166_v46 = vld [vmem:[%s11601_s23 + $0xb0] ss:$8 sps:$4 sm:$0xff]   ;;  %v10174_v51 = vld [vmem:[%s11601_s23 + $0xd4] ss:$8 sps:$4 sm:$0xff]  }
 0xcd8   : > { %8825 = vmatmul.mubr.msk.f32.vlgmr.msra.gmra.mrb[28].mxu1 %vm5160_vm2, %v8824_v49  ;;  %5238 = vmatprep.subr.mxu1 %v4918_v43  ;;  %v10165_v43 = vld [vmem:[%s11601_s23 + $0xa4] ss:$8 sps:$4 sm:$0xff]   ;;  %v10169_v49 = vld [vmem:[%s11601_s23 + $0xc0] ss:$8 sps:$4 sm:$0xff]  }
 0xcd9   : > { %5239 = vmatpush1.msra.mxu1 %v4916_v42  ;;  %5302 = vmatprep.mubr.f32.mxu1 %v10507_v20  ;;  %v10160_v42 = vld [vmem:[%s11601_s23 + $0x90] ss:$8 sps:$4 sm:$0xff]  }
 0xcda   : > { %5502 = vmatprep.subr.bf16.mxu1 %v10087_v52  ;;  %v10172_v52 = vld [vmem:[%s11601_s23 + $0xd0] ss:$8 sps:$4 sm:$0xff]  }
 0xce0   : > { %8826 = vmatmul.mubr.msk.f32.vlgmr.msra.gmra.mrb[28].mxu1 %vm5160_vm2, %v4923_v55  ;;  %v8891_v55 = vld [vmem:[%s11600_s22 + $0x10] sm:$0xff] }
 0xce1   : > { %5503 = vmatpush1.bf16.msra.mxu1 %v10085_v54  ;;  %5534 = vmatprep.mubr.bf16.mxu1 %v11176_v9  ;;  %v10114_v9 = vld [vmem:[%s11598_s16 + $0x294] ss:$8 sps:$4 sm:$0xff]  }
 0xce2   : > { %5504 = vmatprep.subr.bf16.mxu1 %v10090_v56 }
 0xce5   : > { %5505 = vmatpush1.bf16.msra.mxu1 %v10088_v57 }
 0xce6   : > { %5506 = vmatprep.subr.bf16.mxu1 %v10093_v58  ;;  %v10177_v58 = vld [vmem:[%s11601_s23 + $0xe4] ss:$8 sps:$4 sm:$0xff]  }
 0xce9   : > { %5507 = vmatpush1.bf16.msra.mxu1 %v10091_v59  ;;  %v10175_v59 = vld [vmem:[%s11601_s23 + $0xe0] ss:$8 sps:$4 sm:$0xff]  }
 0xcea   : > { %5508 = vmatprep.subr.bf16.mxu1 %v10096_v60  ;;  %v10180_v60 = vld [vmem:[%s11601_s23 + $0xf4] ss:$8 sps:$4 sm:$0xff]  }
 0xced   : > { %5509 = vmatpush1.bf16.msra.mxu1 %v10094_v61  ;;  %v10178_v61 = vld [vmem:[%s11601_s23 + $0xf0] ss:$8 sps:$4 sm:$0xff]  }
 0xcee   : > { %5510 = vmatprep.subr.bf16.mxu1 %v10099_v1  ;;  %v10183_v1 = vld [vmem:[%s11602_s26 + $0x104] ss:$8 sps:$4 sm:$0xff]  }
 0xcf1   : > { %5511 = vmatpush1.bf16.msra.mxu1 %v10097_v62  ;;  %v5621_v62 = vld [vmem:[%s11603_s28] sm:$0x3]  ;;  %s8145_s28 = sshll.u32 %s11613_s10, 3 }
 0xcf2   : > { %5512 = vmatprep.subr.bf16.mxu1 %v10102_v63  ;;  %v5626_v63 = vrot.slane %v5621_v62, %v10779_v48 }
 0xcf5   : > { %5513 = vmatpush1.bf16.msra.mxu1 %v10100_v0  ;;  %v5630_v0 = vrot.slane %v5621_v62, %v10782_v50  ;;  %v10252_v62 = vld [vmem:[%s11602_s26 + $0x74] ss:$8 sps:$4 sm:$0xff]  }
 0xcf6   : > { %5514 = vmatprep.subr.bf16.mxu1 %v10105_v3 }
 0xcf9   : > { %5515 = vmatpush1.bf16.msra.mxu1 %v10103_v4 }
 0xcfa   : > { %5516 = vmatprep.subr.bf16.mxu1 %v10108_v5 }
 0xcfd   : > { %5517 = vmatpush1.bf16.msra.mxu1 %v10106_v6 }
 0xcfe   : > { %5518 = vmatprep.subr.bf16.mxu1 %v10111_v7 }
 0xd01   : > { %5519 = vmatpush1.bf16.msra.mxu1 %v10109_v8 }
 0xd02   : > { %5520 = vmatprep.subr.bf16.mxu1 %v10114_v9 }
 0xd05   : > { %5521 = vmatpush1.bf16.msra.mxu1 %v10112_v10  ;;  %v10181_v10 = vld [vmem:[%s11602_s26 + $0x100] ss:$8 sps:$4 sm:$0xff]  }
 0xd06   : > { %5522 = vmatprep.subr.bf16.mxu1 %v10117_v12 }
 0xd09   : > { %5523 = vmatpush1.bf16.msra.mxu1 %v10115_v13  ;;  %v10186_v13 = vld [vmem:[%s11602_s26 + $0x114] ss:$8 sps:$4 sm:$0xff]  }
 0xd0a   : > { %5524 = vmatprep.subr.bf16.mxu1 %v10120_v14  ;;  %v10184_v14 = vld [vmem:[%s11602_s26 + $0x110] ss:$8 sps:$4 sm:$0xff]  }
 0xd0d   : > { %5525 = vmatpush1.bf16.msra.mxu1 %v10118_v15  ;;  %v10189_v15 = vld [vmem:[%s11602_s26 + $0x124] ss:$8 sps:$4 sm:$0xff]  }
 0xd0e   : > { %5526 = vmatprep.subr.bf16.mxu1 %v10123_v16  ;;  %v10187_v16 = vld [vmem:[%s11602_s26 + $0x120] ss:$8 sps:$4 sm:$0xff]  }
 0xd11   : > { %5527 = vmatpush1.bf16.msra.mxu1 %v10121_v17  ;;  %v10192_v17 = vld [vmem:[%s11602_s26 + $0x134] ss:$8 sps:$4 sm:$0xff]  }
 0xd12   : > { %5528 = vmatprep.subr.bf16.mxu1 %v10126_v23  ;;  %v10190_v23 = vld [vmem:[%s11602_s26 + $0x130] ss:$8 sps:$4 sm:$0xff]  }
 0xd15   : > { %5529 = vmatpush1.bf16.msra.mxu1 %v10124_v24  ;;  %v10195_v24 = vld [vmem:[%s11602_s26 + $0x144] ss:$8 sps:$4 sm:$0xff]  }
 0xd16   : > { %5530 = vmatprep.subr.bf16.mxu1 %v10129_v25  ;;  %v10193_v25 = vld [vmem:[%s11602_s26 + $0x140] ss:$8 sps:$4 sm:$0xff]  }
 0xd19   : > { %5531 = vmatpush1.bf16.msra.mxu1 %v10127_v26  ;;  %v10198_v26 = vld [vmem:[%s11602_s26 + $0x154] ss:$8 sps:$4 sm:$0xff]  }
 0xd1a   : > { %5532 = vmatprep.subr.bf16.mxu1 %v10132_v27  ;;  %v10196_v27 = vld [vmem:[%s11602_s26 + $0x150] ss:$8 sps:$4 sm:$0xff]  }
 0xd1d   : > { %5533 = vmatpush1.bf16.msra.mxu1 %v10130_v28  ;;  %v10201_v28 = vld [vmem:[%s11602_s26 + $0x164] ss:$8 sps:$4 sm:$0xff]  }
 0xd20   : > { %5535 = vmatmul.mubr.bf16.vlgmr.msra.gmra.mrb[40].mxu1 %v11179_v11  ;;  %v10144_v11 = vld [vmem:[%s11601_s23 + $0x34] ss:$8 sps:$4 sm:$0xff]  }
 0xd21   : > { %5612 = vmatprep.mubr.f32.mxu1 %v10507_v20  ;;  %5840 = vmatprep.subr.bf16.mxu0 %v10144_v11  ;;  %v10208_v11 = vld [vmem:[%s11602_s26 + $0x190] ss:$8 sps:$4 sm:$0xff]  }
 0xd22   : > { %5841 = vmatpush1.bf16.msra.mxu0 %v10142_v33  ;;  %v10213_v33 = vld [vmem:[%s11602_s26 + $0x1a4] ss:$8 sps:$4 sm:$0xff]  }
 0xd23   : > { %5842 = vmatprep.subr.bf16.mxu0 %v10147_v19  ;;  %v10211_v19 = vld [vmem:[%s11602_s26 + $0x1a0] ss:$8 sps:$4 sm:$0xff]  }
 0xd26   : > { %5843 = vmatpush1.bf16.msra.mxu0 %v10145_v21  ;;  %v10216_v21 = vld [vmem:[%s11602_s26 + $0x1b4] ss:$8 sps:$4 sm:$0xff]  }
 0xd27   : > { %5844 = vmatprep.subr.bf16.mxu0 %v10150_v22  ;;  %v10214_v22 = vld [vmem:[%s11602_s26 + $0x1b0] ss:$8 sps:$4 sm:$0xff]  }
 0xd2a   : > { %5845 = vmatpush1.bf16.msra.mxu0 %v10148_v34  ;;  %v10219_v34 = vld [vmem:[%s11602_s26 + $0x1c4] ss:$8 sps:$4 sm:$0xff]  }
 0xd2b   : > { %5846 = vmatprep.subr.bf16.mxu0 %v10153_v35  ;;  %v10217_v35 = vld [vmem:[%s11602_s26 + $0x1c0] ss:$8 sps:$4 sm:$0xff]  }
 0xd2e   : > { %5847 = vmatpush1.bf16.msra.mxu0 %v10151_v36  ;;  %v10222_v36 = vld [vmem:[%s11602_s26 + $0x1d4] ss:$8 sps:$4 sm:$0xff]  }
 0xd2f   : > { %5848 = vmatprep.subr.bf16.mxu0 %v10156_v37  ;;  %v10220_v37 = vld [vmem:[%s11602_s26 + $0x1d0] ss:$8 sps:$4 sm:$0xff]  }
 0xd32   : > { %5849 = vmatpush1.bf16.msra.mxu0 %v10154_v38  ;;  %v10225_v38 = vld [vmem:[%s11602_s26 + $0x1e4] ss:$8 sps:$4 sm:$0xff]  }
 0xd33   : > { %5850 = vmatprep.subr.bf16.mxu0 %v10159_v39  ;;  %v10223_v39 = vld [vmem:[%s11602_s26 + $0x1e0] ss:$8 sps:$4 sm:$0xff]  }
 0xd36   : > { %5851 = vmatpush1.bf16.msra.mxu0 %v10157_v40  ;;  %v10228_v40 = vld [vmem:[%s11602_s26 + $0x1f4] ss:$8 sps:$4 sm:$0xff]  }
 0xd37   : > { %5852 = vmatprep.subr.bf16.mxu0 %v10162_v41  ;;  %v10226_v41 = vld [vmem:[%s11602_s26 + $0x1f0] ss:$8 sps:$4 sm:$0xff]  }
 0xd3a   : > { %5853 = vmatpush1.bf16.msra.mxu0 %v10160_v42 }
 0xd3b   : > { %5854 = vmatprep.subr.bf16.mxu0 %v10165_v43  ;;  %v10231_v43 = vld [vmem:[%s11602_s26 + $0x4] ss:$8 sps:$4 sm:$0xff]  }
 0xd3e   : > { %5855 = vmatpush1.bf16.msra.mxu0 %v10163_v44 }
 0xd3f   : > { %5856 = vmatprep.subr.bf16.mxu0 %v10168_v45  ;;  %v5641_v45 = vld [vmem:[%s11604_s1] sm:$0xf]  ;;  %s902_s1 = scalar_lea.vmem %s10662_s12, %s8145_s28 }
 0xd42   : > { %5857 = vmatpush1.bf16.msra.mxu0 %v10166_v46  ;;  %v10229_v46 = vld [vmem:[%s11602_s26] ss:$8 sps:$4 sm:$0xff]  }
 0xd43   : > { %5858 = vmatprep.subr.bf16.mxu0 %v10171_v47 }
 0xd46   : > { %5859 = vmatpush1.bf16.msra.mxu0 %v10169_v49  ;;  %v10234_v49 = vld [vmem:[%s11602_s26 + $0x14] ss:$8 sps:$4 sm:$0xff]  }
 0xd47   : > { %5860 = vmatprep.subr.bf16.mxu0 %v10174_v51 }
 0xd4a   : > { %5861 = vmatpush1.bf16.msra.mxu0 %v10172_v52  ;;  %v10232_v52 = vld [vmem:[%s11602_s26 + $0x10] ss:$8 sps:$4 sm:$0xff]  }
 0xd4b   : > { %5862 = vmatprep.subr.bf16.mxu0 %v10177_v58  ;;  %v10241_v58 = vld [vmem:[%s11602_s26 + $0x40] ss:$8 sps:$4 sm:$0xff]  }
 0xd4e   : > { %5863 = vmatpush1.bf16.msra.mxu0 %v10175_v59  ;;  %v10246_v59 = vld [vmem:[%s11602_s26 + $0x54] ss:$8 sps:$4 sm:$0xff]  }
 0xd4f   : > { %5864 = vmatprep.subr.bf16.mxu0 %v10180_v60  ;;  %v10244_v60 = vld [vmem:[%s11602_s26 + $0x50] ss:$8 sps:$4 sm:$0xff]  }
 0xd52   : > { %5865 = vmatpush1.bf16.msra.mxu0 %v10178_v61  ;;  %v10249_v61 = vld [vmem:[%s11602_s26 + $0x64] ss:$8 sps:$4 sm:$0xff]  }
 0xd53   : > { %6376 = vmatprep.subr.bf16.mxu0 %v10183_v1  ;;  %v10247_v1 = vld [vmem:[%s11602_s26 + $0x60] ss:$8 sps:$4 sm:$0xff]  }
 0xdf3   : > { %v5536_v53 = vpop.f32.mrb[40].mxu1 }
 0xdf4   : > { %v5538_v54 = vpop.f32.mrb[41].mxu1 }
 0xdf5   : > { %v5540_v56 = vpop.f32.mrb[42].mxu1  ;;  %5548 = vmatprep.subr.mxu1 %v5538_v54  ;;  %v10235_v54 = vld [vmem:[%s11602_s26 + $0x20] ss:$8 sps:$4 sm:$0xff]  }
 0xdf6   : > { %v5541_v57 = vpop.f32.mrb[43].mxu1  ;;  %5549 = vmatpush1.msra.mxu1 %v5536_v53  ;;  %v10237_v53 = vld [vmem:[%s11602_s26 + $0x24] ss:$8 sps:$4 sm:$0xff]   ;;  %v10238_v56 = vld [vmem:[%s11602_s26 + $0x30] ss:$8 sps:$4 sm:$0xff]  }
 0xdf7   : > { %8892 = vmatmul.mubr.msk.f32.vlgmr.msra.gmra.mrb[28].mxu1 %vm5160_vm2, %v8891_v55  ;;  %v10240_v55 = vld [vmem:[%s11602_s26 + $0x34] ss:$8 sps:$4 sm:$0xff]   ;;  %v10243_v57 = vld [vmem:[%s11602_s26 + $0x44] ss:$8 sps:$4 sm:$0xff]  }
 0xdf8   : > { %5942 = vmatprep.mubr.f32.mxu1 %v10507_v20 }
 0xeca   : > { %v5614_v3 = vpop.f32.mrb[28].mxu1 }
 0xecb   : > { %v9397_v4 = vadd.f32 %v5626_v63, %v5614_v3  ;;  %v5616_v5 = vpop.f32.mrb[29].mxu1  ;;  %v10250_v63 = vld [vmem:[%s11602_s26 + $0x70] ss:$8 sps:$4 sm:$0xff]   ;;  %v10253_v3 = vld [vmem:[%s11602_s26 + $0x80] ss:$8 sps:$4 sm:$0xff]  }
 0xecc   : > { %v9398_v6 = vadd.f32 %v5630_v0, %v5616_v5  ;;  %v10255_v0 = vld [vmem:[%s11602_s26 + $0x84] ss:$8 sps:$4 sm:$0xff]   ;;  %v10256_v5 = vld [vmem:[%s11602_s26 + $0x90] ss:$8 sps:$4 sm:$0xff]  }
 0xecd   : > { %v5637_v7 = vmax.f32 %v9397_v4, 0.0  ;;  %v10258_v4 = vld [vmem:[%s11602_s26 + $0x94] ss:$8 sps:$4 sm:$0xff]  }
 0xece   : > { %v5638_v8 = vmax.f32 %v9398_v6, 0.0  ;;  %v10261_v6 = vld [vmem:[%s11602_s26 + $0xa4] ss:$8 sps:$4 sm:$0xff]  }
 0xecf   : > { %v11297_v12 = vpack.c.bf16 %v5637_v7, %v5637_v7  ;;  %v10259_v7 = vld [vmem:[%s11602_s26 + $0xa0] ss:$8 sps:$4 sm:$0xff]  }
 0xed0   : > { %v11294_v9 = vpack.c.bf16 %v5638_v8, %v5638_v8  ;;  %v10264_v8 = vld [vmem:[%s11602_s26 + $0xb4] ss:$8 sps:$4 sm:$0xff]  }
 0xed2   : > { %5866 = vmatprep.mubr.bf16.mxu0 %v11294_v9 }
 0xed3   : > { %5867 = vmatmul.mubr.bf16.vlgmr.msra.gmra.mrb[40].mxu0 %v11297_v12 }
 0xed4   : > { %6377 = vmatpush1.bf16.msra.mxu0 %v10181_v10  ;;  %6408 = vmatprep.mubr.bf16.mxu0 %v11294_v9  ;;  %v10262_v10 = vld [vmem:[%s11602_s26 + $0xb0] ss:$8 sps:$4 sm:$0xff]  }
 0xed5   : > { %6378 = vmatprep.subr.bf16.mxu0 %v10186_v13  ;;  %v10267_v13 = vld [vmem:[%s11602_s26 + $0xc4] ss:$8 sps:$4 sm:$0xff]  }
 0xed8   : > { %6379 = vmatpush1.bf16.msra.mxu0 %v10184_v14  ;;  %v10265_v14 = vld [vmem:[%s11602_s26 + $0xc0] ss:$8 sps:$4 sm:$0xff]  }
 0xed9   : > { %6380 = vmatprep.subr.bf16.mxu0 %v10189_v15  ;;  %v10270_v15 = vld [vmem:[%s11602_s26 + $0xd4] ss:$8 sps:$4 sm:$0xff]  }
 0xedc   : > { %6381 = vmatpush1.bf16.msra.mxu0 %v10187_v16  ;;  %v10268_v16 = vld [vmem:[%s11602_s26 + $0xd0] ss:$8 sps:$4 sm:$0xff]  }
 0xedd   : > { %6382 = vmatprep.subr.bf16.mxu0 %v10192_v17  ;;  %v10273_v17 = vld [vmem:[%s11602_s26 + $0xe4] ss:$8 sps:$4 sm:$0xff]  }
 0xee0   : > { %6383 = vmatpush1.bf16.msra.mxu0 %v10190_v23  ;;  %v10271_v23 = vld [vmem:[%s11602_s26 + $0xe0] ss:$8 sps:$4 sm:$0xff]  }
 0xee1   : > { %6384 = vmatprep.subr.bf16.mxu0 %v10195_v24  ;;  %v10276_v24 = vld [vmem:[%s11602_s26 + $0xf4] ss:$8 sps:$4 sm:$0xff]  }
 0xee4   : > { %6385 = vmatpush1.bf16.msra.mxu0 %v10193_v25  ;;  %v10274_v25 = vld [vmem:[%s11602_s26 + $0xf0] ss:$8 sps:$4 sm:$0xff]  }
 0xee5   : > { %6386 = vmatprep.subr.bf16.mxu0 %v10198_v26 }
 0xee8   : > { %6387 = vmatpush1.bf16.msra.mxu0 %v10196_v27 }
 0xee9   : > { %6388 = vmatprep.subr.bf16.mxu0 %v10201_v28 }
 0xeec   : > { %6389 = vmatpush1.bf16.msra.mxu0 %v10199_v30 }
 0xeed   : > { %6390 = vmatprep.subr.bf16.mxu0 %v10204_v18  ;;  %v9022_v18 = vld [vmem:[%s11605_s2 + $0x4] sm:$0xf] }
 0xef0   : > { %6391 = vmatpush1.bf16.msra.mxu0 %v10202_v2 }
 0xef1   : > { %6392 = vmatprep.subr.bf16.mxu0 %v10207_v29  ;;  %v10279_v29 = vld [vmem:[%s11602_s26 + $0x204] ss:$8 sps:$4 sm:$0xff]  }
 0xef4   : > { %6393 = vmatpush1.bf16.msra.mxu0 %v10205_v31 }
 0xef5   : > { %6394 = vmatprep.subr.bf16.mxu0 %v10210_v32  ;;  %v6182_v32 = vld [vmem:[%s11605_s2] sm:$0xf] }
 0xef8   : > { %6395 = vmatpush1.bf16.msra.mxu0 %v10208_v11  ;;  %v10277_v11 = vld [vmem:[%s11602_s26 + $0x200] ss:$8 sps:$4 sm:$0xff]  }
 0xef9   : > { %6396 = vmatprep.subr.bf16.mxu0 %v10213_v33 }
 0xefc   : > { %6397 = vmatpush1.bf16.msra.mxu0 %v10211_v19  ;;  %v10282_v19 = vld [vmem:[%s11602_s26 + $0x214] ss:$8 sps:$4 sm:$0xff]  }
 0xefd   : > { %6398 = vmatprep.subr.bf16.mxu0 %v10216_v21 }
 0xf00   : > { %6399 = vmatpush1.bf16.msra.mxu0 %v10214_v22  ;;  %v10280_v22 = vld [vmem:[%s11602_s26 + $0x210] ss:$8 sps:$4 sm:$0xff]  }
 0xf01   : > { %6400 = vmatprep.subr.bf16.mxu0 %v10219_v34  ;;  %v10285_v34 = vld [vmem:[%s11602_s26 + $0x224] ss:$8 sps:$4 sm:$0xff]  }
 0xf04   : > { %6401 = vmatpush1.bf16.msra.mxu0 %v10217_v35  ;;  %v10283_v35 = vld [vmem:[%s11602_s26 + $0x220] ss:$8 sps:$4 sm:$0xff]  }
 0xf05   : > { %6402 = vmatprep.subr.bf16.mxu0 %v10222_v36  ;;  %v10288_v36 = vld [vmem:[%s11602_s26 + $0x234] ss:$8 sps:$4 sm:$0xff]  }
 0xf08   : > { %6403 = vmatpush1.bf16.msra.mxu0 %v10220_v37  ;;  %v10286_v37 = vld [vmem:[%s11602_s26 + $0x230] ss:$8 sps:$4 sm:$0xff]  }
 0xf09   : > { %6404 = vmatprep.subr.bf16.mxu0 %v10225_v38  ;;  %v10291_v38 = vld [vmem:[%s11602_s26 + $0x244] ss:$8 sps:$4 sm:$0xff]  }
 0xf0c   : > { %6405 = vmatpush1.bf16.msra.mxu0 %v10223_v39  ;;  %v10289_v39 = vld [vmem:[%s11602_s26 + $0x240] ss:$8 sps:$4 sm:$0xff]  }
 0xf0d   : > { %6406 = vmatprep.subr.bf16.mxu0 %v10228_v40  ;;  %v10292_v40 = vld [vmem:[%s11602_s26 + $0x250] ss:$8 sps:$4 sm:$0xff]  }
 0xf10   : > { %6407 = vmatpush1.bf16.msra.mxu0 %v10226_v41  ;;  %v10297_v41 = vld [vmem:[%s11602_s26 + $0x264] ss:$8 sps:$4 sm:$0xff]  }
 0xf13   : > { %6409 = vmatmul.mubr.bf16.vlgmr.msra.gmra.mrb[44].mxu0 %v11297_v12 }
 0xfa6   : > { %v5868_v42 = vpop.f32.mrb[40].mxu0 }
 0xfa7   : > { %v5870_v44 = vpop.f32.mrb[41].mxu0 }
 0xfa8   : > { %v5872_v47 = vpop.f32.mrb[42].mxu0  ;;  %5878 = vmatprep.subr.mxu1 %v5870_v44  ;;  %v10298_v44 = vld [vmem:[%s11602_s26 + $0x270] ss:$8 sps:$4 sm:$0xff]  }
 0xfa9   : > { %v5873_v51 = vpop.f32.mrb[43].mxu0  ;;  %5879 = vmatpush1.msra.mxu1 %v5868_v42  ;;  %v10295_v42 = vld [vmem:[%s11602_s26 + $0x260] ss:$8 sps:$4 sm:$0xff]   ;;  %v10306_v47 = vld [vmem:[%s11602_s26 + $0x294] ss:$8 sps:$4 sm:$0xff]  }
 0xfaa   : > { %8925 = vmatmul.mubr.msk.f32.vlgmr.msra.gmra.mrb[44].mxu1 %vm5160_vm2, %v5641_v45  ;;  %6141 = vmatprep.subr.bf16.mxu1 %v10231_v43  ;;  %v10300_v43 = vld [vmem:[%s11602_s26 + $0x274] ss:$8 sps:$4 sm:$0xff]   ;;  %v10303_v45 = vld [vmem:[%s11602_s26 + $0x284] ss:$8 sps:$4 sm:$0xff]  }
 0xfab   : > { %6142 = vmatpush1.bf16.msra.mxu1 %v10229_v46  ;;  %6173 = vmatprep.mubr.bf16.mxu1 %v11294_v9  ;;  %v10301_v46 = vld [vmem:[%s11602_s26 + $0x280] ss:$8 sps:$4 sm:$0xff]   ;;  %v10309_v51 = vld [vmem:[%s11602_s26 + $0x2a4] ss:$8 sps:$4 sm:$0xff]  }
 0xfac   : > { %6143 = vmatprep.subr.bf16.mxu1 %v10234_v49  ;;  %v10304_v49 = vld [vmem:[%s11602_s26 + $0x290] ss:$8 sps:$4 sm:$0xff]  }
 0xfaf   : > { %6144 = vmatpush1.bf16.msra.mxu1 %v10232_v52  ;;  %v10307_v52 = vld [vmem:[%s11602_s26 + $0x2a0] ss:$8 sps:$4 sm:$0xff]  }
 0xfb0   : > { %6145 = vmatprep.subr.bf16.mxu1 %v10237_v53  ;;  %v10312_v53 = vld [vmem:[%s11602_s26 + $0x2b4] ss:$8 sps:$4 sm:$0xff]  }
 0xfb3   : > { %6146 = vmatpush1.bf16.msra.mxu1 %v10235_v54  ;;  %v10310_v54 = vld [vmem:[%s11602_s26 + $0x2b0] ss:$8 sps:$4 sm:$0xff]  }
 0xfb4   : > { %6147 = vmatprep.subr.bf16.mxu1 %v10240_v55  ;;  %v10315_v55 = vld [vmem:[%s11602_s26 + $0x2c4] ss:$8 sps:$4 sm:$0xff]  }
 0xfb7   : > { %6148 = vmatpush1.bf16.msra.mxu1 %v10238_v56  ;;  %v10313_v56 = vld [vmem:[%s11602_s26 + $0x2c0] ss:$8 sps:$4 sm:$0xff]  }
 0xfb8   : > { %6149 = vmatprep.subr.bf16.mxu1 %v10243_v57  ;;  %v10318_v57 = vld [vmem:[%s11602_s26 + $0x2d4] ss:$8 sps:$4 sm:$0xff]  }
 0xfbb   : > { %6150 = vmatpush1.bf16.msra.mxu1 %v10241_v58  ;;  %v10316_v58 = vld [vmem:[%s11602_s26 + $0x2d0] ss:$8 sps:$4 sm:$0xff]  }
 0xfbc   : > { %6151 = vmatprep.subr.bf16.mxu1 %v10246_v59  ;;  %v10321_v59 = vld [vmem:[%s11602_s26 + $0x2e4] ss:$8 sps:$4 sm:$0xff]  }
 0xfbf   : > { %6152 = vmatpush1.bf16.msra.mxu1 %v10244_v60  ;;  %v10319_v60 = vld [vmem:[%s11602_s26 + $0x2e0] ss:$8 sps:$4 sm:$0xff]  }
 0xfc0   : > { %6153 = vmatprep.subr.bf16.mxu1 %v10249_v61  ;;  %v10324_v61 = vld [vmem:[%s11602_s26 + $0x2f4] ss:$8 sps:$4 sm:$0xff]  }
 0xfc3   : > { %6154 = vmatpush1.bf16.msra.mxu1 %v10247_v1  ;;  %v10322_v1 = vld [vmem:[%s11602_s26 + $0x2f0] ss:$8 sps:$4 sm:$0xff]  }
 0xfc4   : > { %6155 = vmatprep.subr.bf16.mxu1 %v10252_v62  ;;  %v10325_v62 = vld [vmem:[%s11606_s0] ss:$8 sps:$4 sm:$0xff]  }
 0xfc7   : > { %6156 = vmatpush1.bf16.msra.mxu1 %v10250_v63  ;;  %v10327_v63 = vld [vmem:[%s11606_s0 + $0x4] ss:$8 sps:$4 sm:$0xff]  }
 0xfc8   : > { %6157 = vmatprep.subr.bf16.mxu1 %v10255_v0  ;;  %v10333_v0 = vld [vmem:[%s11606_s0 + $0x14] ss:$8 sps:$4 sm:$0xff]   ;;  %7089 = vmatprep.subr.bf16.mxu0 %v10327_v63  ;;  %v10409_v63 = vld [vmem:[%s11606_s0 + $0xe0] ss:$8 sps:$4 sm:$0xff]  }
 0xfc9   : > { %7090 = vmatpush1.bf16.msra.mxu0 %v10325_v62  ;;  %v10411_v62 = vld [vmem:[%s11606_s0 + $0xe4] ss:$8 sps:$4 sm:$0xff]  }
 0xfca   : > { %7091 = vmatprep.subr.bf16.mxu0 %v10333_v0  ;;  %v10414_v0 = vld [vmem:[%s11606_s0 + $0x1e4] ss:$8 sps:$4 sm:$0xff]  }
 0xfcb   : > { %6158 = vmatpush1.bf16.msra.mxu1 %v10253_v3  ;;  %v10331_v3 = vld [vmem:[%s11606_s0 + $0x10] ss:$8 sps:$4 sm:$0xff]  }
 0xfcc   : > { %6159 = vmatprep.subr.bf16.mxu1 %v10258_v4  ;;  %v10339_v4 = vld [vmem:[%s11606_s0 + $0x24] ss:$8 sps:$4 sm:$0xff]  }
 0xfcd   : > { %7092 = vmatpush1.bf16.msra.mxu0 %v10331_v3  ;;  %v10412_v3 = vld [vmem:[%s11606_s0 + $0x1e0] ss:$8 sps:$4 sm:$0xff]  }
 0xfce   : > { %7093 = vmatprep.subr.bf16.mxu0 %v10339_v4  ;;  %v10417_v4 = vld [vmem:[%s11606_s0 + $0xf4] ss:$8 sps:$4 sm:$0xff]  }
 0xfcf   : > { %6160 = vmatpush1.bf16.msra.mxu1 %v10256_v5  ;;  %v10337_v5 = vld [vmem:[%s11606_s0 + $0x20] ss:$8 sps:$4 sm:$0xff]  }
 0xfd0   : > { %6161 = vmatprep.subr.bf16.mxu1 %v10261_v6  ;;  %v10343_v6 = vld [vmem:[%s11606_s0 + $0x30] ss:$8 sps:$4 sm:$0xff]  }
 0xfd1   : > { %7094 = vmatpush1.bf16.msra.mxu0 %v10337_v5  ;;  %v10415_v5 = vld [vmem:[%s11606_s0 + $0xf0] ss:$8 sps:$4 sm:$0xff]  }
 0xfd3   : > { %6162 = vmatpush1.bf16.msra.mxu1 %v10259_v7  ;;  %v10351_v7 = vld [vmem:[%s11606_s0 + $0x44] ss:$8 sps:$4 sm:$0xff]  }
 0xfd4   : > { %6163 = vmatprep.subr.bf16.mxu1 %v10264_v8  ;;  %v10349_v8 = vld [vmem:[%s11606_s0 + $0x40] ss:$8 sps:$4 sm:$0xff]  }
 0xfd7   : > { %6164 = vmatpush1.bf16.msra.mxu1 %v10262_v10  ;;  %v10357_v10 = vld [vmem:[%s11606_s0 + $0x54] ss:$8 sps:$4 sm:$0xff]  }
 0xfd8   : > { %6165 = vmatprep.subr.bf16.mxu1 %v10267_v13  ;;  %v10355_v13 = vld [vmem:[%s11606_s0 + $0x50] ss:$8 sps:$4 sm:$0xff]  }
 0xfdb   : > { %6166 = vmatpush1.bf16.msra.mxu1 %v10265_v14  ;;  %v10363_v14 = vld [vmem:[%s11606_s0 + $0x64] ss:$8 sps:$4 sm:$0xff]  }
 0xfdc   : > { %6167 = vmatprep.subr.bf16.mxu1 %v10270_v15  ;;  %v10361_v15 = vld [vmem:[%s11606_s0 + $0x60] ss:$8 sps:$4 sm:$0xff]  }
 0xfdf   : > { %6168 = vmatpush1.bf16.msra.mxu1 %v10268_v16  ;;  %v10369_v16 = vld [vmem:[%s11606_s0 + $0x74] ss:$8 sps:$4 sm:$0xff]  }
 0xfe0   : > { %6169 = vmatprep.subr.bf16.mxu1 %v10273_v17  ;;  %v10367_v17 = vld [vmem:[%s11606_s0 + $0x70] ss:$8 sps:$4 sm:$0xff]  }
 0xfe3   : > { %6170 = vmatpush1.bf16.msra.mxu1 %v10271_v23  ;;  %v10375_v23 = vld [vmem:[%s11606_s0 + $0x84] ss:$8 sps:$4 sm:$0xff]  }
 0xfe4   : > { %6171 = vmatprep.subr.bf16.mxu1 %v10276_v24  ;;  %v10373_v24 = vld [vmem:[%s11606_s0 + $0x80] ss:$8 sps:$4 sm:$0xff]  }
 0xfe6   : > { %v6410_v26 = vpop.f32.mrb[44].mxu0 }
 0xfe7   : > { %v6412_v27 = vpop.f32.mrb[45].mxu0  ;;  %6172 = vmatpush1.bf16.msra.mxu1 %v10274_v25  ;;  %v10381_v25 = vld [vmem:[%s11606_s0 + $0x94] ss:$8 sps:$4 sm:$0xff]  }
 0xfe8   : > { %v6414_v28 = vpop.f32.mrb[46].mxu0  ;;  %6422 = vmatprep.subr.mxu1 %v6412_v27  ;;  %v10387_v27 = vld [vmem:[%s11606_s0 + $0xa4] ss:$8 sps:$4 sm:$0xff]  }
 0xfe9   : > { %v6415_v30 = vpop.f32.mrb[47].mxu0  ;;  %v10385_v28 = vld [vmem:[%s11606_s0 + $0xa0] ss:$8 sps:$4 sm:$0xff]  }
 0xfea   : > { %6174 = vmatmul.mubr.bf16.vlgmr.msra.gmra.mrb[48].mxu1 %v11297_v12  ;;  %v10393_v30 = vld [vmem:[%s11606_s0 + $0xb4] ss:$8 sps:$4 sm:$0xff]  }
 0xfeb   : > { %6423 = vmatpush1.msra.mxu1 %v6410_v26  ;;  %6486 = vmatprep.mubr.f32.mxu1 %v10507_v20  ;;  %v10379_v26 = vld [vmem:[%s11606_s0 + $0x90] ss:$8 sps:$4 sm:$0xff]  }
 0xff2   : > { %9023 = vmatmul.mubr.msk.f32.vlgmr.msra.gmra.mrb[46].mxu1 %vm5160_vm2, %v9022_v18  ;;  %v10391_v18 = vld [vmem:[%s11606_s0 + $0xb0] ss:$8 sps:$4 sm:$0xff]  }
 0xff3   : > { %6560 = vmatprep.mubr.f32.mxu1 %v10507_v20 }
0x10bd   : > { %v6175_v2 = vpop.f32.mrb[48].mxu1 }
0x10be   : > { %v6177_v31 = vpop.f32.mrb[49].mxu1 }
0x10bf   : > { %v6179_v33 = vpop.f32.mrb[50].mxu1  ;;  %6496 = vmatprep.subr.mxu1 %v6177_v31  ;;  %v10405_v31 = vld [vmem:[%s11606_s0 + $0xd4] ss:$8 sps:$4 sm:$0xff]  }
0x10c0   : > { %v6180_v21 = vpop.f32.mrb[51].mxu1  ;;  %6497 = vmatpush1.msra.mxu1 %v6175_v2  ;;  %v10399_v2 = vld [vmem:[%s11606_s0 + $0xc4] ss:$8 sps:$4 sm:$0xff]  }
0x10c1   : > { %9024 = vmatmul.mubr.msk.f32.vlgmr.msra.gmra.mrb[46].mxu1 %vm5160_vm2, %v6182_v32  ;;  %6760 = vmatprep.subr.bf16.mxu1 %v10279_v29  ;;  %v10397_v29 = vld [vmem:[%s11606_s0 + $0xc0] ss:$8 sps:$4 sm:$0xff]   ;;  %v10403_v32 = vld [vmem:[%s11606_s0 + $0xd0] ss:$8 sps:$4 sm:$0xff]   ;;  %v10330_v33 = vld [vmem:[%s11606_s0 + $0x104] ss:$8 sps:$4 sm:$0xff]  }
0x10c2   : > { %6761 = vmatpush1.bf16.msra.mxu1 %v10277_v11  ;;  %6792 = vmatprep.mubr.bf16.mxu1 %v11294_v9  ;;  %v10294_v9 = vld [vmem:[%s11602_s26 + $0x254] ss:$8 sps:$4 sm:$0xff]   ;;  %v9089_v21 = vld [vmem:[%s11605_s2 + $0x8] sm:$0xf] }
0x10c3   : > { %6762 = vmatprep.subr.bf16.mxu1 %v10282_v19 }
0x10c6   : > { %6763 = vmatpush1.bf16.msra.mxu1 %v10280_v22  ;;  %v10328_v22 = vld [vmem:[%s11606_s0 + $0x100] ss:$8 sps:$4 sm:$0xff]  }
0x10c7   : > { %6764 = vmatprep.subr.bf16.mxu1 %v10285_v34 }
0x10ca   : > { %6765 = vmatpush1.bf16.msra.mxu1 %v10283_v35  ;;  %v10336_v35 = vld [vmem:[%s11606_s0 + $0x114] ss:$8 sps:$4 sm:$0xff]  }
0x10cb   : > { %6766 = vmatprep.subr.bf16.mxu1 %v10288_v36 }
0x10ce   : > { %6767 = vmatpush1.bf16.msra.mxu1 %v10286_v37  ;;  %v10334_v37 = vld [vmem:[%s11606_s0 + $0x110] ss:$8 sps:$4 sm:$0xff]  }
0x10cf   : > { %6768 = vmatprep.subr.bf16.mxu1 %v10291_v38  ;;  %v10342_v38 = vld [vmem:[%s11606_s0 + $0x124] ss:$8 sps:$4 sm:$0xff]  }
0x10d2   : > { %6769 = vmatpush1.bf16.msra.mxu1 %v10289_v39  ;;  %v10340_v39 = vld [vmem:[%s11606_s0 + $0x120] ss:$8 sps:$4 sm:$0xff]  }
0x10d3   : > { %6770 = vmatprep.subr.bf16.mxu1 %v10294_v9  ;;  %v10348_v9 = vld [vmem:[%s11606_s0 + $0x134] ss:$8 sps:$4 sm:$0xff]  }
0x10d6   : > { %6771 = vmatpush1.bf16.msra.mxu1 %v10292_v40  ;;  %v10346_v40 = vld [vmem:[%s11606_s0 + $0x130] ss:$8 sps:$4 sm:$0xff]  }
0x10d7   : > { %6772 = vmatprep.subr.bf16.mxu1 %v10297_v41  ;;  %v10354_v41 = vld [vmem:[%s11606_s0 + $0x144] ss:$8 sps:$4 sm:$0xff]  }
0x10da   : > { %6773 = vmatpush1.bf16.msra.mxu1 %v10295_v42  ;;  %v10352_v42 = vld [vmem:[%s11606_s0 + $0x140] ss:$8 sps:$4 sm:$0xff]  }
0x10db   : > { %6774 = vmatprep.subr.bf16.mxu1 %v10300_v43  ;;  %v10360_v43 = vld [vmem:[%s11606_s0 + $0x154] ss:$8 sps:$4 sm:$0xff]  }
0x10de   : > { %6775 = vmatpush1.bf16.msra.mxu1 %v10298_v44  ;;  %v10358_v44 = vld [vmem:[%s11606_s0 + $0x150] ss:$8 sps:$4 sm:$0xff]  }
0x10df   : > { %6776 = vmatprep.subr.bf16.mxu1 %v10303_v45  ;;  %v10366_v45 = vld [vmem:[%s11606_s0 + $0x164] ss:$8 sps:$4 sm:$0xff]  }
0x10e2   : > { %6777 = vmatpush1.bf16.msra.mxu1 %v10301_v46  ;;  %v10364_v46 = vld [vmem:[%s11606_s0 + $0x160] ss:$8 sps:$4 sm:$0xff]  }
0x10e3   : > { %6778 = vmatprep.subr.bf16.mxu1 %v10306_v47  ;;  %v10372_v47 = vld [vmem:[%s11606_s0 + $0x174] ss:$8 sps:$4 sm:$0xff]  }
0x10e6   : > { %6779 = vmatpush1.bf16.msra.mxu1 %v10304_v49  ;;  %v10370_v49 = vld [vmem:[%s11606_s0 + $0x170] ss:$8 sps:$4 sm:$0xff]  }
0x10e7   : > { %6780 = vmatprep.subr.bf16.mxu1 %v10309_v51  ;;  %v10378_v51 = vld [vmem:[%s11606_s0 + $0x184] ss:$8 sps:$4 sm:$0xff]  }
0x10ea   : > { %6781 = vmatpush1.bf16.msra.mxu1 %v10307_v52  ;;  %v10376_v52 = vld [vmem:[%s11606_s0 + $0x180] ss:$8 sps:$4 sm:$0xff]  }
0x10eb   : > { %6782 = vmatprep.subr.bf16.mxu1 %v10312_v53  ;;  %v10384_v53 = vld [vmem:[%s11606_s0 + $0x194] ss:$8 sps:$4 sm:$0xff]  }
0x10ee   : > { %6783 = vmatpush1.bf16.msra.mxu1 %v10310_v54  ;;  %v10382_v54 = vld [vmem:[%s11606_s0 + $0x190] ss:$8 sps:$4 sm:$0xff]  }
0x10ef   : > { %6784 = vmatprep.subr.bf16.mxu1 %v10315_v55  ;;  %v10390_v55 = vld [vmem:[%s11606_s0 + $0x1a4] ss:$8 sps:$4 sm:$0xff]  }
0x10f2   : > { %6785 = vmatpush1.bf16.msra.mxu1 %v10313_v56  ;;  %v10388_v56 = vld [vmem:[%s11606_s0 + $0x1a0] ss:$8 sps:$4 sm:$0xff]  }
0x10f3   : > { %6786 = vmatprep.subr.bf16.mxu1 %v10318_v57  ;;  %v10396_v57 = vld [vmem:[%s11606_s0 + $0x1b4] ss:$8 sps:$4 sm:$0xff]  }
0x10f6   : > { %6787 = vmatpush1.bf16.msra.mxu1 %v10316_v58  ;;  %v10394_v58 = vld [vmem:[%s11606_s0 + $0x1b0] ss:$8 sps:$4 sm:$0xff]  }
0x10f7   : > { %6788 = vmatprep.subr.bf16.mxu1 %v10321_v59  ;;  %v10402_v59 = vld [vmem:[%s11606_s0 + $0x1c4] ss:$8 sps:$4 sm:$0xff]  }
0x10fa   : > { %6789 = vmatpush1.bf16.msra.mxu1 %v10319_v60  ;;  %v10400_v60 = vld [vmem:[%s11606_s0 + $0x1c0] ss:$8 sps:$4 sm:$0xff]  }
0x10fb   : > { %6790 = vmatprep.subr.bf16.mxu1 %v10324_v61  ;;  %v10408_v61 = vld [vmem:[%s11606_s0 + $0x1d4] ss:$8 sps:$4 sm:$0xff]  }
0x10fe   : > { %6791 = vmatpush1.bf16.msra.mxu1 %v10322_v1  ;;  %v10406_v1 = vld [vmem:[%s11606_s0 + $0x1d0] ss:$8 sps:$4 sm:$0xff]  }
0x1101   : > { %6793 = vmatmul.mubr.bf16.vlgmr.msra.gmra.mrb[52].mxu1 %v11297_v12  ;;  %v10345_v12 = vld [vmem:[%s11606_s0 + $0x34] ss:$8 sps:$4 sm:$0xff]  }
0x1102   : > { %6870 = vmatprep.mubr.f32.mxu1 %v10507_v20  ;;  %7095 = vmatprep.subr.bf16.mxu0 %v10345_v12  ;;  %v10420_v12 = vld [vmem:[%s11606_s0 + $0x1f4] ss:$8 sps:$4 sm:$0xff]  }
0x1103   : > { %7096 = vmatpush1.bf16.msra.mxu0 %v10343_v6  ;;  %v10418_v6 = vld [vmem:[%s11606_s0 + $0x1f0] ss:$8 sps:$4 sm:$0xff]  }
0x1104   : > { %7097 = vmatprep.subr.bf16.mxu0 %v10351_v7  ;;  %v10423_v7 = vld [vmem:[%s11606_s0 + $0x204] ss:$8 sps:$4 sm:$0xff]  }
0x1107   : > { %7098 = vmatpush1.bf16.msra.mxu0 %v10349_v8  ;;  %v6879_v8 = vld [vmem:[%s11607_s11] sm:$0x3] }
0x1108   : > { %7099 = vmatprep.subr.bf16.mxu0 %v10357_v10  ;;  %v6884_v10 = vrot.slane %v6879_v8, %v10779_v48 }
0x110b   : > { %7100 = vmatpush1.bf16.msra.mxu0 %v10355_v13  ;;  %v6888_v13 = vrot.slane %v6879_v8, %v10782_v50  ;;  %v9258_v8 = vld [vmem:[%s11608_s15 + $0x8] sm:$0xf] }
0x110c   : > { %7101 = vmatprep.subr.bf16.mxu0 %v10363_v14 }
0x110f   : > { %7102 = vmatpush1.bf16.msra.mxu0 %v10361_v15 }
0x1110   : > { %7103 = vmatprep.subr.bf16.mxu0 %v10369_v16 }
0x1113   : > { %7104 = vmatpush1.bf16.msra.mxu0 %v10367_v17 }
0x1114   : > { %7105 = vmatprep.subr.bf16.mxu0 %v10375_v23 }
0x1117   : > { %7106 = vmatpush1.bf16.msra.mxu0 %v10373_v24 }
0x1118   : > { %7107 = vmatprep.subr.bf16.mxu0 %v10381_v25 }
0x111b   : > { %7108 = vmatpush1.bf16.msra.mxu0 %v10379_v26  ;;  %v10421_v26 = vld [vmem:[%s11606_s0 + $0x200] ss:$8 sps:$4 sm:$0xff]  }
0x111c   : > { %7109 = vmatprep.subr.bf16.mxu0 %v10387_v27 }
0x111f   : > { %7110 = vmatpush1.bf16.msra.mxu0 %v10385_v28  ;;  %v10426_v28 = vld [vmem:[%s11606_s0 + $0x214] ss:$8 sps:$4 sm:$0xff]  }
0x1120   : > { %7111 = vmatprep.subr.bf16.mxu0 %v10393_v30  ;;  %v10424_v30 = vld [vmem:[%s11606_s0 + $0x210] ss:$8 sps:$4 sm:$0xff]  }
0x1123   : > { %7112 = vmatpush1.bf16.msra.mxu0 %v10391_v18  ;;  %v10429_v18 = vld [vmem:[%s11606_s0 + $0x224] ss:$8 sps:$4 sm:$0xff]  }
0x1124   : > { %7113 = vmatprep.subr.bf16.mxu0 %v10399_v2  ;;  %v10427_v2 = vld [vmem:[%s11606_s0 + $0x220] ss:$8 sps:$4 sm:$0xff]  }
0x1127   : > { %7114 = vmatpush1.bf16.msra.mxu0 %v10397_v29  ;;  %v10432_v29 = vld [vmem:[%s11606_s0 + $0x234] ss:$8 sps:$4 sm:$0xff]  }
0x1128   : > { %7115 = vmatprep.subr.bf16.mxu0 %v10405_v31  ;;  %v10430_v31 = vld [vmem:[%s11606_s0 + $0x230] ss:$8 sps:$4 sm:$0xff]  }
0x112b   : > { %7116 = vmatpush1.bf16.msra.mxu0 %v10403_v32  ;;  %v10435_v32 = vld [vmem:[%s11606_s0 + $0x244] ss:$8 sps:$4 sm:$0xff]  }
0x112c   : > { %7117 = vmatprep.subr.bf16.mxu0 %v10411_v62  ;;  %v7885_v62 = vld [vmem:[%s10652_s20 + $0x80] sm:$0xff] }
0x112f   : > { %7118 = vmatpush1.bf16.msra.mxu0 %v10409_v63  ;;  %v7886_v63 = vld [vmem:[%s10652_s20 + $0x88] sm:$0xff] }
0x1130   : > { %7119 = vmatprep.subr.bf16.mxu0 %v10417_v4  ;;  %v7887_v4 = vld [vmem:[%s10652_s20 + $0x90] sm:$0xff] }
0x1133   : > { %7120 = vmatpush1.bf16.msra.mxu0 %v10415_v5  ;;  %v7888_v5 = vld [vmem:[%s10652_s20 + $0x98] sm:$0xff] }
0x1134   : > { %7722 = vmatprep.subr.bf16.mxu0 %v10423_v7 }
0x11d4   : > { %v6794_v11 = vpop.f32.mrb[52].mxu1 }
0x11d5   : > { %v6796_v19 = vpop.f32.mrb[53].mxu1 }
0x11d6   : > { %v6798_v34 = vpop.f32.mrb[54].mxu1  ;;  %6806 = vmatprep.subr.mxu1 %v6796_v19  ;;  %v10436_v19 = vld [vmem:[%s11606_s0 + $0x250] ss:$8 sps:$4 sm:$0xff]  }
0x11d7   : > { %v6799_v36 = vpop.f32.mrb[55].mxu1  ;;  %6807 = vmatpush1.msra.mxu1 %v6794_v11  ;;  %v10433_v11 = vld [vmem:[%s11606_s0 + $0x240] ss:$8 sps:$4 sm:$0xff]   ;;  %v10444_v34 = vld [vmem:[%s11606_s0 + $0x274] ss:$8 sps:$4 sm:$0xff]  }
0x11d8   : > { %9090 = vmatmul.mubr.msk.f32.vlgmr.msra.gmra.mrb[46].mxu1 %vm5160_vm2, %v9089_v21  ;;  %7324 = vmatprep.subr.bf16.mxu1 %v10330_v33  ;;  %v10438_v33 = vld [vmem:[%s11606_s0 + $0x254] ss:$8 sps:$4 sm:$0xff]   ;;  %v10441_v21 = vld [vmem:[%s11606_s0 + $0x264] ss:$8 sps:$4 sm:$0xff]  }
0x11d9   : > { %7325 = vmatpush1.bf16.msra.mxu1 %v10328_v22  ;;  %v10439_v22 = vld [vmem:[%s11606_s0 + $0x260] ss:$8 sps:$4 sm:$0xff]   ;;  %v10447_v36 = vld [vmem:[%s11606_s0 + $0x284] ss:$8 sps:$4 sm:$0xff]  }
0x11da   : > { %7326 = vmatprep.subr.bf16.mxu1 %v10336_v35  ;;  %v10442_v35 = vld [vmem:[%s11606_s0 + $0x270] ss:$8 sps:$4 sm:$0xff]  }
0x11dd   : > { %7327 = vmatpush1.bf16.msra.mxu1 %v10334_v37  ;;  %v10445_v37 = vld [vmem:[%s11606_s0 + $0x280] ss:$8 sps:$4 sm:$0xff]  }
0x11de   : > { %7328 = vmatprep.subr.bf16.mxu1 %v10342_v38  ;;  %v10450_v38 = vld [vmem:[%s11606_s0 + $0x294] ss:$8 sps:$4 sm:$0xff]  }
0x11e1   : > { %7329 = vmatpush1.bf16.msra.mxu1 %v10340_v39  ;;  %v10448_v39 = vld [vmem:[%s11606_s0 + $0x290] ss:$8 sps:$4 sm:$0xff]  }
0x11e2   : > { %7330 = vmatprep.subr.bf16.mxu1 %v10348_v9  ;;  %v10453_v9 = vld [vmem:[%s11606_s0 + $0x2a4] ss:$8 sps:$4 sm:$0xff]  }
0x11e5   : > { %7331 = vmatpush1.bf16.msra.mxu1 %v10346_v40  ;;  %v10451_v40 = vld [vmem:[%s11606_s0 + $0x2a0] ss:$8 sps:$4 sm:$0xff]  }
0x11e6   : > { %7332 = vmatprep.subr.bf16.mxu1 %v10354_v41  ;;  %v10456_v41 = vld [vmem:[%s11606_s0 + $0x2b4] ss:$8 sps:$4 sm:$0xff]  }
0x11e9   : > { %7333 = vmatpush1.bf16.msra.mxu1 %v10352_v42  ;;  %v10454_v42 = vld [vmem:[%s11606_s0 + $0x2b0] ss:$8 sps:$4 sm:$0xff]  }
0x11ea   : > { %7334 = vmatprep.subr.bf16.mxu1 %v10360_v43  ;;  %v10459_v43 = vld [vmem:[%s11606_s0 + $0x2c4] ss:$8 sps:$4 sm:$0xff]  }
0x11ed   : > { %7335 = vmatpush1.bf16.msra.mxu1 %v10358_v44  ;;  %v10457_v44 = vld [vmem:[%s11606_s0 + $0x2c0] ss:$8 sps:$4 sm:$0xff]  }
0x11ee   : > { %7336 = vmatprep.subr.bf16.mxu1 %v10366_v45  ;;  %v10462_v45 = vld [vmem:[%s11606_s0 + $0x2d4] ss:$8 sps:$4 sm:$0xff]  }
0x11f1   : > { %7337 = vmatpush1.bf16.msra.mxu1 %v10364_v46  ;;  %v10460_v46 = vld [vmem:[%s11606_s0 + $0x2d0] ss:$8 sps:$4 sm:$0xff]  }
0x11f2   : > { %7338 = vmatprep.subr.bf16.mxu1 %v10372_v47  ;;  %v10465_v47 = vld [vmem:[%s11606_s0 + $0x2e4] ss:$8 sps:$4 sm:$0xff]  }
0x11f5   : > { %7339 = vmatpush1.bf16.msra.mxu1 %v10370_v49  ;;  %v10463_v49 = vld [vmem:[%s11606_s0 + $0x2e0] ss:$8 sps:$4 sm:$0xff]  }
0x11f6   : > { %7340 = vmatprep.subr.bf16.mxu1 %v10378_v51  ;;  %v10468_v51 = vld [vmem:[%s11606_s0 + $0x2f4] ss:$8 sps:$4 sm:$0xff]  }
0x11f9   : > { %7341 = vmatpush1.bf16.msra.mxu1 %v10376_v52  ;;  %v10466_v52 = vld [vmem:[%s11606_s0 + $0x2f0] ss:$8 sps:$4 sm:$0xff]  }
0x11fa   : > { %7342 = vmatprep.subr.bf16.mxu1 %v10384_v53 }
0x11fd   : > { %7343 = vmatpush1.bf16.msra.mxu1 %v10382_v54 }
0x11fe   : > { %7344 = vmatprep.subr.bf16.mxu1 %v10390_v55 }
0x1201   : > { %7345 = vmatpush1.bf16.msra.mxu1 %v10388_v56 }
0x1202   : > { %7346 = vmatprep.subr.bf16.mxu1 %v10396_v57  ;;  %v9187_v57 = vld [vmem:[%s11608_s15 + $0x4] sm:$0xf] }
0x1205   : > { %7347 = vmatpush1.bf16.msra.mxu1 %v10394_v58 }
0x1206   : > { %7348 = vmatprep.subr.bf16.mxu1 %v10402_v59 }
0x1209   : > { %7349 = vmatpush1.bf16.msra.mxu1 %v10400_v60 }
0x120a   : > { %7350 = vmatprep.subr.bf16.mxu1 %v10408_v61 }
0x120d   : > { %7351 = vmatpush1.bf16.msra.mxu1 %v10406_v1  ;;  %v7130_v1 = vld [vmem:[%s11608_s15] sm:$0xf] }
0x120e   : > { %7352 = vmatprep.subr.bf16.mxu1 %v10414_v0  ;;  %v7869_v0 = vld [vmem:[%s10652_s20] sm:$0xff] }
0x1211   : > { %7353 = vmatpush1.bf16.msra.mxu1 %v10412_v3  ;;  %v7870_v3 = vld [vmem:[%s10652_s20 + $0x8] sm:$0xff] }
0x1212   : > { %7354 = vmatprep.subr.bf16.mxu1 %v10420_v12 }
0x1215   : > { %7355 = vmatpush1.bf16.msra.mxu1 %v10418_v6  ;;  %v9361_v6 = vpack.c.bf16 %v7886_v63, %v7885_v62 }
0x12ab   : > { %v6872_v14 = vpop.f32.mrb[46].mxu1 }
0x12ac   : > { %v6891_v15 = vadd.f32 %v6884_v10, %v6872_v14  ;;  %v6874_v16 = vpop.f32.mrb[47].mxu1  ;;  %v9363_v10 = vpack.c.bf16 %v7870_v3, %v7869_v0  ;;  %v9365_v14 = vpack.c.bf16 %v7888_v5, %v7887_v4  ;;  %v7971_v3 = vld [vmem:[%s10647_s6] sm:$0xff] }
0x12ad   : > { %v6892_v17 = vadd.f32 %v6888_v13, %v6874_v16  ;;  %v7872_v16 = vld [vmem:[%s10652_s20 + $0x18] sm:$0xff] }
0x12ae   : > { %v6893_v23 = vmax.f32 %v6891_v15, 0.0  ;;  %v7871_v15 = vld [vmem:[%s10652_s20 + $0x10] sm:$0xff] }
0x12af   : > { %v6894_v24 = vmax.f32 %v6892_v17, 0.0 }
0x12b0   : > { %v11481_v27 = vpack.c.bf16 %v6893_v23, %v6893_v23  ;;  %v7889_v23 = vld [vmem:[%s10652_s20 + $0xa0] sm:$0xff] }
0x12b1   : > { %v6896_v25 = vpack.c.bf16 %v6894_v24, %v6894_v24  ;;  %v7890_v24 = vld [vmem:[%s10652_s20 + $0xa8] sm:$0xff] }
0x12b3   : > { %7121 = vmatprep.mubr.bf16.mxu0 %v6896_v25  ;;  %7356 = vmatprep.mubr.bf16.mxu1 %v6896_v25 }
0x12b4   : > { %7122 = vmatmul.mubr.bf16.vlgmr.msra.gmra.mrb[48].mxu0 %v11481_v27  ;;  %7357 = vmatmul.mubr.bf16.vlgmr.msra.gmra.mrb[56].mxu1 %v11481_v27 }
0x12b5   : > { %7723 = vmatpush1.bf16.msra.mxu0 %v10421_v26  ;;  %7754 = vmatprep.mubr.bf16.mxu0 %v6896_v25  ;;  %v9367_v25 = vpack.c.bf16 %v7872_v16, %v7871_v15  ;;  %v9369_v26 = vpack.c.bf16 %v7890_v24, %v7889_v23 }
0x12b6   : > { %7724 = vmatprep.subr.bf16.mxu0 %v10426_v28  ;;  %7442 = vmatprep.mubr.f32.mxu1 %v10507_v20  ;;  %v7874_v28 = vld [vmem:[%s10652_s20 + $0x28] sm:$0xff] }
0x12b9   : > { %7725 = vmatpush1.bf16.msra.mxu0 %v10424_v30  ;;  %v7891_v30 = vld [vmem:[%s10652_s20 + $0xb0] sm:$0xff] }
0x12ba   : > { %7726 = vmatprep.subr.bf16.mxu0 %v10429_v18  ;;  %v7892_v18 = vld [vmem:[%s10652_s20 + $0xb8] sm:$0xff] }
0x12bd   : > { %7727 = vmatpush1.bf16.msra.mxu0 %v10427_v2 }
0x12be   : > { %7728 = vmatprep.subr.bf16.mxu0 %v10432_v29  ;;  %v9373_v29 = vpack.c.bf16 %v7892_v18, %v7891_v30 }
0x12c1   : > { %7729 = vmatpush1.bf16.msra.mxu0 %v10430_v31  ;;  %v7875_v31 = vld [vmem:[%s10652_s20 + $0x30] sm:$0xff] }
0x12c2   : > { %7730 = vmatprep.subr.bf16.mxu0 %v10435_v32  ;;  %v7876_v32 = vld [vmem:[%s10652_s20 + $0x38] sm:$0xff] }
0x12c5   : > { %7731 = vmatpush1.bf16.msra.mxu0 %v10433_v11  ;;  %v7893_v11 = vld [vmem:[%s10652_s20 + $0xc0] sm:$0xff] }
0x12c6   : > { %7732 = vmatprep.subr.bf16.mxu0 %v10438_v33  ;;  %v7894_v33 = vld [vmem:[%s10652_s20 + $0xc8] sm:$0xff] }
0x12c9   : > { %7733 = vmatpush1.bf16.msra.mxu0 %v10436_v19  ;;  %v9375_v19 = vpack.c.bf16 %v7876_v32, %v7875_v31 }
0x12ca   : > { %7734 = vmatprep.subr.bf16.mxu0 %v10441_v21  ;;  %v9377_v21 = vpack.c.bf16 %v7894_v33, %v7893_v11 }
0x12cd   : > { %7735 = vmatpush1.bf16.msra.mxu0 %v10439_v22  ;;  %v7877_v22 = vld [vmem:[%s10652_s20 + $0x40] sm:$0xff] }
0x12ce   : > { %7736 = vmatprep.subr.bf16.mxu0 %v10444_v34  ;;  %v7878_v34 = vld [vmem:[%s10652_s20 + $0x48] sm:$0xff] }
0x12d1   : > { %7737 = vmatpush1.bf16.msra.mxu0 %v10442_v35  ;;  %v7895_v35 = vld [vmem:[%s10652_s20 + $0xd0] sm:$0xff] }
0x12d2   : > { %7738 = vmatprep.subr.bf16.mxu0 %v10447_v36  ;;  %v7896_v36 = vld [vmem:[%s10652_s20 + $0xd8] sm:$0xff] }
0x12d5   : > { %7739 = vmatpush1.bf16.msra.mxu0 %v10445_v37  ;;  %v9379_v37 = vpack.c.bf16 %v7878_v34, %v7877_v22 }
0x12d6   : > { %7740 = vmatprep.subr.bf16.mxu0 %v10450_v38  ;;  %v9381_v38 = vpack.c.bf16 %v7896_v36, %v7895_v35 }
0x12d9   : > { %7741 = vmatpush1.bf16.msra.mxu0 %v10448_v39  ;;  %v7879_v39 = vld [vmem:[%s10652_s20 + $0x50] sm:$0xff] }
0x12da   : > { %7742 = vmatprep.subr.bf16.mxu0 %v10453_v9  ;;  %v7880_v9 = vld [vmem:[%s10652_s20 + $0x58] sm:$0xff] }
0x12dd   : > { %7743 = vmatpush1.bf16.msra.mxu0 %v10451_v40  ;;  %v7897_v40 = vld [vmem:[%s10652_s20 + $0xe0] sm:$0xff] }
0x12de   : > { %7744 = vmatprep.subr.bf16.mxu0 %v10456_v41  ;;  %v7898_v41 = vld [vmem:[%s10652_s20 + $0xe8] sm:$0xff] }
0x12e1   : > { %7745 = vmatpush1.bf16.msra.mxu0 %v10454_v42  ;;  %v9383_v42 = vpack.c.bf16 %v7880_v9, %v7879_v39 }
0x12e2   : > { %7746 = vmatprep.subr.bf16.mxu0 %v10459_v43  ;;  %v9385_v43 = vpack.c.bf16 %v7898_v41, %v7897_v40 }
0x12e5   : > { %7747 = vmatpush1.bf16.msra.mxu0 %v10457_v44  ;;  %v7881_v44 = vld [vmem:[%s10652_s20 + $0x60] sm:$0xff] }
0x12e6   : > { %7748 = vmatprep.subr.bf16.mxu0 %v10462_v45  ;;  %v7882_v45 = vld [vmem:[%s10652_s20 + $0x68] sm:$0xff] }
0x12e9   : > { %7749 = vmatpush1.bf16.msra.mxu0 %v10460_v46  ;;  %v9387_v46 = vpack.c.bf16 %v7882_v45, %v7881_v44 }
0x12ea   : > { %7750 = vmatprep.subr.bf16.mxu0 %v10465_v47  ;;  %v7899_v47 = vld [vmem:[%s10652_s20 + $0xf0] sm:$0xff] }
0x12ed   : > { %7751 = vmatpush1.bf16.msra.mxu0 %v10463_v49  ;;  %v7900_v49 = vld [vmem:[%s10652_s20 + $0xf8] sm:$0xff] }
0x12ee   : > { %7752 = vmatprep.subr.bf16.mxu0 %v10468_v51  ;;  %v9389_v51 = vpack.c.bf16 %v7900_v49, %v7899_v47 }
0x12f1   : > { %7753 = vmatpush1.bf16.msra.mxu0 %v10466_v52  ;;  %v7883_v52 = vld [vmem:[%s10652_s20 + $0x70] sm:$0xff] }
0x12f2   : > { %9304 = vmatprep.subr.mxu0 %v10507_v20 }
0x12f4   : > { %7755 = vmatmul.mubr.bf16.vlgmr.msra.gmra.mrb[52].mxu0 %v11481_v27  ;;  %v7873_v27 = vld [vmem:[%s10652_s20 + $0x20] sm:$0xff] }
0x12f5   : > { %v9371_v2 = vpack.c.bf16 %v7874_v28, %v7873_v27  ;;  %9306 = vmatprep.mubr.msk.f32.mxu0 %vm10508_vm5, %v10507_v20 }
0x1387   : > { %v7123_v53 = vpop.f32.mrb[48].mxu0  ;;  %v7358_v54 = vpop.f32.mrb[56].mxu1 }
0x1388   : > { %v7125_v55 = vpop.f32.mrb[49].mxu0  ;;  %v7360_v56 = vpop.f32.mrb[57].mxu1 }
0x1389   : > { %v7127_v58 = vpop.f32.mrb[50].mxu0  ;;  %v7362_v59 = vpop.f32.mrb[58].mxu1  ;;  %9188 = vmatprep.subr.msk.mxu1 %vm7371_vm3, %v7360_v56 }
0x138a   : > { %v7128_v60 = vpop.f32.mrb[51].mxu0  ;;  %v7363_v61 = vpop.f32.mrb[59].mxu1  ;;  %9189 = vmatpush1.msk.msra.mxu1 %vm7371_vm3, %v7358_v54 }
0x138b   : > { %9191 = vmatprep.subr.msk.mxu1 %vm7371_vm3, %v7125_v55  ;;  %9190 = vmatmul.mubr.msk.f32.vlgmr.msra.gmra.mrb[44].mxu1 %vm7367_vm4, %v9187_v57  ;;  %v7847_v55 = vld [vmem:[%s11609_s18] sm:$0x3] }
0x138c   : > { %9192 = vmatpush1.msk.msra.mxu1 %vm7371_vm3, %v7123_v53  ;;  %7522 = vmatprep.mubr.f32.mxu1 %v10507_v20  ;;  %v7884_v53 = vld [vmem:[%s10652_s20 + $0x78] sm:$0xff]  ;;  %v7852_v56 = vrot.slane %v7847_v55, %v10779_v48  ;;  %v7856_v57 = vrot.slane %v7847_v55, %v10782_v50  ;;  %v9262_v50 = vld [vmem:[%s10657_s30] ss:$0 sm:$0xff] }
0x138d   : > { %v9391_v54 = vpack.c.bf16 %v7884_v53, %v7883_v52 }
0x1393   : > { %9193 = vmatmul.mubr.msk.f32.vlgmr.msra.gmra.mrb[44].mxu1 %vm7367_vm4, %v7130_v1 }
0x1394   : > { %7838 = vmatprep.mubr.f32.mxu1 %v10507_v20 }
0x13c7   : > { %v7756_v12 = vpop.f32.mrb[52].mxu0 }
0x13c8   : > { %v7758_v7 = vpop.f32.mrb[53].mxu0 }
0x13c9   : > { %v7760_v13 = vpop.f32.mrb[54].mxu0  ;;  %9259 = vmatprep.subr.msk.mxu1 %vm7371_vm3, %v7758_v7 }
0x13ca   : > { %v7761_v17 = vpop.f32.mrb[55].mxu0  ;;  %9260 = vmatpush1.msk.msra.mxu1 %vm7371_vm3, %v7756_v12 }
0x13cb   : > { %9261 = vmatmul.mubr.msk.f32.vlgmr.msra.gmra.mrb[44].mxu1 %vm7367_vm4, %v9258_v8  ;;  %9362 = vmatprep.subr.bf16.mxu1 %v9361_v6 }
0x13cc   : > { %9364 = vmatpush3.bf16.msra.mxu1 %v9363_v10 }
0x13cd   : > { %9366 = vmatprep.subr.bf16.mxu1 %v9365_v14 }
0x13d0   : > { %9368 = vmatpush3.bf16.msra.mxu1 %v9367_v25 }
0x13d1   : > { %9370 = vmatprep.subr.bf16.mxu1 %v9369_v26 }
0x13d4   : > { %9372 = vmatpush3.bf16.msra.mxu1 %v9371_v2 }
0x13d5   : > { %9374 = vmatprep.subr.bf16.mxu1 %v9373_v29 }
0x13d8   : > { %9376 = vmatpush3.bf16.msra.mxu1 %v9375_v19 }
0x13d9   : > { %9378 = vmatprep.subr.bf16.mxu1 %v9377_v21 }
0x13dc   : > { %9380 = vmatpush3.bf16.msra.mxu1 %v9379_v37 }
0x13dd   : > { %9382 = vmatprep.subr.bf16.mxu1 %v9381_v38 }
0x13e0   : > { %9384 = vmatpush3.bf16.msra.mxu1 %v9383_v42 }
0x13e1   : > { %9386 = vmatprep.subr.bf16.mxu1 %v9385_v43 }
0x13e4   : > { %9388 = vmatpush3.bf16.msra.mxu1 %v9387_v46 }
0x13e5   : > { %9390 = vmatprep.subr.bf16.mxu1 %v9389_v51 }
0x13e8   : > { %9392 = vmatpush3.bf16.msra.mxu1 %v9391_v54 }
0x149e   : > { %v7840_v58 = vpop.f32.mrb[44].mxu1 }
0x149f   : > { %v9399_v59 = vadd.f32 %v7852_v56, %v7840_v58  ;;  %v7842_v60 = vpop.f32.mrb[45].mxu1 }
0x14a0   : > { %v9400_v61 = vadd.f32 %v7856_v57, %v7842_v60 }
0x14a1   : > { %v7863_v62 = vmax.f32 %v9399_v59, 0.0 }
0x14a2   : > { %v7864_v1 = vmax.f32 %v9400_v61, 0.0 }
0x14a4   : > { %7965 = vmatprep.mubr.f32.mxu1 %v7864_v1 }
0x14a5   : > { %7966 = vmatmul.mubr.f32.vlgmr.msra.gmra.mrb[60].mxu1 %v7863_v62 }
0x1578   : > { %v9299_v63 = vpop.f32.mrb[60].mxu1 }
0x1579   : > { %v9300_v0 = vpop.f32.mrb[61].mxu1 }
0x157a   : > { %v9301_v48 = vadd.f32 %v9300_v0, %v9299_v63 }
0x157c   : > { %9305 = vmatpush3.msk.msra.mxu0 %vm7371_vm3, %v9301_v48 }
0x157d   : > { %9307 = vmatmul.mubr.msk.f32.vlgmr.msra.gmra.mrb[56].mxu0 %vm7367_vm4, %v7971_v3 }
0x1650   : > { %v8051_v4 = vpop.f32.mrb[56].mxu0 }
0x1651   : > { %v8052_v5 = vadd.f32 %v9262_v50, %v8051_v4  ;;  %v9308_v12 = vpop.f32.mrb[57].mxu0 }
0x1653   : > { %8055 = vst [vmem:[%s902_s1] sm:$0xff] %v8052_v5 }
0x1654 PF: > { %s69_s7 = sadd.s32 1, %s10475_s7  }
0x1655   : > { %p66_p5 = scmp.ge.s32.totalorder %s69_s7, 4  }
0x1657   :  { %68 = sbr.rel (!%p66_p5) target bundleno = 47 (0x2f), region = 223 }

</bundles_post_ra>
